<compile_context>
chip_gen: v7x
topology: tpu7x:2x2x1
jax: 0.10.0
libtpu: 0.0.40
codegen_flags: <defaults>
</compile_context>

<pallas_src>
import jax
import jax.numpy as jnp
from jax.experimental import pallas as pl
from jax.experimental.pallas import tpu as pltpu


# ----------------------------------------------------------------------------
# Kernel 1: per-point MLP 3->64->64 (local feat) ->128->1024, max over points.
# Activations are (channels, tn) tiles; the max over points is kept as a
# lane-dense (1024, 128) partial max that stays resident across the n axis.
# ----------------------------------------------------------------------------
def stage1_kernel(x_ref, w1, b1, w2, b2, w3, b3, w4, local_ref, gmax_ref):
    n = pl.program_id(2)                                    # reduction axis (last)
    tn = x_ref.shape[-1]
    d_glob = gmax_ref.shape[1]                              # 1024
    n_sub = tn // 128
    CH = 256                                                # layer-4 output-row chunk
    n_chunks = d_glob // CH

    x = x_ref[0]                                            # (8, tn) bf16, rows 3..7 = 0
    # Layer 1 (3 -> 64, zero-padded to K=8) on the MXU (frees the VALU slot on v6e/v7x).
    l1 = jnp.maximum(
        jnp.dot(w1[...], x, preferred_element_type=jnp.float32) + b1[...], 0.0)

    l2 = jnp.maximum(
        jnp.dot(w2[...], l1.astype(jnp.bfloat16),
                preferred_element_type=jnp.float32) + b2[...], 0.0)     # (64, tn)
    local_ref[0] = l2.astype(local_ref.dtype)               # local_feat tile (bf16)

    h3 = jnp.maximum(
        jnp.dot(w3[...], l2.astype(jnp.bfloat16),
                preferred_element_type=jnp.float32) + b3[...], 0.0)     # (128, tn)
    h3b = h3.astype(jnp.bfloat16)

    @pl.when(n == 0)
    def _():
        gmax_ref[0] = jnp.full(gmax_ref.shape[1:], -jnp.inf, gmax_ref.dtype)

    # Layer 4 (128 -> 1024), chunked over output rows; bias + ReLU deferred past the
    # max (applied in the wrapper).  The per-chunk partial max over lane-groups is a
    # pure VPU elementwise max (static 128-lane slices, no cross-lane reduce) and the
    # accumulator stores are full-width (CH, 128) — no masked 1-lane stores.
    for c in range(n_chunks):
        z = jnp.dot(w4[c * CH:(c + 1) * CH, :], h3b,
                    preferred_element_type=jnp.float32)     # (CH, tn)
        acc = gmax_ref[0, c * CH:(c + 1) * CH, :]           # (CH, 128)
        for g in range(n_sub):
            acc = jnp.maximum(acc, z[:, g * 128:(g + 1) * 128])
        gmax_ref[0, c * CH:(c + 1) * CH, :] = acc


def pointnet12_max(pts_t, w1t, b1c, w2t, b2c, w3t, b3c, w4t, *, tn, n_split):
    B, _, N_pad = pts_t.shape
    assert N_pad % (n_split * tn) == 0 and tn % 128 == 0
    d_local = w2t.shape[0]
    d_glob = w4t.shape[0]
    tiles = N_pad // (n_split * tn)                         # tiles per N-split

    def full_spec(a):
        return pl.BlockSpec(a.shape, lambda s, b, n: (0,) * a.ndim)

    grid_spec = pltpu.PrefetchScalarGridSpec(
        num_scalar_prefetch=0,
        grid=(n_split, B, tiles),
        in_specs=[
            pl.BlockSpec((1, 8, tn), lambda s, b, n: (b, 0, s * tiles + n)),
            full_spec(w1t), full_spec(b1c),
            full_spec(w2t), full_spec(b2c),
            full_spec(w3t), full_spec(b3c),
            full_spec(w4t),
        ],
        out_specs=[
            pl.BlockSpec((1, d_local, tn), lambda s, b, n: (b, 0, s * tiles + n)),
            # One lane-dense 128-wide slab per (batch, split); resident across n.
            pl.BlockSpec((1, d_glob, 128), lambda s, b, n: (b, 0, s)),
        ],
    )
    return pl.pallas_call(
        stage1_kernel,
        out_shape=(jax.ShapeDtypeStruct((B, d_local, N_pad), jnp.bfloat16),
                   jax.ShapeDtypeStruct((B, d_glob, n_split * 128), jnp.float32)),
        grid_spec=grid_spec,
        compiler_params=pltpu.CompilerParams(
            dimension_semantics=("parallel", "parallel", "arbitrary"),
            vmem_limit_bytes=32 * 1024 * 1024),
    )(pts_t, w1t, b1c, w2t, b2c, w3t, b3c, w4t)


# ----------------------------------------------------------------------------
# Kernel 2: segmentation head.  The 1088->512 concat matmul is split:
#   relu(cat @ W5 + b5) == relu(W5_local^T @ local + (global @ W5_global + b5))
# The per-batch global term `gb` (512, 1) is precomputed in the wrapper.
# ----------------------------------------------------------------------------
def stage2_kernel(local_ref, gb_ref, w5, w6, b6, w7, b7, w8, b8, out_ref):
    local = local_ref[0]                                    # (64, tn) bf16
    gb = gb_ref[0]                                          # (512, 1) f32

    h1 = jnp.maximum(
        jnp.dot(w5[...], local, preferred_element_type=jnp.float32) + gb, 0.0)
    h2 = jnp.maximum(
        jnp.dot(w6[...], h1.astype(jnp.bfloat16),
                preferred_element_type=jnp.float32) + b6[...], 0.0)
    h3 = jnp.maximum(
        jnp.dot(w7[...], h2.astype(jnp.bfloat16),
                preferred_element_type=jnp.float32) + b7[...], 0.0)
    out = jnp.dot(w8[...], h3.astype(jnp.bfloat16),
                  preferred_element_type=jnp.float32) + b8[...]         # (8, tn)
    out_ref[0] = out.astype(out_ref.dtype)


def seg_head(local_t, gb, w5lt, w6t, b6c, w7t, b7c, w8t, b8c, *, tn):
    B, d_local, N_pad = local_t.shape
    assert N_pad % tn == 0 and tn % 128 == 0
    num_out = w8t.shape[0]

    def full_spec(a):
        return pl.BlockSpec(a.shape, lambda b, n: (0,) * a.ndim)

    grid_spec = pltpu.PrefetchScalarGridSpec(
        num_scalar_prefetch=0,
        grid=(B, N_pad // tn),
        in_specs=[
            pl.BlockSpec((1, d_local, tn), lambda b, n: (b, 0, n)),
            pl.BlockSpec((1, gb.shape[1], 1), lambda b, n: (b, 0, 0)),
            full_spec(w5lt),
            full_spec(w6t), full_spec(b6c),
            full_spec(w7t), full_spec(b7c),
            full_spec(w8t), full_spec(b8c),
        ],
        out_specs=pl.BlockSpec((1, num_out, tn), lambda b, n: (b, 0, n)),
    )
    return pl.pallas_call(
        stage2_kernel,
        out_shape=jax.ShapeDtypeStruct((B, num_out, N_pad), jnp.float32),
        grid_spec=grid_spec,
        compiler_params=pltpu.CompilerParams(
            dimension_semantics=("parallel", "parallel"),
            vmem_limit_bytes=32 * 1024 * 1024),
    )(local_t, gb, w5lt, w6t, b6c, w7t, b7c, w8t, b8c)


# ----------------------------------------------------------------------------
# Full forward (matches seg_model.forward); handles arbitrary N via edge padding.
# ----------------------------------------------------------------------------
@jax.jit
def seg_model_forward(points, params):
    (W1, b1), (W2, b2), (W3, b3), (W4, b4), (W5, b5), (W6, b6), (W7, b7), (W8, b8) = params
    B, N, _ = points.shape
    d_local = W2.shape[1]                       # 64
    num_seg = W8.shape[1]
    num_out = num_seg + (-num_seg) % 8          # pad class dim for unmasked stores
    bf16 = jnp.bfloat16

    # --- Tiling: split N into n_split independent halves (keeps both v7x TCs busy for
    # small/odd B), pad N up to a multiple of the tile by duplicating the last point
    # (max over points unchanged; padded rows sliced off at the end). ---
    n_split = 2 if N >= 256 else 1
    n_half = -(-N // n_split)
    n_half = -(-n_half // 128) * 128            # multiple of 128
    tn = min(2048, n_half)                      # big tile; fits 32 MiB scoped VMEM
    n_half = -(-n_half // tn) * tn              # multiple of tn
    N_pad = n_split * n_half

    # Points: (B, N, 3) -> channels-major (B, 8, N_pad) bf16 (zero-padded channels).
    pts = jnp.pad(points, ((0, 0), (0, N_pad - N), (0, 0)), mode="edge")
    pts_t = jnp.transpose(pts, (0, 2, 1))                               # (B, 3, N_pad)
    pts_t = jnp.pad(pts_t, ((0, 0), (0, 8 - 3), (0, 0))).astype(bf16)   # (B, 8, N_pad)

    # Kernel-facing params: (out, in) bf16 weights, (out, 1) f32 biases.
    w1t = jnp.pad(W1, ((0, 8 - 3), (0, 0))).T.astype(bf16)              # (64, 8)
    b1c = b1[:, None]
    w2t, b2c = W2.T.astype(bf16), b2[:, None]
    w3t, b3c = W3.T.astype(bf16), b3[:, None]
    w4t = W4.T.astype(bf16)                     # (1024, 128); b4 applied after the max
    w5l, w5g = W5[:d_local], W5[d_local:]       # split the concat (1088 -> 512) matmul
    w5lt = w5l.T.astype(bf16)
    w6t, b6c = W6.T.astype(bf16), b6[:, None]
    w7t, b7c = W7.T.astype(bf16), b7[:, None]
    w8t = jnp.pad(W8, ((0, 0), (0, num_out - num_seg))).T.astype(bf16)  # (8, 128)
    b8c = jnp.pad(b8, (0, num_out - num_seg))[:, None]                  # (8, 1)

    local_t, gmax = pointnet12_max(pts_t, w1t, b1c, w2t, b2c, w3t, b3c, w4t,
                                   tn=tn, n_split=n_split)

    # Final 128-lane / split-slab reduce, deferred layer-4 bias + ReLU, and the
    # per-batch global half of layer 5 (tiny; left to XLA on purpose).
    zmax = jnp.max(gmax, axis=-1)                                       # (B, 1024)
    global_feat = jnp.maximum(zmax + b4[None, :], 0.0)
    gb = (global_feat @ w5g + b5)[:, :, None]                           # (B, 512, 1)

    out_t = seg_head(local_t, gb, w5lt, w6t, b6c, w7t, b7c, w8t, b8c, tn=tn)
    return jnp.transpose(out_t[:, :num_seg, :N], (0, 2, 1))             # (B, N, 6)


# ----------------------------------------------------------------------------
# Parameter init (PyTorch-Linear-style uniform +-1/sqrt(fan_in)); W stored (in, out)
# ----------------------------------------------------------------------------
def init_linear(key, fan_in, fan_out):
    kw, kb = jax.random.split(key)
    bound = 1.0 / jnp.sqrt(fan_in)
    w = jax.random.uniform(kw, (fan_in, fan_out), jnp.float32, -bound, bound)
    b = jax.random.uniform(kb, (fan_out,), jnp.float32, -bound, bound)
    return w, b


def make_params(key, num_seg_classes=6):
    dims = [(3, 64), (64, 64), (64, 128), (128, 1024),
            (1088, 512), (512, 256), (256, 128), (128, num_seg_classes)]
    keys = jax.random.split(key, len(dims))
    return tuple(init_linear(k, fi, fo) for k, (fi, fo) in zip(keys, dims))


# Pure-JAX reference (mirrors the PyTorch module)
def seg_model_ref(points, params):
    (W1, b1), (W2, b2), (W3, b3), (W4, b4), (W5, b5), (W6, b6), (W7, b7), (W8, b8) = params
    B, N, _ = points.shape
    l = jnp.maximum(points @ W1 + b1, 0.0)
    l = jnp.maximum(l @ W2 + b2, 0.0)                       # local_feat (B, N, 64)
    h = jnp.maximum(l @ W3 + b3, 0.0)
    h = jnp.maximum(h @ W4 + b4, 0.0)                       # (B, N, 1024)
    g = jnp.max(h, axis=1)                                  # (B, 1024)
    cat = jnp.concatenate(
        [l, jnp.broadcast_to(g[:, None, :], (B, N, g.shape[-1]))], axis=-1)
    h = jnp.maximum(cat @ W5 + b5, 0.0)
    h = jnp.maximum(h @ W6 + b6, 0.0)
    h = jnp.maximum(h @ W7 + b7, 0.0)
    return h @ W8 + b8


if __name__ == "__main__":
    key = jax.random.PRNGKey(0)
    k_pts, k_par = jax.random.split(key)

    # Small shapes; N deliberately not a multiple of 128 to exercise the padding path.
    B, N, num_seg = 2, 500, 6
    points = jax.random.normal(k_pts, (B, N, 3), dtype=jnp.float32)
    params = make_params(k_par, num_seg_classes=num_seg)

    out = seg_model_forward(points, params)
    out = jax.block_until_ready(out)

    ref = seg_model_ref(points, params)
    assert out.shape == (B, N, num_seg), out.shape
    # bf16 matmul operands (incl. the bf16 layer-1 MXU path) with f32 accumulation ->
    # relaxed tolerance vs the f32 reference.
    assert jnp.allclose(out, ref, atol=3e-2, rtol=3e-2)

    print("KERNEL_OK")
</pallas_src>

<mosaic_0001>
module attributes {stable_mosaic.version = 11 : i64} {
  func.func @stage1_kernel(%arg0: i32, %arg1: i32, %arg2: i32, %arg3: memref<1x8x256xbf16, #tpu.memory_space<vmem>>, %arg4: memref<64x8xbf16, #tpu.memory_space<vmem>>, %arg5: memref<64x1xf32, #tpu.memory_space<vmem>>, %arg6: memref<64x64xbf16, #tpu.memory_space<vmem>>, %arg7: memref<64x1xf32, #tpu.memory_space<vmem>>, %arg8: memref<128x64xbf16, #tpu.memory_space<vmem>>, %arg9: memref<128x1xf32, #tpu.memory_space<vmem>>, %arg10: memref<1024x128xbf16, #tpu.memory_space<vmem>>, %arg11: memref<1x64x256xbf16, #tpu.memory_space<vmem>>, %arg12: memref<1x1024x128xf32, #tpu.memory_space<vmem>>) attributes {dimension_semantics = [#tpu.dimension_semantics<parallel>, #tpu.dimension_semantics<parallel>, #tpu.dimension_semantics<arbitrary>], iteration_bounds = array<i64: 2, 2, 1>, scalar_prefetch = 0 : i64, scratch_operands = 0 : i64, tpu.core_type = #tpu.core_type<tc>, window_params = [{transform_indices = @transform_0, window_bounds = array<i64: 1, 8, 256>}, {pipeline_mode = #tpu.pipeline_mode<synchronous>, transform_indices = @transform_1, window_bounds = array<i64: 64, 8>}, {pipeline_mode = #tpu.pipeline_mode<synchronous>, transform_indices = @transform_2, window_bounds = array<i64: 64, 1>}, {pipeline_mode = #tpu.pipeline_mode<synchronous>, transform_indices = @transform_3, window_bounds = array<i64: 64, 64>}, {pipeline_mode = #tpu.pipeline_mode<synchronous>, transform_indices = @transform_4, window_bounds = array<i64: 64, 1>}, {pipeline_mode = #tpu.pipeline_mode<synchronous>, transform_indices = @transform_5, window_bounds = array<i64: 128, 64>}, {pipeline_mode = #tpu.pipeline_mode<synchronous>, transform_indices = @transform_6, window_bounds = array<i64: 128, 1>}, {pipeline_mode = #tpu.pipeline_mode<synchronous>, transform_indices = @transform_7, window_bounds = array<i64: 1024, 128>}, {transform_indices = @transform_8, window_bounds = array<i64: 1, 64, 256>}, {transform_indices = @transform_9, window_bounds = array<i64: 1, 1024, 128>}]} {
    %c0 = arith.constant 0 : index
    %c0_0 = arith.constant 0 : index
    %c0_1 = arith.constant 0 : index
    %0 = vector.load %arg3[%c0, %c0_0, %c0_1] : memref<1x8x256xbf16, #tpu.memory_space<vmem>>, vector<1x8x256xbf16>
    %1 = vector.shape_cast %0 : vector<1x8x256xbf16> to vector<8x256xbf16>
    %c0_2 = arith.constant 0 : index
    %c0_3 = arith.constant 0 : index
    %2 = vector.load %arg4[%c0_2, %c0_3] : memref<64x8xbf16, #tpu.memory_space<vmem>>, vector<64x8xbf16>
    %cst = arith.constant dense<0.000000e+00> : vector<64x256xf32>
    %3 = tpu.matmul %2, %1, %cst {dimension_numbers = #tpu.dot_dimension_numbers<[1], [0], [0], [1], [0, 0, 1, 1], [], []>} : vector<64x8xbf16>, vector<8x256xbf16>, vector<64x256xf32> -> vector<64x256xf32>
    %c0_4 = arith.constant 0 : index
    %c0_5 = arith.constant 0 : index
    %4 = vector.load %arg5[%c0_4, %c0_5] : memref<64x1xf32, #tpu.memory_space<vmem>>, vector<64x1xf32>
    %5 = vector.broadcast %4 : vector<64x1xf32> to vector<64x256xf32>
    %6 = arith.addf %3, %5 : vector<64x256xf32>
    %cst_6 = arith.constant 0.000000e+00 : f32
    %7 = vector.broadcast %cst_6 : f32 to vector<64x256xf32>
    %8 = arith.maximumf %6, %7 : vector<64x256xf32>
    %c0_7 = arith.constant 0 : index
    %c0_8 = arith.constant 0 : index
    %9 = vector.load %arg6[%c0_7, %c0_8] : memref<64x64xbf16, #tpu.memory_space<vmem>>, vector<64x64xbf16>
    %10 = arith.truncf %8 : vector<64x256xf32> to vector<64x256xbf16>
    %cst_9 = arith.constant dense<0.000000e+00> : vector<64x256xf32>
    %11 = tpu.matmul %9, %10, %cst_9 {dimension_numbers = #tpu.dot_dimension_numbers<[1], [0], [0], [1], [0, 0, 1, 1], [], []>} : vector<64x64xbf16>, vector<64x256xbf16>, vector<64x256xf32> -> vector<64x256xf32>
    %c0_10 = arith.constant 0 : index
    %c0_11 = arith.constant 0 : index
    %12 = vector.load %arg7[%c0_10, %c0_11] : memref<64x1xf32, #tpu.memory_space<vmem>>, vector<64x1xf32>
    %13 = vector.broadcast %12 : vector<64x1xf32> to vector<64x256xf32>
    %14 = arith.addf %11, %13 : vector<64x256xf32>
    %cst_12 = arith.constant 0.000000e+00 : f32
    %15 = vector.broadcast %cst_12 : f32 to vector<64x256xf32>
    %16 = arith.maximumf %14, %15 : vector<64x256xf32>
    %17 = arith.truncf %16 : vector<64x256xf32> to vector<64x256xbf16>
    %c0_13 = arith.constant 0 : index
    %c0_14 = arith.constant 0 : index
    %c0_15 = arith.constant 0 : index
    %18 = vector.load %arg11[%c0_13, %c0_14, %c0_15] : memref<1x64x256xbf16, #tpu.memory_space<vmem>>, vector<1x64x256xbf16>
    %19 = vector.shape_cast %18 : vector<1x64x256xbf16> to vector<64x256xbf16>
    %20 = vector.shape_cast %17 : vector<64x256xbf16> to vector<1x64x256xbf16>
    tpu.vector_store %arg11[%c0_13, %c0_14, %c0_15], %20 {strides = array<i32>} : memref<1x64x256xbf16, #tpu.memory_space<vmem>>, vector<1x64x256xbf16>,
    %c0_16 = arith.constant 0 : index
    %c0_17 = arith.constant 0 : index
    %21 = vector.load %arg8[%c0_16, %c0_17] : memref<128x64xbf16, #tpu.memory_space<vmem>>, vector<128x64xbf16>
    %22 = arith.truncf %16 : vector<64x256xf32> to vector<64x256xbf16>
    %cst_18 = arith.constant dense<0.000000e+00> : vector<128x256xf32>
    %23 = tpu.matmul %21, %22, %cst_18 {dimension_numbers = #tpu.dot_dimension_numbers<[1], [0], [0], [1], [0, 0, 1, 1], [], []>} : vector<128x64xbf16>, vector<64x256xbf16>, vector<128x256xf32> -> vector<128x256xf32>
    %c0_19 = arith.constant 0 : index
    %c0_20 = arith.constant 0 : index
    %24 = vector.load %arg9[%c0_19, %c0_20] : memref<128x1xf32, #tpu.memory_space<vmem>>, vector<128x1xf32>
    %25 = vector.broadcast %24 : vector<128x1xf32> to vector<128x256xf32>
    %26 = arith.addf %23, %25 : vector<128x256xf32>
    %cst_21 = arith.constant 0.000000e+00 : f32
    %27 = vector.broadcast %cst_21 : f32 to vector<128x256xf32>
    %28 = arith.maximumf %26, %27 : vector<128x256xf32>
    %29 = arith.truncf %28 : vector<128x256xf32> to vector<128x256xbf16>
    %c0_i32 = arith.constant 0 : i32
    %30 = arith.cmpi eq, %arg2, %c0_i32 : i32
    %31 = arith.extui %30 : i1 to i32
    %c0_i32_22 = arith.constant 0 : i32
    %32 = arith.cmpi ne, %31, %c0_i32_22 : i32
    scf.if %32 {
      %cst_56 = arith.constant 0xFF800000 : f32
      %77 = vector.broadcast %cst_56 : f32 to vector<1024x128xf32>
      %c0_57 = arith.constant 0 : index
      %c0_58 = arith.constant 0 : index
      %c0_59 = arith.constant 0 : index
      %78 = vector.load %arg12[%c0_57, %c0_58, %c0_59] : memref<1x1024x128xf32, #tpu.memory_space<vmem>>, vector<1x1024x128xf32>
      %79 = vector.shape_cast %78 : vector<1x1024x128xf32> to vector<1024x128xf32>
      %80 = vector.shape_cast %77 : vector<1024x128xf32> to vector<1x1024x128xf32>
      tpu.vector_store %arg12[%c0_57, %c0_58, %c0_59], %80 {strides = array<i32>} : memref<1x1024x128xf32, #tpu.memory_space<vmem>>, vector<1x1024x128xf32>,
    } else {
    }
    %c0_23 = arith.constant 0 : index
    %c0_24 = arith.constant 0 : index
    %33 = vector.load %arg10[%c0_23, %c0_24] : memref<1024x128xbf16, #tpu.memory_space<vmem>>, vector<256x128xbf16>
    %cst_25 = arith.constant dense<0.000000e+00> : vector<256x256xf32>
    %34 = tpu.matmul %33, %29, %cst_25 {dimension_numbers = #tpu.dot_dimension_numbers<[1], [0], [0], [1], [0, 0, 1, 1], [], []>} : vector<256x128xbf16>, vector<128x256xbf16>, vector<256x256xf32> -> vector<256x256xf32>
    %c0_26 = arith.constant 0 : index
    %c0_27 = arith.constant 0 : index
    %c0_28 = arith.constant 0 : index
    %35 = vector.load %arg12[%c0_26, %c0_27, %c0_28] : memref<1x1024x128xf32, #tpu.memory_space<vmem>>, vector<1x256x128xf32>
    %36 = vector.shape_cast %35 : vector<1x256x128xf32> to vector<256x128xf32>
    %37 = vector.extract_strided_slice %34 {offsets = [0, 0], sizes = [256, 128], strides = [1, 1]} : vector<256x256xf32> to vector<256x128xf32>
    %38 = arith.maximumf %36, %37 : vector<256x128xf32>
    %39 = vector.extract_strided_slice %34 {offsets = [0, 128], sizes = [256, 128], strides = [1, 1]} : vector<256x256xf32> to vector<256x128xf32>
    %40 = arith.maximumf %38, %39 : vector<256x128xf32>
    %c0_29 = arith.constant 0 : index
    %c0_30 = arith.constant 0 : index
    %c0_31 = arith.constant 0 : index
    %41 = vector.load %arg12[%c0_29, %c0_30, %c0_31] : memref<1x1024x128xf32, #tpu.memory_space<vmem>>, vector<1x256x128xf32>
    %42 = vector.shape_cast %41 : vector<1x256x128xf32> to vector<256x128xf32>
    %43 = vector.shape_cast %40 : vector<256x128xf32> to vector<1x256x128xf32>
    tpu.vector_store %arg12[%c0_29, %c0_30, %c0_31], %43 {strides = array<i32>} : memref<1x1024x128xf32, #tpu.memory_space<vmem>>, vector<1x256x128xf32>,
    %c256 = arith.constant 256 : index
    %c0_32 = arith.constant 0 : index
    %44 = vector.load %arg10[%c256, %c0_32] : memref<1024x128xbf16, #tpu.memory_space<vmem>>, vector<256x128xbf16>
    %cst_33 = arith.constant dense<0.000000e+00> : vector<256x256xf32>
    %45 = tpu.matmul %44, %29, %cst_33 {dimension_numbers = #tpu.dot_dimension_numbers<[1], [0], [0], [1], [0, 0, 1, 1], [], []>} : vector<256x128xbf16>, vector<128x256xbf16>, vector<256x256xf32> -> vector<256x256xf32>
    %c0_34 = arith.constant 0 : index
    %c256_35 = arith.constant 256 : index
    %c0_36 = arith.constant 0 : index
    %46 = vector.load %arg12[%c0_34, %c256_35, %c0_36] : memref<1x1024x128xf32, #tpu.memory_space<vmem>>, vector<1x256x128xf32>
    %47 = vector.shape_cast %46 : vector<1x256x128xf32> to vector<256x128xf32>
    %48 = vector.extract_strided_slice %45 {offsets = [0, 0], sizes = [256, 128], strides = [1, 1]} : vector<256x256xf32> to vector<256x128xf32>
    %49 = arith.maximumf %47, %48 : vector<256x128xf32>
    %50 = vector.extract_strided_slice %45 {offsets = [0, 128], sizes = [256, 128], strides = [1, 1]} : vector<256x256xf32> to vector<256x128xf32>
    %51 = arith.maximumf %49, %50 : vector<256x128xf32>
    %c0_37 = arith.constant 0 : index
    %c256_38 = arith.constant 256 : index
    %c0_39 = arith.constant 0 : index
    %52 = vector.load %arg12[%c0_37, %c256_38, %c0_39] : memref<1x1024x128xf32, #tpu.memory_space<vmem>>, vector<1x256x128xf32>
    %53 = vector.shape_cast %52 : vector<1x256x128xf32> to vector<256x128xf32>
    %54 = vector.shape_cast %51 : vector<256x128xf32> to vector<1x256x128xf32>
    tpu.vector_store %arg12[%c0_37, %c256_38, %c0_39], %54 {strides = array<i32>} : memref<1x1024x128xf32, #tpu.memory_space<vmem>>, vector<1x256x128xf32>,
    %c512 = arith.constant 512 : index
    %c0_40 = arith.constant 0 : index
    %55 = vector.load %arg10[%c512, %c0_40] : memref<1024x128xbf16, #tpu.memory_space<vmem>>, vector<256x128xbf16>
    %cst_41 = arith.constant dense<0.000000e+00> : vector<256x256xf32>
    %56 = tpu.matmul %55, %29, %cst_41 {dimension_numbers = #tpu.dot_dimension_numbers<[1], [0], [0], [1], [0, 0, 1, 1], [], []>} : vector<256x128xbf16>, vector<128x256xbf16>, vector<256x256xf32> -> vector<256x256xf32>
    %c0_42 = arith.constant 0 : index
    %c512_43 = arith.constant 512 : index
    %c0_44 = arith.constant 0 : index
    %57 = vector.load %arg12[%c0_42, %c512_43, %c0_44] : memref<1x1024x128xf32, #tpu.memory_space<vmem>>, vector<1x256x128xf32>
    %58 = vector.shape_cast %57 : vector<1x256x128xf32> to vector<256x128xf32>
    %59 = vector.extract_strided_slice %56 {offsets = [0, 0], sizes = [256, 128], strides = [1, 1]} : vector<256x256xf32> to vector<256x128xf32>
    %60 = arith.maximumf %58, %59 : vector<256x128xf32>
    %61 = vector.extract_strided_slice %56 {offsets = [0, 128], sizes = [256, 128], strides = [1, 1]} : vector<256x256xf32> to vector<256x128xf32>
    %62 = arith.maximumf %60, %61 : vector<256x128xf32>
    %c0_45 = arith.constant 0 : index
    %c512_46 = arith.constant 512 : index
    %c0_47 = arith.constant 0 : index
    %63 = vector.load %arg12[%c0_45, %c512_46, %c0_47] : memref<1x1024x128xf32, #tpu.memory_space<vmem>>, vector<1x256x128xf32>
    %64 = vector.shape_cast %63 : vector<1x256x128xf32> to vector<256x128xf32>
    %65 = vector.shape_cast %62 : vector<256x128xf32> to vector<1x256x128xf32>
    tpu.vector_store %arg12[%c0_45, %c512_46, %c0_47], %65 {strides = array<i32>} : memref<1x1024x128xf32, #tpu.memory_space<vmem>>, vector<1x256x128xf32>,
    %c768 = arith.constant 768 : index
    %c0_48 = arith.constant 0 : index
    %66 = vector.load %arg10[%c768, %c0_48] : memref<1024x128xbf16, #tpu.memory_space<vmem>>, vector<256x128xbf16>
    %cst_49 = arith.constant dense<0.000000e+00> : vector<256x256xf32>
    %67 = tpu.matmul %66, %29, %cst_49 {dimension_numbers = #tpu.dot_dimension_numbers<[1], [0], [0], [1], [0, 0, 1, 1], [], []>} : vector<256x128xbf16>, vector<128x256xbf16>, vector<256x256xf32> -> vector<256x256xf32>
    %c0_50 = arith.constant 0 : index
    %c768_51 = arith.constant 768 : index
    %c0_52 = arith.constant 0 : index
    %68 = vector.load %arg12[%c0_50, %c768_51, %c0_52] : memref<1x1024x128xf32, #tpu.memory_space<vmem>>, vector<1x256x128xf32>
    %69 = vector.shape_cast %68 : vector<1x256x128xf32> to vector<256x128xf32>
    %70 = vector.extract_strided_slice %67 {offsets = [0, 0], sizes = [256, 128], strides = [1, 1]} : vector<256x256xf32> to vector<256x128xf32>
    %71 = arith.maximumf %69, %70 : vector<256x128xf32>
    %72 = vector.extract_strided_slice %67 {offsets = [0, 128], sizes = [256, 128], strides = [1, 1]} : vector<256x256xf32> to vector<256x128xf32>
    %73 = arith.maximumf %71, %72 : vector<256x128xf32>
    %c0_53 = arith.constant 0 : index
    %c768_54 = arith.constant 768 : index
    %c0_55 = arith.constant 0 : index
    %74 = vector.load %arg12[%c0_53, %c768_54, %c0_55] : memref<1x1024x128xf32, #tpu.memory_space<vmem>>, vector<1x256x128xf32>
    %75 = vector.shape_cast %74 : vector<1x256x128xf32> to vector<256x128xf32>
    %76 = vector.shape_cast %73 : vector<256x128xf32> to vector<1x256x128xf32>
    tpu.vector_store %arg12[%c0_53, %c768_54, %c0_55], %76 {strides = array<i32>} : memref<1x1024x128xf32, #tpu.memory_space<vmem>>, vector<1x256x128xf32>,
    return
  }
  func.func @transform_0(%arg0: i32, %arg1: i32, %arg2: i32) -> (i32, i32, i32) {
    %c1_i32 = arith.constant 1 : i32
    %0 = arith.muli %arg0, %c1_i32 : i32
    %1 = arith.addi %0, %arg2 : i32
    %c0_i32 = arith.constant 0 : i32
    %c0_i32_0 = arith.constant 0 : i32
    return %arg1, %c0_i32, %1 : i32, i32, i32
  }
  func.func @transform_1(%arg0: i32, %arg1: i32, %arg2: i32) -> (i32, i32) {
    %c0_i32 = arith.constant 0 : i32
    %c0_i32_0 = arith.constant 0 : i32
    %c0_i32_1 = arith.constant 0 : i32
    return %c0_i32, %c0_i32_0 : i32, i32
  }
  func.func @transform_2(%arg0: i32, %arg1: i32, %arg2: i32) -> (i32, i32) {
    %c0_i32 = arith.constant 0 : i32
    %c0_i32_0 = arith.constant 0 : i32
    %c0_i32_1 = arith.constant 0 : i32
    return %c0_i32, %c0_i32_0 : i32, i32
  }
  func.func @transform_3(%arg0: i32, %arg1: i32, %arg2: i32) -> (i32, i32) {
    %c0_i32 = arith.constant 0 : i32
    %c0_i32_0 = arith.constant 0 : i32
    %c0_i32_1 = arith.constant 0 : i32
    return %c0_i32, %c0_i32_0 : i32, i32
  }
  func.func @transform_4(%arg0: i32, %arg1: i32, %arg2: i32) -> (i32, i32) {
    %c0_i32 = arith.constant 0 : i32
    %c0_i32_0 = arith.constant 0 : i32
    %c0_i32_1 = arith.constant 0 : i32
    return %c0_i32, %c0_i32_0 : i32, i32
  }
  func.func @transform_5(%arg0: i32, %arg1: i32, %arg2: i32) -> (i32, i32) {
    %c0_i32 = arith.constant 0 : i32
    %c0_i32_0 = arith.constant 0 : i32
    %c0_i32_1 = arith.constant 0 : i32
    return %c0_i32, %c0_i32_0 : i32, i32
  }
  func.func @transform_6(%arg0: i32, %arg1: i32, %arg2: i32) -> (i32, i32) {
    %c0_i32 = arith.constant 0 : i32
    %c0_i32_0 = arith.constant 0 : i32
    %c0_i32_1 = arith.constant 0 : i32
    return %c0_i32, %c0_i32_0 : i32, i32
  }
  func.func @transform_7(%arg0: i32, %arg1: i32, %arg2: i32) -> (i32, i32) {
    %c0_i32 = arith.constant 0 : i32
    %c0_i32_0 = arith.constant 0 : i32
    %c0_i32_1 = arith.constant 0 : i32
    return %c0_i32, %c0_i32_0 : i32, i32
  }
  func.func @transform_8(%arg0: i32, %arg1: i32, %arg2: i32) -> (i32, i32, i32) {
    %c1_i32 = arith.constant 1 : i32
    %0 = arith.muli %arg0, %c1_i32 : i32
    %1 = arith.addi %0, %arg2 : i32
    %c0_i32 = arith.constant 0 : i32
    %c0_i32_0 = arith.constant 0 : i32
    return %arg1, %c0_i32, %1 : i32, i32, i32
  }
  func.func @transform_9(%arg0: i32, %arg1: i32, %arg2: i32) -> (i32, i32, i32) {
    %c0_i32 = arith.constant 0 : i32
    %c0_i32_0 = arith.constant 0 : i32
    return %arg1, %c0_i32, %arg0 : i32, i32, i32
  }
}

module attributes {stable_mosaic.version = 11 : i64} {
  func.func @stage2_kernel(%arg0: i32, %arg1: i32, %arg2: memref<1x64x256xbf16, #tpu.memory_space<vmem>>, %arg3: memref<1x512x1xf32, #tpu.memory_space<vmem>>, %arg4: memref<512x64xbf16, #tpu.memory_space<vmem>>, %arg5: memref<256x512xbf16, #tpu.memory_space<vmem>>, %arg6: memref<256x1xf32, #tpu.memory_space<vmem>>, %arg7: memref<128x256xbf16, #tpu.memory_space<vmem>>, %arg8: memref<128x1xf32, #tpu.memory_space<vmem>>, %arg9: memref<8x128xbf16, #tpu.memory_space<vmem>>, %arg10: memref<8x1xf32, #tpu.memory_space<vmem>>, %arg11: memref<1x8x256xf32, #tpu.memory_space<vmem>>) attributes {dimension_semantics = [#tpu.dimension_semantics<parallel>, #tpu.dimension_semantics<parallel>], iteration_bounds = array<i64: 2, 2>, scalar_prefetch = 0 : i64, scratch_operands = 0 : i64, tpu.core_type = #tpu.core_type<tc>, window_params = [{transform_indices = @transform_0, window_bounds = array<i64: 1, 64, 256>}, {transform_indices = @transform_1, window_bounds = array<i64: 1, 512, 1>}, {pipeline_mode = #tpu.pipeline_mode<synchronous>, transform_indices = @transform_2, window_bounds = array<i64: 512, 64>}, {pipeline_mode = #tpu.pipeline_mode<synchronous>, transform_indices = @transform_3, window_bounds = array<i64: 256, 512>}, {pipeline_mode = #tpu.pipeline_mode<synchronous>, transform_indices = @transform_4, window_bounds = array<i64: 256, 1>}, {pipeline_mode = #tpu.pipeline_mode<synchronous>, transform_indices = @transform_5, window_bounds = array<i64: 128, 256>}, {pipeline_mode = #tpu.pipeline_mode<synchronous>, transform_indices = @transform_6, window_bounds = array<i64: 128, 1>}, {pipeline_mode = #tpu.pipeline_mode<synchronous>, transform_indices = @transform_7, window_bounds = array<i64: 8, 128>}, {pipeline_mode = #tpu.pipeline_mode<synchronous>, transform_indices = @transform_8, window_bounds = array<i64: 8, 1>}, {transform_indices = @transform_9, window_bounds = array<i64: 1, 8, 256>}]} {
    %c0 = arith.constant 0 : index
    %c0_0 = arith.constant 0 : index
    %c0_1 = arith.constant 0 : index
    %0 = vector.load %arg2[%c0, %c0_0, %c0_1] : memref<1x64x256xbf16, #tpu.memory_space<vmem>>, vector<1x64x256xbf16>
    %1 = vector.shape_cast %0 : vector<1x64x256xbf16> to vector<64x256xbf16>
    %c0_2 = arith.constant 0 : index
    %c0_3 = arith.constant 0 : index
    %c0_4 = arith.constant 0 : index
    %2 = vector.load %arg3[%c0_2, %c0_3, %c0_4] : memref<1x512x1xf32, #tpu.memory_space<vmem>>, vector<1x512x1xf32>
    %3 = vector.shape_cast %2 : vector<1x512x1xf32> to vector<512x1xf32>
    %c0_5 = arith.constant 0 : index
    %c0_6 = arith.constant 0 : index
    %4 = vector.load %arg4[%c0_5, %c0_6] : memref<512x64xbf16, #tpu.memory_space<vmem>>, vector<512x64xbf16>
    %cst = arith.constant dense<0.000000e+00> : vector<512x256xf32>
    %5 = tpu.matmul %4, %1, %cst {dimension_numbers = #tpu.dot_dimension_numbers<[1], [0], [0], [1], [0, 0, 1, 1], [], []>} : vector<512x64xbf16>, vector<64x256xbf16>, vector<512x256xf32> -> vector<512x256xf32>
    %6 = vector.broadcast %3 : vector<512x1xf32> to vector<512x256xf32>
    %7 = arith.addf %5, %6 : vector<512x256xf32>
    %cst_7 = arith.constant 0.000000e+00 : f32
    %8 = vector.broadcast %cst_7 : f32 to vector<512x256xf32>
    %9 = arith.maximumf %7, %8 : vector<512x256xf32>
    %c0_8 = arith.constant 0 : index
    %c0_9 = arith.constant 0 : index
    %10 = vector.load %arg5[%c0_8, %c0_9] : memref<256x512xbf16, #tpu.memory_space<vmem>>, vector<256x512xbf16>
    %11 = arith.truncf %9 : vector<512x256xf32> to vector<512x256xbf16>
    %cst_10 = arith.constant dense<0.000000e+00> : vector<256x256xf32>
    %12 = tpu.matmul %10, %11, %cst_10 {dimension_numbers = #tpu.dot_dimension_numbers<[1], [0], [0], [1], [0, 0, 1, 1], [], []>} : vector<256x512xbf16>, vector<512x256xbf16>, vector<256x256xf32> -> vector<256x256xf32>
    %c0_11 = arith.constant 0 : index
    %c0_12 = arith.constant 0 : index
    %13 = vector.load %arg6[%c0_11, %c0_12] : memref<256x1xf32, #tpu.memory_space<vmem>>, vector<256x1xf32>
    %14 = vector.broadcast %13 : vector<256x1xf32> to vector<256x256xf32>
    %15 = arith.addf %12, %14 : vector<256x256xf32>
    %cst_13 = arith.constant 0.000000e+00 : f32
    %16 = vector.broadcast %cst_13 : f32 to vector<256x256xf32>
    %17 = arith.maximumf %15, %16 : vector<256x256xf32>
    %c0_14 = arith.constant 0 : index
    %c0_15 = arith.constant 0 : index
    %18 = vector.load %arg7[%c0_14, %c0_15] : memref<128x256xbf16, #tpu.memory_space<vmem>>, vector<128x256xbf16>
    %19 = arith.truncf %17 : vector<256x256xf32> to vector<256x256xbf16>
    %cst_16 = arith.constant dense<0.000000e+00> : vector<128x256xf32>
    %20 = tpu.matmul %18, %19, %cst_16 {dimension_numbers = #tpu.dot_dimension_numbers<[1], [0], [0], [1], [0, 0, 1, 1], [], []>} : vector<128x256xbf16>, vector<256x256xbf16>, vector<128x256xf32> -> vector<128x256xf32>
    %c0_17 = arith.constant 0 : index
    %c0_18 = arith.constant 0 : index
    %21 = vector.load %arg8[%c0_17, %c0_18] : memref<128x1xf32, #tpu.memory_space<vmem>>, vector<128x1xf32>
    %22 = vector.broadcast %21 : vector<128x1xf32> to vector<128x256xf32>
    %23 = arith.addf %20, %22 : vector<128x256xf32>
    %cst_19 = arith.constant 0.000000e+00 : f32
    %24 = vector.broadcast %cst_19 : f32 to vector<128x256xf32>
    %25 = arith.maximumf %23, %24 : vector<128x256xf32>
    %c0_20 = arith.constant 0 : index
    %c0_21 = arith.constant 0 : index
    %26 = vector.load %arg9[%c0_20, %c0_21] : memref<8x128xbf16, #tpu.memory_space<vmem>>, vector<8x128xbf16>
    %27 = arith.truncf %25 : vector<128x256xf32> to vector<128x256xbf16>
    %cst_22 = arith.constant dense<0.000000e+00> : vector<8x256xf32>
    %28 = tpu.matmul %26, %27, %cst_22 {dimension_numbers = #tpu.dot_dimension_numbers<[1], [0], [0], [1], [0, 0, 1, 1], [], []>} : vector<8x128xbf16>, vector<128x256xbf16>, vector<8x256xf32> -> vector<8x256xf32>
    %c0_23 = arith.constant 0 : index
    %c0_24 = arith.constant 0 : index
    %29 = vector.load %arg10[%c0_23, %c0_24] : memref<8x1xf32, #tpu.memory_space<vmem>>, vector<8x1xf32>
    %30 = vector.broadcast %29 : vector<8x1xf32> to vector<8x256xf32>
    %31 = arith.addf %28, %30 : vector<8x256xf32>
    %c0_25 = arith.constant 0 : index
    %c0_26 = arith.constant 0 : index
    %c0_27 = arith.constant 0 : index
    %32 = vector.load %arg11[%c0_25, %c0_26, %c0_27] : memref<1x8x256xf32, #tpu.memory_space<vmem>>, vector<1x8x256xf32>
    %33 = vector.shape_cast %32 : vector<1x8x256xf32> to vector<8x256xf32>
    %34 = vector.shape_cast %31 : vector<8x256xf32> to vector<1x8x256xf32>
    tpu.vector_store %arg11[%c0_25, %c0_26, %c0_27], %34 {strides = array<i32>} : memref<1x8x256xf32, #tpu.memory_space<vmem>>, vector<1x8x256xf32>,
    return
  }
  func.func @transform_0(%arg0: i32, %arg1: i32) -> (i32, i32, i32) {
    %c0_i32 = arith.constant 0 : i32
    %c0_i32_0 = arith.constant 0 : i32
    return %arg0, %c0_i32, %arg1 : i32, i32, i32
  }
  func.func @transform_1(%arg0: i32, %arg1: i32) -> (i32, i32, i32) {
    %c0_i32 = arith.constant 0 : i32
    %c0_i32_0 = arith.constant 0 : i32
    %c0_i32_1 = arith.constant 0 : i32
    return %arg0, %c0_i32, %c0_i32_0 : i32, i32, i32
  }
  func.func @transform_2(%arg0: i32, %arg1: i32) -> (i32, i32) {
    %c0_i32 = arith.constant 0 : i32
    %c0_i32_0 = arith.constant 0 : i32
    %c0_i32_1 = arith.constant 0 : i32
    return %c0_i32, %c0_i32_0 : i32, i32
  }
  func.func @transform_3(%arg0: i32, %arg1: i32) -> (i32, i32) {
    %c0_i32 = arith.constant 0 : i32
    %c0_i32_0 = arith.constant 0 : i32
    %c0_i32_1 = arith.constant 0 : i32
    return %c0_i32, %c0_i32_0 : i32, i32
  }
  func.func @transform_4(%arg0: i32, %arg1: i32) -> (i32, i32) {
    %c0_i32 = arith.constant 0 : i32
    %c0_i32_0 = arith.constant 0 : i32
    %c0_i32_1 = arith.constant 0 : i32
    return %c0_i32, %c0_i32_0 : i32, i32
  }
  func.func @transform_5(%arg0: i32, %arg1: i32) -> (i32, i32) {
    %c0_i32 = arith.constant 0 : i32
    %c0_i32_0 = arith.constant 0 : i32
    %c0_i32_1 = arith.constant 0 : i32
    return %c0_i32, %c0_i32_0 : i32, i32
  }
  func.func @transform_6(%arg0: i32, %arg1: i32) -> (i32, i32) {
    %c0_i32 = arith.constant 0 : i32
    %c0_i32_0 = arith.constant 0 : i32
    %c0_i32_1 = arith.constant 0 : i32
    return %c0_i32, %c0_i32_0 : i32, i32
  }
  func.func @transform_7(%arg0: i32, %arg1: i32) -> (i32, i32) {
    %c0_i32 = arith.constant 0 : i32
    %c0_i32_0 = arith.constant 0 : i32
    %c0_i32_1 = arith.constant 0 : i32
    return %c0_i32, %c0_i32_0 : i32, i32
  }
  func.func @transform_8(%arg0: i32, %arg1: i32) -> (i32, i32) {
    %c0_i32 = arith.constant 0 : i32
    %c0_i32_0 = arith.constant 0 : i32
    %c0_i32_1 = arith.constant 0 : i32
    return %c0_i32, %c0_i32_0 : i32, i32
  }
  func.func @transform_9(%arg0: i32, %arg1: i32) -> (i32, i32, i32) {
    %c0_i32 = arith.constant 0 : i32
    %c0_i32_0 = arith.constant 0 : i32
    return %arg0, %c0_i32, %arg1 : i32, i32, i32
  }
}

</mosaic_0001>

<bundles_post_ra>
// kernel: seg_model_forward.2
= control target key start
LH: loop header
LB: loop body
LE: loop exit
PB: predicated region body
PF: predicated region fallthrough
CT: control target
= control target key end

     0   :  { %s4211_s30 = smov 0   ;;  %s4213_s10 = smov 0   ;;  %s5272_s0 = inlined_call_operand.vmem [shape: bf16[2,8,512], index: 0, kind: input, shape index: {}]   ;;  %s5273_s1 = inlined_call_operand.vmem [shape: bf16[64,8], index: 1, kind: input, shape index: {}]   ;;  %s5274_s2 = inlined_call_operand.vmem [shape: f32[64,1], index: 2, kind: input, shape index: {}]   ;;  %s5275_s3 = inlined_call_operand.vmem [shape: bf16[64,64], index: 3, kind: input, shape index: {}]   ;;  %s5276_s4 = inlined_call_operand.vmem [shape: f32[64,1], index: 4, kind: input, shape index: {}]   ;;  %s5277_s5 = inlined_call_operand.vmem [shape: bf16[128,64], index: 5, kind: input, shape index: {}]   ;;  %s5278_s6 = inlined_call_operand.vmem [shape: f32[128,1], index: 6, kind: input, shape index: {}]   ;;  %s5279_s7 = inlined_call_operand.vmem [shape: bf16[1024,128], index: 7, kind: input, shape index: {}]   ;;  %s5280_s8 = inlined_call_operand.vmem [shape: bf16[2,64,512], index: 8, kind: output, shape index: {0}]   ;;  %s5281_s9 = inlined_call_operand.vmem [shape: f32[2,1024,256], index: 9, kind: output, shape index: {1}]  }
   0x1   :  { %s4215_s11 = smov 0   ;;  %s4217_s12 = smov 0  }
   0x2   :  { %s4219_s13 = smov 0   ;;  %s4221_s14 = smov 0  }
   0x3   :  { %s4223_s15 = smov 0  }
   0x4 LB: > { %5287 = sst [smem:[#allocation4_spill]] %s4138_s10  ;;  %s35_s16 = sadd.s32 1, %s4150_s13  ;;  %s4158_s15 = sphi %s4223_s15, %s20_s15   ;;  %s4154_s14 = sphi %s4221_s14, %s5299_s14   ;;  %s4150_s13 = sphi %s4219_s13, %s5298_s13   ;;  %s4146_s12 = sphi %s4217_s12, %s5297_s12   ;;  %s4142_s11 = sphi %s4215_s11, %s5296_s11   ;;  %s4138_s10 = sphi %s4213_s10, %s5295_s10   ;;  %s4134_s30 = sphi %s4211_s30, %s5294_s30  }
   0x5   : > { %5288 = sst [smem:[#allocation5_spill]] %s4150_s13  ;;  %p37_p0 = scmp.ge.s32.totalorder %s35_s16, 2 }
   0x6   : > { %5289 = sst [smem:[#allocation6_spill]] %s4154_s14  ;;  %s39_s17 = sadd.s32 1, %s4154_s14 }
   0x7   : > { %s3812_s18 = sadd.s32 4294967295, %s4158_s15   ;;  %p237_p1 = scmp.ne.s32.totalorder %s4138_s10, %s4134_s30 }
   0x8   : > { %s5301_s16 = smov (%p37_p0, %s35_s16), 0  ;;  %s5303_s17 = smov (!%p37_p0, %s39_s17), %s4154_s14 }
   0x9   : > { %5290 = sst [smem:[#allocation7_spill]] %s5301_s16  ;;  %s222_s19 = ssub.s32 %s4150_s13, %s5301_s16 }
   0xa   : > { %p238_p2 = scmp.eq.s32.totalorder %s3812_s18, 3  ;;  %p41_p3 = scmp.ge.s32.totalorder %s5303_s17, 2 }
   0xb   : > { %p3816_p4 = scmp.ge.s32.totalorder %s4158_s15, 1  ;;  %p326_p6 = scmp.lt.s32.totalorder %s4158_s15, 5 }
   0xc   : > { %p4257_p5 = por %p238_p2, %p237_p1  ;;  %s5305_s17 = smov (%p41_p3, %s5303_s17), 0 }
   0xd   : > { %5292 = sst [smem:[#allocation8_spill]] %s5305_s17  ;;  %p327_p7 = pnand %p3816_p4, %p326_p6 }
   0xe   : > { %s223_s21 = ssub.s32 %s4154_s14, %s5305_s17  ;;  %s227_s23 = sadd.s32 1, %s4138_s10  ;;  %v4160_v0 = vmov (!%p327_p7), 0   ;;  %v394_v1 = vld [vmem:[%s5274_s2] sm:$0xff] (!%p327_p7)  ;;  %v396_v2 = vld [vmem:[%s5274_s2 + $0x10] sm:$0xff] (!%p327_p7)  ;;  %v395_v3 = vld [vmem:[%s5274_s2 + $0x8] sm:$0xff] (!%p327_p7)  ;;  %vm480_vm0 = vcmask (!%p327_p7), 1043456  }
   0xf   : > { %s224_s22 = sor.u32 %s223_s21, %s222_s19  ;;  %330 = sbr.rel (%p327_p7) target bundleno = 1372 (0x55c), region = 52  ;;  %519 = vmatprep.mubr.bf16.mxu0 (!%p327_p7), %v4160_v0  ;;  %4020 = vset.pattern.permute.xlu0 (!%p327_p7), %v4160_v0  ;;  %v397_v4 = vld [vmem:[%s5274_s2 + $0x18] sm:$0xff] (!%p327_p7)  ;;  %v398_v8 = vld [vmem:[%s5274_s2 + $0x20] sm:$0xff] (!%p327_p7)  ;;  %v399_v11 = vld [vmem:[%s5274_s2 + $0x28] sm:$0xff] (!%p327_p7)  ;;  %vm467_vm1 = vcmask (!%p327_p7), 64512   ;;  %vm660_vm2 = vcmask (!%p327_p7), 523264  }
  0x10   : > { %p225_p8 = scmp.eq.s32.totalorder %s224_s22, 0  ;;  %s4271_s25 = sshll.u32 (!%p327_p7), %s4146_s12, 1  ;;  %4021 = vset.pattern.permute.xlu1 (!%p327_p7), %v4160_v0  ;;  %705 = vmatprep.mubr.bf16.mxu1 (!%p327_p7), %v4160_v0  ;;  %v4024_v10 = vld [vmem:[%s5273_s1] sm:$0xff] (!%p327_p7)   ;;  %v400_v12 = vld [vmem:[%s5274_s2 + $0x30] sm:$0xff] (!%p327_p7)  ;;  %v401_v13 = vld [vmem:[%s5274_s2 + $0x38] sm:$0xff] (!%p327_p7) }
  0x11   : > { %p372_p9 = scmp.lt.s32.totalorder (!%p327_p7), %s4142_s11, 1  ;;  %p374_p10 = scmp.lt.s32.totalorder (!%p327_p7), %s4271_s25, 3  ;;  %404 = vperm.xlu0 (!%p327_p7), %4020, %v394_v1   ;;  %414 = vperm.xlu1 (!%p327_p7), %4021, %v396_v2   ;;  %v592_v14 = vld [vmem:[%s5276_s4] sm:$0xff] (!%p327_p7)  ;;  %v4025_v15 = vld [vmem:[%s5273_s1 + $0x8] sm:$0xff] (!%p327_p7)   ;;  %v594_v17 = vld [vmem:[%s5276_s4 + $0x10] sm:$0xff] (!%p327_p7) }
  0x12   : > { %s4268_s24 = scalar_select %p225_p8, %s4138_s10, %s227_s23  }
  0x13   : > { %v593_v16 = vld [vmem:[%s5276_s4 + $0x8] sm:$0xff] (!%p327_p7)  ;;  %v595_v18 = vld [vmem:[%s5276_s4 + $0x18] sm:$0xff] (!%p327_p7)  ;;  %v596_v19 = vld [vmem:[%s5276_s4 + $0x20] sm:$0xff] (!%p327_p7)  ;;  %s361_s22 = sand.u32 (!%p327_p7), 1, %s4134_s30  }
  0x14   : > { %5293 = sst [smem:[#allocation9_spill]] %s4268_s24  ;;  %v4026_v20 = vld [vmem:[%s5273_s1 + $0x10] sm:$0xff] (!%p327_p7)   ;;  %v597_v21 = vld [vmem:[%s5276_s4 + $0x28] sm:$0xff] (!%p327_p7)  ;;  %v599_v23 = vld [vmem:[%s5276_s4 + $0x38] sm:$0xff] (!%p327_p7)  ;;  %s3818_s24 = sshll.u32 (!%p327_p7), %s361_s22, 10 }
  0x15   : > { %409 = vperm.xlu0 (!%p327_p7), %4020, %v395_v3   ;;  %419 = vperm.xlu1 (!%p327_p7), %4021, %v397_v4   ;;  %v598_v22 = vld [vmem:[%s5276_s4 + $0x30] sm:$0xff] (!%p327_p7)  ;;  %v834_v24 = vld [vmem:[%s5278_s6] sm:$0xff] (!%p327_p7)  ;;  %v4027_v25 = vld [vmem:[%s5273_s1 + $0x18] sm:$0xff] (!%p327_p7)   ;;  %s4809_s30 = scalar_lea.vmem (!%p327_p7), [#allocation3], %s3818_s24 }
  0x16   : > { %s373_s26 = scalar_select %p372_p9, %s4142_s11, 1  ;;  %v835_v26 = vld [vmem:[%s5278_s6 + $0x8] sm:$0xff]  ;;  %v836_v27 = vld [vmem:[%s5278_s6 + $0x10] sm:$0xff]  ;;  %v837_v28 = vld [vmem:[%s5278_s6 + $0x18] sm:$0xff] }
  0x17   : > { %s375_s27 = scalar_select %p374_p10, %s4271_s25, 3  ;;  %v838_v29 = vld [vmem:[%s5278_s6 + $0x20] sm:$0xff]  ;;  %v839_v30 = vld [vmem:[%s5278_s6 + $0x28] sm:$0xff]  ;;  %v840_v31 = vld [vmem:[%s5278_s6 + $0x30] sm:$0xff] }
  0x18   : > { %s3820_s28 = sshll.u32 %s373_s26, 2  ;;  %v841_v32 = vld [vmem:[%s5278_s6 + $0x38] sm:$0xff]  ;;  %v842_v33 = vld [vmem:[%s5278_s6 + $0x40] sm:$0xff]  ;;  %v843_v34 = vld [vmem:[%s5278_s6 + $0x48] sm:$0xff] }
  0x19   : > { %s377_s19 = sadd.s32 %s3820_s28, %s375_s27  ;;  %424 = vperm.xlu0 %4020, %v398_v8   ;;  %429 = vperm.xlu1 %4021, %v399_v11   ;;  %v844_v35 = vld [vmem:[%s5278_s6 + $0x50] sm:$0xff]  ;;  %v845_v36 = vld [vmem:[%s5278_s6 + $0x58] sm:$0xff]  ;;  %v846_v37 = vld [vmem:[%s5278_s6 + $0x60] sm:$0xff]  ;;  %s3932_s27 = sshll.u32 (%p4257_p5), %s4142_s11, 5 }
  0x1a   : > { %s3821_s23 = sshll.u32 %s377_s19, 2  ;;  %v847_v38 = vld [vmem:[%s5278_s6 + $0x68] sm:$0xff]  ;;  %v848_v39 = vld [vmem:[%s5278_s6 + $0x70] sm:$0xff]  ;;  %v849_v40 = vld [vmem:[%s5278_s6 + $0x78] sm:$0xff]  ;;  %s3097_s28 = sadd.s32 (%p4257_p5), %s3932_s27, %s4271_s25 }
  0x1b   : > { %s379_s26 = scalar_lea.vmem %s5272_s0, %s3821_s23  ;;  %s3817_s23 = sshll.u32 %s361_s22, 6 }
  0x1c   : > { %v385_v5 = vld [vmem:[%s379_s26] sm:$0xff]  ;;  %s4423_s26 = scalar_lea.vmem [#allocation2], %s3817_s23  ;;  %s3933_s16 = sshll.u32 (%p4257_p5), %s3097_s28, 2 }
  0x1d   : > { %v3827_v6 = vcombine.high %v385_v5, %v385_v5  ;;  %v3826_v7 = vcombine.low %v385_v5, %v385_v5  ;;  %434 = vperm.xlu0 %4020, %v400_v12   ;;  %439 = vperm.xlu1 %4021, %v401_v13   ;;  %s3099_s14 = scalar_lea.vmem (%p4257_p5), %s5280_s8, %s3933_s16 }
  0x1f   : > { %3828 = vmatprep.subr.msk.bf16.mxu0 %vm480_vm0, %v3827_v6  ;;  %v482_v9 = vsel %vm480_vm0, %v3826_v7, 0 }
  0x20   : > { %488 = vmatpush1.bf16.msra.mxu0 %v482_v9 }
  0x21   : > { %602 = vperm.xlu0 %4020, %v592_v14   ;;  %607 = vperm.xlu1 %4021, %v593_v16  }
  0x23   : > { %3829 = vmatmul.mubr.msk.bf16.vlgmr.msra.gmra.mrb[0].mxu0 %vm467_vm1, %v4024_v10 }
  0x24   : > { %529 = vmatprep.mubr.bf16.mxu0 %v4160_v0 }
  0x25   : > { %612 = vperm.xlu0 %4020, %v594_v17   ;;  %617 = vperm.xlu1 %4021, %v595_v18  }
  0x29   : > { %622 = vperm.xlu0 %4020, %v596_v19   ;;  %627 = vperm.xlu1 %4021, %v597_v21  }
  0x2b   : > { %3830 = vmatmul.mubr.msk.bf16.gmra.mrb[4].mxu0 %vm467_vm1, %v4025_v15 }
  0x2c   : > { %539 = vmatprep.mubr.bf16.mxu0 %v4160_v0 }
  0x2d   : > { %632 = vperm.xlu0 %4020, %v598_v22   ;;  %637 = vperm.xlu1 %4021, %v599_v23  }
  0x31   : > { %852 = vperm.xlu0 %4020, %v834_v24   ;;  %857 = vperm.xlu1 %4021, %v835_v26  }
  0x33   : > { %3831 = vmatmul.mubr.msk.bf16.gmra.mrb[8].mxu0 %vm467_vm1, %v4026_v20 }
  0x34   : > { %549 = vmatprep.mubr.bf16.mxu0 %v4160_v0 }
  0x35   : > { %862 = vperm.xlu0 %4020, %v836_v27   ;;  %867 = vperm.xlu1 %4021, %v837_v28  }
  0x39   : > { %872 = vperm.xlu0 %4020, %v838_v29   ;;  %877 = vperm.xlu1 %4021, %v839_v30  }
  0x3b   : > { %3832 = vmatmul.mubr.msk.bf16.gmra.mrb[12].mxu0 %vm467_vm1, %v4027_v25 }
  0x3c   : > { %1026 = vmatprep.mubr.bf16.mxu0 %v4160_v0 }
  0x3d   : > { %882 = vperm.xlu0 %4020, %v840_v31   ;;  %887 = vperm.xlu1 %4021, %v841_v32  }
  0x41   : > { %892 = vperm.xlu0 %4020, %v842_v33   ;;  %897 = vperm.xlu1 %4021, %v843_v34  }
  0x45   : > { %902 = vperm.xlu0 %4020, %v844_v35   ;;  %907 = vperm.xlu1 %4021, %v845_v36  }
  0x49   : > { %912 = vperm.xlu0 %4020, %v846_v37   ;;  %917 = vperm.xlu1 %4021, %v847_v38  }
  0x4d   : > { %922 = vperm.xlu0 %4020, %v848_v39   ;;  %927 = vperm.xlu1 %4021, %v849_v40  }
  0x90   : > { %v405_v41 = vpop.permute.xlu0 %404  ;;  %v415_v50 = vpop.permute.xlu1 %414 }
  0x94   : > { %v410_v45 = vpop.permute.xlu0 %409  ;;  %v420_v61 = vpop.permute.xlu1 %419 }
  0x98   : > { %v425_v9 = vpop.permute.xlu0 %424  ;;  %v430_v14 = vpop.permute.xlu1 %429 }
  0x9c   : > { %v435_v25 = vpop.permute.xlu0 %434  ;;  %v440_v30 = vpop.permute.xlu1 %439 }
  0xf6   : > { %v521_v42 = vpop.f32.mrb[0].mxu0 }
  0xf7   : > { %v522_v43 = vadd.f32 %v521_v42, %v405_v41  ;;  %v523_v44 = vpop.f32.mrb[1].mxu0  ;;  %v4028_v42 = vld [vmem:[%s5275_s3] sm:$0xff]  }
  0xf8   : > { %v524_v46 = vadd.f32 %v523_v44, %v405_v41  ;;  %v525_v47 = vpop.f32.mrb[2].mxu0  ;;  %v4030_v44 = vld [vmem:[%s5275_s3 + $0x10] sm:$0xff]  }
  0xf9   : > { %v526_v48 = vadd.f32 %v525_v47, %v410_v45  ;;  %v527_v49 = vpop.f32.mrb[3].mxu0  ;;  %v560_v52 = vmax.f32 %v522_v43, 0.0  ;;  %v4029_v43 = vld [vmem:[%s5275_s3 + $0x8] sm:$0xff]  }
  0xfa   : > { %v528_v51 = vadd.f32 %v527_v49, %v410_v45  ;;  %v561_v54 = vmax.f32 %v524_v46, 0.0  ;;  %v4031_v45 = vld [vmem:[%s5275_s3 + $0x18] sm:$0xff]   ;;  %v603_v46 = vpop.permute.xlu0 %602 }
  0xfb   : > { %v562_v53 = vmax.f32 %v526_v48, 0.0 }
  0xfc   : > { %v563_v55 = vmax.f32 %v528_v51, 0.0 }
  0xfd   : > { %v584_v56 = vpack.c.bf16 %v562_v53, %v560_v52 }
  0xfe   : > { %v531_v57 = vpop.f32.mrb[4].mxu0  ;;  %v585_v58 = vpack.c.bf16 %v563_v55, %v561_v54 }
  0xff   : > { %v532_v59 = vadd.f32 %v531_v57, %v415_v50  ;;  %v533_v60 = vpop.f32.mrb[5].mxu0 }
 0x100   : > { %v534_v62 = vadd.f32 %v533_v60, %v415_v50  ;;  %v535_v63 = vpop.f32.mrb[6].mxu0  ;;  %673 = vmatprep.subr.bf16.mxu1 %v585_v58  ;;  %v608_v50 = vpop.permute.xlu1 %607 }
 0x101   : > { %v536_v1 = vadd.f32 %v535_v63, %v420_v61  ;;  %v537_v2 = vpop.f32.mrb[7].mxu0  ;;  %674 = vmatpush1.bf16.msra.mxu1 %v584_v56  ;;  %v564_v4 = vmax.f32 %v532_v59, 0.0 }
 0x102   : > { %v538_v3 = vadd.f32 %v537_v2, %v420_v61  ;;  %v565_v6 = vmax.f32 %v534_v62, 0.0  ;;  %v613_v62 = vpop.permute.xlu0 %612 }
 0x103   : > { %v566_v5 = vmax.f32 %v536_v1, 0.0 }
 0x104   : > { %v567_v7 = vmax.f32 %v538_v3, 0.0 }
 0x105   : > { %v586_v8 = vpack.c.bf16 %v566_v5, %v564_v4  ;;  %v618_v5 = vpop.permute.xlu1 %617 }
 0x106   : > { %v587_v10 = vpack.c.bf16 %v567_v7, %v565_v6  ;;  %v541_v11 = vpop.f32.mrb[8].mxu0 }
 0x107   : > { %v542_v12 = vadd.f32 %v541_v11, %v425_v9  ;;  %v543_v13 = vpop.f32.mrb[9].mxu0 }
 0x108   : > { %v544_v15 = vadd.f32 %v543_v13, %v425_v9  ;;  %v545_v16 = vpop.f32.mrb[10].mxu0  ;;  %675 = vmatprep.subr.bf16.mxu1 %v587_v10 }
 0x109   : > { %v546_v17 = vadd.f32 %v545_v16, %v430_v14  ;;  %v547_v18 = vpop.f32.mrb[11].mxu0  ;;  %676 = vmatpush1.bf16.msra.mxu1 %v586_v8  ;;  %v568_v20 = vmax.f32 %v542_v12, 0.0 }
 0x10a   : > { %v548_v19 = vadd.f32 %v547_v18, %v430_v14  ;;  %v569_v22 = vmax.f32 %v544_v15, 0.0 }
 0x10b   : > { %v570_v21 = vmax.f32 %v546_v17, 0.0  ;;  %v623_v17 = vpop.permute.xlu0 %622 }
 0x10c   : > { %v571_v23 = vmax.f32 %v548_v19, 0.0 }
 0x10d   : > { %v588_v24 = vpack.c.bf16 %v570_v21, %v568_v20 }
 0x10e   : > { %v589_v26 = vpack.c.bf16 %v571_v23, %v569_v22  ;;  %v551_v27 = vpop.f32.mrb[12].mxu0  ;;  %v628_v23 = vpop.permute.xlu1 %627 }
 0x10f   : > { %v552_v28 = vadd.f32 %v551_v27, %v435_v25  ;;  %v553_v29 = vpop.f32.mrb[13].mxu0 }
 0x110   : > { %v554_v31 = vadd.f32 %v553_v29, %v435_v25  ;;  %v555_v32 = vpop.f32.mrb[14].mxu0  ;;  %677 = vmatprep.subr.bf16.mxu1 %v589_v26 }
 0x111   : > { %v556_v33 = vadd.f32 %v555_v32, %v440_v30  ;;  %v557_v34 = vpop.f32.mrb[15].mxu0  ;;  %678 = vmatpush1.bf16.msra.mxu1 %v588_v24  ;;  %v572_v36 = vmax.f32 %v552_v28, 0.0 }
 0x112   : > { %v558_v35 = vadd.f32 %v557_v34, %v440_v30  ;;  %v573_v38 = vmax.f32 %v554_v31, 0.0 }
 0x113   : > { %v574_v37 = vmax.f32 %v556_v33, 0.0 }
 0x114   : > { %v575_v39 = vmax.f32 %v558_v35, 0.0  ;;  %v633_v35 = vpop.permute.xlu0 %632 }
 0x115   : > { %v590_v40 = vpack.c.bf16 %v574_v37, %v572_v36 }
 0x116   : > { %v591_v41 = vpack.c.bf16 %v575_v39, %v573_v38 }
 0x118   : > { %679 = vmatprep.subr.bf16.mxu1 %v591_v41  ;;  %v638_v41 = vpop.permute.xlu1 %637 }
 0x119   : > { %680 = vmatpush1.bf16.msra.mxu1 %v590_v40 }
 0x11c   : > { %3837 = vmatmul.mubr.msk.bf16.vlgmr.msra.gmra.mrb[0].mxu1 %vm660_vm2, %v4028_v42 }
 0x11d   : > { %715 = vmatprep.mubr.bf16.mxu1 %v4160_v0 }
 0x124   : > { %3838 = vmatmul.mubr.msk.bf16.gmra.mrb[4].mxu1 %vm660_vm2, %v4029_v43 }
 0x125   : > { %725 = vmatprep.mubr.bf16.mxu1 %v4160_v0 }
 0x12c   : > { %3839 = vmatmul.mubr.msk.bf16.gmra.mrb[8].mxu1 %vm660_vm2, %v4030_v44 }
 0x12d   : > { %735 = vmatprep.mubr.bf16.mxu1 %v4160_v0 }
 0x134   : > { %3840 = vmatmul.mubr.msk.bf16.gmra.mrb[12].mxu1 %vm660_vm2, %v4031_v45 }
 0x135   : > { %1447 = vmatprep.mubr.bf16.mxu1 %v4160_v0 }
 0x1ef   : > { %v707_v47 = vpop.f32.mrb[0].mxu1 }
 0x1f0   : > { %v708_v48 = vadd.f32 %v707_v47, %v603_v46  ;;  %v709_v49 = vpop.f32.mrb[1].mxu1 }
 0x1f1   : > { %v710_v51 = vadd.f32 %v709_v49, %v603_v46  ;;  %v711_v52 = vpop.f32.mrb[2].mxu1 }
 0x1f2   : > { %v746_v53 = vmax.f32 %v708_v48, 0.0  ;;  %v712_v54 = vadd.f32 %v711_v52, %v608_v50  ;;  %v713_v55 = vpop.f32.mrb[3].mxu1 }
 0x1f3   : > { %v747_v56 = vmax.f32 %v710_v51, 0.0  ;;  %v714_v57 = vadd.f32 %v713_v55, %v608_v50  ;;  %v4032_v55 = vld [vmem:[%s5277_s5] sm:$0xff]  }
 0x1f4   : > { %v748_v58 = vmax.f32 %v712_v54, 0.0 }
 0x1f5   : > { %v3938_v59 = vpack.c.bf16 %v747_v56, %v746_v53  ;;  %v749_v60 = vmax.f32 %v714_v57, 0.0  ;;  %v4034_v57 = vld [vmem:[%s5277_s5 + $0x10] sm:$0xff]  }
 0x1f6   : > { %v762_v61 = vpack.c.bf16 %v748_v58, %v746_v53 }
 0x1f7   : > { %810 = vst [vmem:[%s4423_s26] sm:$0xff] %v3938_v59  ;;  %v763_v63 = vpack.c.bf16 %v749_v60, %v747_v56  ;;  %v3939_v1 = vpack.c.bf16 %v749_v60, %v748_v58  ;;  %v717_v2 = vpop.f32.mrb[4].mxu1  ;;  %v4033_v56 = vld [vmem:[%s5277_s5 + $0x8] sm:$0xff]   ;;  %v4035_v58 = vld [vmem:[%s5277_s5 + $0x18] sm:$0xff]   ;;  %v4036_v59 = vld [vmem:[%s5277_s5 + $0x20] sm:$0xff]  }
 0x1f8   : > { %v718_v3 = vadd.f32 %v717_v2, %v613_v62  ;;  %v719_v4 = vpop.f32.mrb[5].mxu1  ;;  %v4037_v60 = vld [vmem:[%s5277_s5 + $0x28] sm:$0xff]  }
 0x1f9   : > { %811 = vst [vmem:[%s4423_s26 + $0x8] sm:$0xff] %v3939_v1  ;;  %v720_v6 = vadd.f32 %v719_v4, %v613_v62  ;;  %v721_v7 = vpop.f32.mrb[6].mxu1  ;;  %994 = vmatprep.subr.bf16.mxu0 %v763_v63  ;;  %v4039_v62 = vld [vmem:[%s5277_s5 + $0x38] sm:$0xff]   ;;  %v853_v63 = vpop.permute.xlu0 %852 }
 0x1fa   : > { %v750_v8 = vmax.f32 %v718_v3, 0.0  ;;  %v722_v9 = vadd.f32 %v721_v7, %v618_v5  ;;  %v723_v10 = vpop.f32.mrb[7].mxu1  ;;  %995 = vmatpush1.bf16.msra.mxu0 %v762_v61  ;;  %v4038_v61 = vld [vmem:[%s5277_s5 + $0x30] sm:$0xff]   ;;  %v858_v4 = vpop.permute.xlu1 %857 }
 0x1fb   : > { %v751_v11 = vmax.f32 %v720_v6, 0.0  ;;  %v724_v12 = vadd.f32 %v723_v10, %v618_v5 }
 0x1fc   : > { %v752_v13 = vmax.f32 %v722_v9, 0.0 }
 0x1fd   : > { %v3940_v14 = vpack.c.bf16 %v751_v11, %v750_v8  ;;  %v753_v15 = vmax.f32 %v724_v12, 0.0 }
 0x1fe   : > { %v764_v16 = vpack.c.bf16 %v752_v13, %v750_v8 }
 0x1ff   : > { %812 = vst [vmem:[%s4423_s26 + $0x10] sm:$0xff] %v3940_v14  ;;  %v765_v18 = vpack.c.bf16 %v753_v15, %v751_v11  ;;  %v3941_v19 = vpack.c.bf16 %v753_v15, %v752_v13  ;;  %v727_v20 = vpop.f32.mrb[8].mxu1  ;;  %v863_v15 = vpop.permute.xlu0 %862 }
 0x200   : > { %v728_v21 = vadd.f32 %v727_v20, %v623_v17  ;;  %v729_v22 = vpop.f32.mrb[9].mxu1  ;;  %v868_v20 = vpop.permute.xlu1 %867 }
 0x201   : > { %813 = vst [vmem:[%s4423_s26 + $0x18] sm:$0xff] %v3941_v19  ;;  %v730_v24 = vadd.f32 %v729_v22, %v623_v17  ;;  %v731_v25 = vpop.f32.mrb[10].mxu1  ;;  %996 = vmatprep.subr.bf16.mxu0 %v765_v18 }
 0x202   : > { %v754_v26 = vmax.f32 %v728_v21, 0.0  ;;  %v732_v27 = vadd.f32 %v731_v25, %v628_v23  ;;  %v733_v28 = vpop.f32.mrb[11].mxu1  ;;  %997 = vmatpush1.bf16.msra.mxu0 %v764_v16 }
 0x203   : > { %v755_v29 = vmax.f32 %v730_v24, 0.0  ;;  %v734_v30 = vadd.f32 %v733_v28, %v628_v23 }
 0x204   : > { %v756_v31 = vmax.f32 %v732_v27, 0.0 }
 0x205   : > { %v3942_v32 = vpack.c.bf16 %v755_v29, %v754_v26  ;;  %v757_v33 = vmax.f32 %v734_v30, 0.0 }
 0x206   : > { %v766_v34 = vpack.c.bf16 %v756_v31, %v754_v26 }
 0x207   : > { %814 = vst [vmem:[%s4423_s26 + $0x20] sm:$0xff] %v3942_v32  ;;  %v767_v36 = vpack.c.bf16 %v757_v33, %v755_v29  ;;  %v3943_v37 = vpack.c.bf16 %v757_v33, %v756_v31  ;;  %v737_v38 = vpop.f32.mrb[12].mxu1  ;;  %v873_v31 = vpop.permute.xlu0 %872 }
 0x208   : > { %v738_v39 = vadd.f32 %v737_v38, %v633_v35  ;;  %v739_v40 = vpop.f32.mrb[13].mxu1 }
 0x209   : > { %815 = vst [vmem:[%s4423_s26 + $0x28] sm:$0xff] %v3943_v37  ;;  %v740_v42 = vadd.f32 %v739_v40, %v633_v35  ;;  %v741_v43 = vpop.f32.mrb[14].mxu1  ;;  %998 = vmatprep.subr.bf16.mxu0 %v767_v36  ;;  %v878_v36 = vpop.permute.xlu1 %877 }
 0x20a   : > { %v758_v44 = vmax.f32 %v738_v39, 0.0  ;;  %v742_v45 = vadd.f32 %v741_v43, %v638_v41  ;;  %v743_v46 = vpop.f32.mrb[15].mxu1  ;;  %999 = vmatpush1.bf16.msra.mxu0 %v766_v34 }
 0x20b   : > { %v759_v47 = vmax.f32 %v740_v42, 0.0  ;;  %v744_v48 = vadd.f32 %v743_v46, %v638_v41 }
 0x20c   : > { %v760_v49 = vmax.f32 %v742_v45, 0.0 }
 0x20d   : > { %v3944_v50 = vpack.c.bf16 %v759_v47, %v758_v44  ;;  %v761_v51 = vmax.f32 %v744_v48, 0.0 }
 0x20e   : > { %v768_v52 = vpack.c.bf16 %v760_v49, %v758_v44 }
 0x20f   : > { %816 = vst [vmem:[%s4423_s26 + $0x30] sm:$0xff] %v3944_v50  ;;  %v769_v53 = vpack.c.bf16 %v761_v51, %v759_v47  ;;  %v3945_v54 = vpack.c.bf16 %v761_v51, %v760_v49  ;;  %v883_v47 = vpop.permute.xlu0 %882 }
 0x211   : > { %817 = vst [vmem:[%s4423_s26 + $0x38] sm:$0xff] %v3945_v54  ;;  %1000 = vmatprep.subr.bf16.mxu0 %v769_v53 }
 0x212   : > { %1001 = vmatpush1.bf16.msra.mxu0 %v768_v52  ;;  %v888_v52 = vpop.permute.xlu1 %887 }
 0x215   : > { %3857 = vmatmul.mubr.msk.bf16.vlgmr.msra.gmra.mrb[16].mxu0 %vm660_vm2, %v4032_v55 }
 0x216   : > { %1036 = vmatprep.mubr.bf16.mxu0 %v4160_v0 }
 0x21d   : > { %3858 = vmatmul.mubr.msk.bf16.gmra.mrb[20].mxu0 %vm660_vm2, %v4033_v56 }
 0x21e   : > { %1046 = vmatprep.mubr.bf16.mxu0 %v4160_v0 }
 0x225   : > { %3859 = vmatmul.mubr.msk.bf16.gmra.mrb[24].mxu0 %vm660_vm2, %v4034_v57 }
 0x226   : > { %1056 = vmatprep.mubr.bf16.mxu0 %v4160_v0 }
 0x22d   : > { %3860 = vmatmul.mubr.msk.bf16.gmra.mrb[28].mxu0 %vm660_vm2, %v4035_v58 }
 0x22e   : > { %1066 = vmatprep.mubr.bf16.mxu0 %v4160_v0 }
 0x235   : > { %3861 = vmatmul.mubr.msk.bf16.gmra.mrb[32].mxu0 %vm660_vm2, %v4036_v59 }
 0x236   : > { %1076 = vmatprep.mubr.bf16.mxu0 %v4160_v0 }
 0x23d   : > { %3862 = vmatmul.mubr.msk.bf16.gmra.mrb[36].mxu0 %vm660_vm2, %v4037_v60 }
 0x23e   : > { %1086 = vmatprep.mubr.bf16.mxu0 %v4160_v0 }
 0x245   : > { %3863 = vmatmul.mubr.msk.bf16.gmra.mrb[40].mxu0 %vm660_vm2, %v4038_v61 }
 0x246   : > { %1096 = vmatprep.mubr.bf16.mxu0 %v4160_v0 }
 0x24d   : > { %3864 = vmatmul.mubr.msk.bf16.gmra.mrb[44].mxu0 %vm660_vm2, %v4039_v62 }
 0x24e   : > { %1896 = vmatprep.mubr.bf16.mxu0 %v4160_v0 }
 0x2e8   : > { %v1028_v1 = vpop.f32.mrb[16].mxu0 }
 0x2e9   : > { %v1029_v2 = vadd.f32 %v1028_v1, %v853_v63  ;;  %v1030_v3 = vpop.f32.mrb[17].mxu0 }
 0x2ea   : > { %v1031_v5 = vadd.f32 %v1030_v3, %v853_v63  ;;  %v1032_v6 = vpop.f32.mrb[18].mxu0  ;;  %v893_v63 = vpop.permute.xlu0 %892 }
 0x2eb   : > { %v1033_v7 = vadd.f32 %v1032_v6, %v858_v4  ;;  %v1034_v8 = vpop.f32.mrb[19].mxu0  ;;  %v1107_v10 = vmax.f32 %v1029_v2, 0.0 }
 0x2ec   : > { %v1035_v9 = vadd.f32 %v1034_v8, %v858_v4  ;;  %v1108_v12 = vmax.f32 %v1031_v5, 0.0  ;;  %v898_v5 = vpop.permute.xlu1 %897 }
 0x2ed   : > { %v1109_v11 = vmax.f32 %v1033_v7, 0.0 }
 0x2ee   : > { %v1110_v13 = vmax.f32 %v1035_v9, 0.0 }
 0x2ef   : > { %v4473_v14 = vpack.c.bf16 %v1109_v11, %v1107_v10 }
 0x2f0   : > { %v4475_v16 = vpack.c.bf16 %v1110_v13, %v1108_v12  ;;  %v1038_v17 = vpop.f32.mrb[20].mxu0 }
 0x2f1   : > { %v1039_v18 = vadd.f32 %v1038_v17, %v863_v15  ;;  %v1040_v19 = vpop.f32.mrb[21].mxu0 }
 0x2f2   : > { %v1041_v21 = vadd.f32 %v1040_v19, %v863_v15  ;;  %v1042_v22 = vpop.f32.mrb[22].mxu0  ;;  %1415 = vmatprep.subr.bf16.mxu1 %v4475_v16  ;;  %1864 = vmatprep.subr.bf16.mxu0 %v4475_v16 }
 0x2f3   : > { %v1043_v23 = vadd.f32 %v1042_v22, %v868_v20  ;;  %v1044_v24 = vpop.f32.mrb[23].mxu0  ;;  %1416 = vmatpush1.bf16.msra.mxu1 %v4473_v14  ;;  %1865 = vmatpush1.bf16.msra.mxu0 %v4473_v14  ;;  %v1111_v26 = vmax.f32 %v1039_v18, 0.0  ;;  %v903_v18 = vpop.permute.xlu0 %902 }
 0x2f4   : > { %v1045_v25 = vadd.f32 %v1044_v24, %v868_v20  ;;  %v1112_v28 = vmax.f32 %v1041_v21, 0.0 }
 0x2f5   : > { %v1113_v27 = vmax.f32 %v1043_v23, 0.0  ;;  %v908_v23 = vpop.permute.xlu1 %907 }
 0x2f6   : > { %v1114_v29 = vmax.f32 %v1045_v25, 0.0 }
 0x2f7   : > { %v4481_v30 = vpack.c.bf16 %v1113_v27, %v1111_v26 }
 0x2f8   : > { %v4483_v32 = vpack.c.bf16 %v1114_v29, %v1112_v28  ;;  %v1048_v33 = vpop.f32.mrb[24].mxu0 }
 0x2f9   : > { %v1049_v34 = vadd.f32 %v1048_v33, %v873_v31  ;;  %v1050_v35 = vpop.f32.mrb[25].mxu0 }
 0x2fa   : > { %v1051_v37 = vadd.f32 %v1050_v35, %v873_v31  ;;  %v1052_v38 = vpop.f32.mrb[26].mxu0  ;;  %1417 = vmatprep.subr.bf16.mxu1 %v4483_v32  ;;  %1866 = vmatprep.subr.bf16.mxu0 %v4483_v32 }
 0x2fb   : > { %v1053_v39 = vadd.f32 %v1052_v38, %v878_v36  ;;  %v1054_v40 = vpop.f32.mrb[27].mxu0  ;;  %1418 = vmatpush1.bf16.msra.mxu1 %v4481_v30  ;;  %1867 = vmatpush1.bf16.msra.mxu0 %v4481_v30  ;;  %v1115_v42 = vmax.f32 %v1049_v34, 0.0 }
 0x2fc   : > { %v1055_v41 = vadd.f32 %v1054_v40, %v878_v36  ;;  %v1116_v44 = vmax.f32 %v1051_v37, 0.0  ;;  %v913_v36 = vpop.permute.xlu0 %912 }
 0x2fd   : > { %v1117_v43 = vmax.f32 %v1053_v39, 0.0 }
 0x2fe   : > { %v1118_v45 = vmax.f32 %v1055_v41, 0.0  ;;  %v918_v41 = vpop.permute.xlu1 %917 }
 0x2ff   : > { %v4489_v46 = vpack.c.bf16 %v1117_v43, %v1115_v42 }
 0x300   : > { %v4491_v48 = vpack.c.bf16 %v1118_v45, %v1116_v44  ;;  %v1058_v49 = vpop.f32.mrb[28].mxu0 }
 0x301   : > { %v1059_v50 = vadd.f32 %v1058_v49, %v883_v47  ;;  %v1060_v51 = vpop.f32.mrb[29].mxu0 }
 0x302   : > { %v1061_v53 = vadd.f32 %v1060_v51, %v883_v47  ;;  %v1062_v54 = vpop.f32.mrb[30].mxu0  ;;  %1419 = vmatprep.subr.bf16.mxu1 %v4491_v48  ;;  %1868 = vmatprep.subr.bf16.mxu0 %v4491_v48 }
 0x303   : > { %v1063_v55 = vadd.f32 %v1062_v54, %v888_v52  ;;  %v1064_v56 = vpop.f32.mrb[31].mxu0  ;;  %1420 = vmatpush1.bf16.msra.mxu1 %v4489_v46  ;;  %1869 = vmatpush1.bf16.msra.mxu0 %v4489_v46  ;;  %v1119_v58 = vmax.f32 %v1059_v50, 0.0  ;;  %v923_v54 = vpop.permute.xlu0 %922 }
 0x304   : > { %v1065_v57 = vadd.f32 %v1064_v56, %v888_v52  ;;  %v1120_v60 = vmax.f32 %v1061_v53, 0.0 }
 0x305   : > { %v1121_v59 = vmax.f32 %v1063_v55, 0.0 }
 0x306   : > { %v1122_v61 = vmax.f32 %v1065_v57, 0.0 }
 0x307   : > { %v4497_v62 = vpack.c.bf16 %v1121_v59, %v1119_v58  ;;  %v928_v59 = vpop.permute.xlu1 %927 }
 0x308   : > { %v4499_v1 = vpack.c.bf16 %v1122_v61, %v1120_v60  ;;  %v1068_v2 = vpop.f32.mrb[32].mxu0 }
 0x309   : > { %v1069_v3 = vadd.f32 %v1068_v2, %v893_v63  ;;  %v1070_v4 = vpop.f32.mrb[33].mxu0 }
 0x30a   : > { %v1071_v6 = vadd.f32 %v1070_v4, %v893_v63  ;;  %v1072_v7 = vpop.f32.mrb[34].mxu0  ;;  %1421 = vmatprep.subr.bf16.mxu1 %v4499_v1  ;;  %1870 = vmatprep.subr.bf16.mxu0 %v4499_v1 }
 0x30b   : > { %v1073_v8 = vadd.f32 %v1072_v7, %v898_v5  ;;  %v1074_v9 = vpop.f32.mrb[35].mxu0  ;;  %1422 = vmatpush1.bf16.msra.mxu1 %v4497_v62  ;;  %1871 = vmatpush1.bf16.msra.mxu0 %v4497_v62  ;;  %v1123_v11 = vmax.f32 %v1069_v3, 0.0 }
 0x30c   : > { %v1075_v10 = vadd.f32 %v1074_v9, %v898_v5  ;;  %v1124_v13 = vmax.f32 %v1071_v6, 0.0 }
 0x30d   : > { %v1125_v12 = vmax.f32 %v1073_v8, 0.0 }
 0x30e   : > { %v1126_v15 = vmax.f32 %v1075_v10, 0.0  ;;  %v4040_v10 = vld [vmem:[%s5279_s7] sm:$0xff]  }
 0x30f   : > { %v4505_v17 = vpack.c.bf16 %v1125_v12, %v1123_v11  ;;  %v4041_v11 = vld [vmem:[%s5279_s7 + $0x80] sm:$0xff]   ;;  %v4042_v12 = vld [vmem:[%s5279_s7 + $0x8] sm:$0xff]  }
 0x310   : > { %v4507_v19 = vpack.c.bf16 %v1126_v15, %v1124_v13  ;;  %v1078_v20 = vpop.f32.mrb[36].mxu0  ;;  %v4049_v13 = vld [vmem:[%s5279_s7 + $0x88] sm:$0xff]   ;;  %v4043_v15 = vld [vmem:[%s5279_s7 + $0x10] sm:$0xff]  }
 0x311   : > { %v1079_v21 = vadd.f32 %v1078_v20, %v903_v18  ;;  %v1080_v22 = vpop.f32.mrb[37].mxu0  ;;  %v4044_v20 = vld [vmem:[%s5279_s7 + $0x18] sm:$0xff]  }
 0x312   : > { %v1081_v24 = vadd.f32 %v1080_v22, %v903_v18  ;;  %v1082_v25 = vpop.f32.mrb[38].mxu0  ;;  %1423 = vmatprep.subr.bf16.mxu1 %v4507_v19  ;;  %1872 = vmatprep.subr.bf16.mxu0 %v4507_v19  ;;  %v4051_v18 = vld [vmem:[%s5279_s7 + $0x90] sm:$0xff]   ;;  %v4045_v22 = vld [vmem:[%s5279_s7 + $0x20] sm:$0xff]  }
 0x313   : > { %v1083_v26 = vadd.f32 %v1082_v25, %v908_v23  ;;  %v1084_v27 = vpop.f32.mrb[39].mxu0  ;;  %1424 = vmatpush1.bf16.msra.mxu1 %v4505_v17  ;;  %1873 = vmatpush1.bf16.msra.mxu0 %v4505_v17  ;;  %v1127_v29 = vmax.f32 %v1079_v21, 0.0  ;;  %v4053_v21 = vld [vmem:[%s5279_s7 + $0x98] sm:$0xff]   ;;  %v4057_v25 = vld [vmem:[%s5279_s7 + $0xa8] sm:$0xff]  }
 0x314   : > { %v1085_v28 = vadd.f32 %v1084_v27, %v908_v23  ;;  %v1128_v33 = vmax.f32 %v1081_v24, 0.0  ;;  %v4055_v23 = vld [vmem:[%s5279_s7 + $0xa0] sm:$0xff]   ;;  %v4046_v24 = vld [vmem:[%s5279_s7 + $0x28] sm:$0xff]   ;;  %v4048_v27 = vld [vmem:[%s5279_s7 + $0x38] sm:$0xff]  }
 0x315   : > { %v1129_v31 = vmax.f32 %v1083_v26, 0.0  ;;  %v4059_v26 = vld [vmem:[%s5279_s7 + $0xb0] sm:$0xff]  }
 0x316   : > { %v1130_v34 = vmax.f32 %v1085_v28, 0.0  ;;  %v4061_v28 = vld [vmem:[%s5279_s7 + $0xb8] sm:$0xff]  }
 0x317   : > { %v4513_v35 = vpack.c.bf16 %v1129_v31, %v1127_v29  ;;  %v4050_v29 = vld [vmem:[%s5279_s7 + $0x40] sm:$0xff]  }
 0x318   : > { %v4515_v37 = vpack.c.bf16 %v1130_v34, %v1128_v33  ;;  %v1088_v38 = vpop.f32.mrb[40].mxu0  ;;  %v4063_v31 = vld [vmem:[%s5279_s7 + $0xc0] sm:$0xff]   ;;  %v4052_v33 = vld [vmem:[%s5279_s7 + $0x48] sm:$0xff]  }
 0x319   : > { %v1089_v39 = vadd.f32 %v1088_v38, %v913_v36  ;;  %v1090_v40 = vpop.f32.mrb[41].mxu0  ;;  %v4065_v34 = vld [vmem:[%s5279_s7 + $0xc8] sm:$0xff]   ;;  %v4067_v38 = vld [vmem:[%s5279_s7 + $0xd0] sm:$0xff]  }
 0x31a   : > { %v1091_v42 = vadd.f32 %v1090_v40, %v913_v36  ;;  %v1092_v43 = vpop.f32.mrb[42].mxu0  ;;  %1425 = vmatprep.subr.bf16.mxu1 %v4515_v37  ;;  %1874 = vmatprep.subr.bf16.mxu0 %v4515_v37  ;;  %v4054_v36 = vld [vmem:[%s5279_s7 + $0x50] sm:$0xff]   ;;  %v4068_v40 = vld [vmem:[%s5279_s7 + $0xd8] sm:$0xff]  }
 0x31b   : > { %v1093_v44 = vadd.f32 %v1092_v43, %v918_v41  ;;  %v1094_v45 = vpop.f32.mrb[43].mxu0  ;;  %1426 = vmatpush1.bf16.msra.mxu1 %v4513_v35  ;;  %1875 = vmatpush1.bf16.msra.mxu0 %v4513_v35  ;;  %v1131_v49 = vmax.f32 %v1089_v39, 0.0  ;;  %v4056_v39 = vld [vmem:[%s5279_s7 + $0x58] sm:$0xff]   ;;  %v4060_v43 = vld [vmem:[%s5279_s7 + $0x68] sm:$0xff]  }
 0x31c   : > { %v1095_v47 = vadd.f32 %v1094_v45, %v918_v41  ;;  %v1132_v51 = vmax.f32 %v1091_v42, 0.0  ;;  %v4058_v41 = vld [vmem:[%s5279_s7 + $0x60] sm:$0xff]   ;;  %v4062_v45 = vld [vmem:[%s5279_s7 + $0x70] sm:$0xff]  }
 0x31d   : > { %v1133_v50 = vmax.f32 %v1093_v44, 0.0  ;;  %v4070_v42 = vld [vmem:[%s5279_s7 + $0xe0] sm:$0xff]   ;;  %v4072_v44 = vld [vmem:[%s5279_s7 + $0xe8] sm:$0xff]  }
 0x31e   : > { %v1134_v52 = vmax.f32 %v1095_v47, 0.0  ;;  %v4074_v47 = vld [vmem:[%s5279_s7 + $0xf0] sm:$0xff]  }
 0x31f   : > { %v4521_v53 = vpack.c.bf16 %v1133_v50, %v1131_v49  ;;  %v4064_v49 = vld [vmem:[%s5279_s7 + $0x78] sm:$0xff]  }
 0x320   : > { %v4523_v55 = vpack.c.bf16 %v1134_v52, %v1132_v51  ;;  %v1098_v56 = vpop.f32.mrb[44].mxu0  ;;  %v4076_v50 = vld [vmem:[%s5279_s7 + $0xf8] sm:$0xff]   ;;  %v4066_v51 = vld [vmem:[%s5279_s7 + $0x100] sm:$0xff]  }
 0x321   : > { %v1099_v57 = vadd.f32 %v1098_v56, %v923_v54  ;;  %v1100_v58 = vpop.f32.mrb[45].mxu0  ;;  %v4079_v52 = vld [vmem:[%s5279_s7 + $0x180] sm:$0xff]   ;;  %v4081_v56 = vld [vmem:[%s5279_s7 + $0x188] sm:$0xff]  }
 0x322   : > { %v1101_v60 = vadd.f32 %v1100_v58, %v923_v54  ;;  %v1102_v61 = vpop.f32.mrb[46].mxu0  ;;  %1427 = vmatprep.subr.bf16.mxu1 %v4523_v55  ;;  %1876 = vmatprep.subr.bf16.mxu0 %v4523_v55  ;;  %v4069_v54 = vld [vmem:[%s5279_s7 + $0x108] sm:$0xff]  }
 0x323   : > { %v1103_v63 = vadd.f32 %v1102_v61, %v928_v59  ;;  %v1104_v2 = vpop.f32.mrb[47].mxu0  ;;  %1428 = vmatpush1.bf16.msra.mxu1 %v4521_v53  ;;  %1877 = vmatpush1.bf16.msra.mxu0 %v4521_v53  ;;  %v1135_v4 = vmax.f32 %v1099_v57, 0.0  ;;  %v4095_v57 = vld [vmem:[%s5279_s7 + $0x1c0] sm:$0xff]   ;;  %v4084_v58 = vld [vmem:[%s5279_s7 + $0x148] sm:$0xff]   ;;  %v4098_v61 = vld [vmem:[%s5279_s7 + $0x1d0] sm:$0xff]  }
 0x324   : > { %v1105_v3 = vadd.f32 %v1104_v2, %v928_v59  ;;  %v1136_v6 = vmax.f32 %v1101_v60, 0.0  ;;  %v4097_v59 = vld [vmem:[%s5279_s7 + $0x1c8] sm:$0xff]   ;;  %v4086_v60 = vld [vmem:[%s5279_s7 + $0x150] sm:$0xff]  }
 0x325   : > { %v1137_v5 = vmax.f32 %v1103_v63, 0.0 }
 0x326   : > { %v1138_v7 = vmax.f32 %v1105_v3, 0.0 }
 0x327   : > { %v4529_v8 = vpack.c.bf16 %v1137_v5, %v1135_v4  ;;  %v4088_v4 = vld [vmem:[%s5279_s7 + $0x158] sm:$0xff]  }
 0x328   : > { %v4531_v9 = vpack.c.bf16 %v1138_v7, %v1136_v6  ;;  %v4100_v6 = vld [vmem:[%s5279_s7 + $0x1d8] sm:$0xff]  }
 0x32a   : > { %1429 = vmatprep.subr.bf16.mxu1 %v4531_v9  ;;  %1878 = vmatprep.subr.bf16.mxu0 %v4531_v9 }
 0x32b   : > { %1430 = vmatpush1.bf16.msra.mxu1 %v4529_v8  ;;  %1879 = vmatpush1.bf16.msra.mxu0 %v4529_v8 }
 0x32c   : > { %2313 = vmatprep.subr.bf16.mxu1 %v4475_v16  ;;  %2762 = vmatprep.subr.bf16.mxu0 %v4475_v16 }
 0x32e   : > { %1448 = vmatmul.mubr.bf16.vlgmr.msra.gmra.mrb[16].mxu1 %v4040_v10  ;;  %1897 = vmatmul.mubr.bf16.vlgmr.msra.gmra.mrb[48].mxu0 %v4041_v11 }
 0x32f   : > { %2314 = vmatpush1.bf16.msra.mxu1 %v4473_v14  ;;  %2763 = vmatpush1.bf16.msra.mxu0 %v4473_v14 }
 0x330   : > { %2315 = vmatprep.subr.bf16.mxu1 %v4483_v32  ;;  %2764 = vmatprep.subr.bf16.mxu0 %v4483_v32 }
 0x331   : > { %1457 = vmatprep.mubr.bf16.mxu1 %v4160_v0  ;;  %1906 = vmatprep.mubr.bf16.mxu0 %v4160_v0 }
 0x333   : > { %2316 = vmatpush1.bf16.msra.mxu1 %v4481_v30  ;;  %2765 = vmatpush1.bf16.msra.mxu0 %v4481_v30 }
 0x334   : > { %2317 = vmatprep.subr.bf16.mxu1 %v4491_v48  ;;  %2766 = vmatprep.subr.bf16.mxu0 %v4491_v48 }
 0x336   : > { %1458 = vmatmul.mubr.bf16.gmra.mrb[20].mxu1 %v4042_v12  ;;  %1907 = vmatmul.mubr.bf16.gmra.mrb[52].mxu0 %v4049_v13 }
 0x337   : > { %2318 = vmatpush1.bf16.msra.mxu1 %v4489_v46  ;;  %2767 = vmatpush1.bf16.msra.mxu0 %v4489_v46 }
 0x338   : > { %2319 = vmatprep.subr.bf16.mxu1 %v4499_v1  ;;  %2768 = vmatprep.subr.bf16.mxu0 %v4499_v1 }
 0x339   : > { %1467 = vmatprep.mubr.bf16.mxu1 %v4160_v0  ;;  %1916 = vmatprep.mubr.bf16.mxu0 %v4160_v0 }
 0x33b   : > { %2320 = vmatpush1.bf16.msra.mxu1 %v4497_v62  ;;  %2769 = vmatpush1.bf16.msra.mxu0 %v4497_v62 }
 0x33c   : > { %2321 = vmatprep.subr.bf16.mxu1 %v4507_v19  ;;  %2770 = vmatprep.subr.bf16.mxu0 %v4507_v19 }
 0x33e   : > { %1468 = vmatmul.mubr.bf16.gmra.mrb[24].mxu1 %v4043_v15  ;;  %1917 = vmatmul.mubr.bf16.gmra.mrb[56].mxu0 %v4051_v18 }
 0x33f   : > { %2322 = vmatpush1.bf16.msra.mxu1 %v4505_v17  ;;  %2771 = vmatpush1.bf16.msra.mxu0 %v4505_v17 }
 0x340   : > { %2323 = vmatprep.subr.bf16.mxu1 %v4515_v37  ;;  %2772 = vmatprep.subr.bf16.mxu0 %v4515_v37 }
 0x341   : > { %1477 = vmatprep.mubr.bf16.mxu1 %v4160_v0  ;;  %1926 = vmatprep.mubr.bf16.mxu0 %v4160_v0 }
 0x343   : > { %2324 = vmatpush1.bf16.msra.mxu1 %v4513_v35  ;;  %2773 = vmatpush1.bf16.msra.mxu0 %v4513_v35 }
 0x344   : > { %2325 = vmatprep.subr.bf16.mxu1 %v4523_v55  ;;  %2774 = vmatprep.subr.bf16.mxu0 %v4523_v55 }
 0x346   : > { %1478 = vmatmul.mubr.bf16.gmra.mrb[28].mxu1 %v4044_v20  ;;  %1927 = vmatmul.mubr.bf16.gmra.mrb[60].mxu0 %v4053_v21 }
 0x347   : > { %2326 = vmatpush1.bf16.msra.mxu1 %v4521_v53  ;;  %2775 = vmatpush1.bf16.msra.mxu0 %v4521_v53 }
 0x348   : > { %2327 = vmatprep.subr.bf16.mxu1 %v4531_v9  ;;  %2776 = vmatprep.subr.bf16.mxu0 %v4531_v9 }
 0x349   : > { %1487 = vmatprep.mubr.bf16.mxu1 %v4160_v0  ;;  %1936 = vmatprep.mubr.bf16.mxu0 %v4160_v0 }
 0x34b   : > { %2328 = vmatpush1.bf16.msra.mxu1 %v4529_v8  ;;  %2777 = vmatpush1.bf16.msra.mxu0 %v4529_v8 }
 0x34c   : > { %3946 = vmatprep.subr.bf16.mxu1 %v4475_v16  ;;  %v4047_v16 = vld [vmem:[%s5279_s7 + $0x30] sm:$0xff]  }
 0x34e   : > { %1488 = vmatmul.mubr.bf16.gmra.mrb[32].mxu1 %v4045_v22  ;;  %1937 = vmatmul.mubr.bf16.gmra.mrb[64].mxu0 %v4055_v23  ;;  %v4090_v22 = vld [vmem:[%s5279_s7 + $0x160] sm:$0xff]  }
 0x34f   : > { %1497 = vmatprep.mubr.bf16.mxu1 %v4160_v0  ;;  %1946 = vmatprep.mubr.bf16.mxu0 %v4160_v0 }
 0x356   : > { %1498 = vmatmul.mubr.bf16.gmra.mrb[36].mxu1 %v4046_v24  ;;  %1947 = vmatmul.mubr.bf16.gmra.mrb[68].mxu0 %v4057_v25  ;;  %v4102_v24 = vld [vmem:[%s5279_s7 + $0x1e0] sm:$0xff]  }
 0x357   : > { %1507 = vmatprep.mubr.bf16.mxu1 %v4160_v0  ;;  %1956 = vmatprep.mubr.bf16.mxu0 %v4160_v0 }
 0x35e   : > { %1508 = vmatmul.mubr.bf16.gmra.mrb[40].mxu1 %v4047_v16  ;;  %1957 = vmatmul.mubr.bf16.gmra.mrb[72].mxu0 %v4059_v26 }
 0x35f   : > { %1517 = vmatprep.mubr.bf16.mxu1 %v4160_v0  ;;  %1966 = vmatprep.mubr.bf16.mxu0 %v4160_v0 }
 0x366   : > { %1518 = vmatmul.mubr.bf16.gmra.mrb[44].mxu1 %v4048_v27  ;;  %1967 = vmatmul.mubr.bf16.gmra.mrb[76].mxu0 %v4061_v28 }
 0x367   : > { %1527 = vmatprep.mubr.bf16.mxu1 %v4160_v0  ;;  %1976 = vmatprep.mubr.bf16.mxu0 %v4160_v0 }
 0x36e   : > { %1528 = vmatmul.mubr.bf16.gmra.mrb[48].mxu1 %v4050_v29  ;;  %1977 = vmatmul.mubr.bf16.gmra.mrb[80].mxu0 %v4063_v31 }
 0x36f   : > { %1537 = vmatprep.mubr.bf16.mxu1 %v4160_v0  ;;  %1986 = vmatprep.mubr.bf16.mxu0 %v4160_v0 }
 0x376   : > { %1538 = vmatmul.mubr.bf16.gmra.mrb[52].mxu1 %v4052_v33  ;;  %1987 = vmatmul.mubr.bf16.gmra.mrb[84].mxu0 %v4065_v34 }
 0x377   : > { %1547 = vmatprep.mubr.bf16.mxu1 %v4160_v0  ;;  %1996 = vmatprep.mubr.bf16.mxu0 %v4160_v0 }
 0x37e   : > { %1548 = vmatmul.mubr.bf16.gmra.mrb[56].mxu1 %v4054_v36  ;;  %1997 = vmatmul.mubr.bf16.gmra.mrb[88].mxu0 %v4067_v38 }
 0x37f   : > { %1557 = vmatprep.mubr.bf16.mxu1 %v4160_v0  ;;  %2006 = vmatprep.mubr.bf16.mxu0 %v4160_v0 }
 0x386   : > { %1558 = vmatmul.mubr.bf16.gmra.mrb[60].mxu1 %v4056_v39  ;;  %2007 = vmatmul.mubr.bf16.gmra.mrb[92].mxu0 %v4068_v40  ;;  %v4092_v39 = vld [vmem:[%s5279_s7 + $0x168] sm:$0xff]  }
 0x387   : > { %1567 = vmatprep.mubr.bf16.mxu1 %v4160_v0  ;;  %2016 = vmatprep.mubr.bf16.mxu0 %v4160_v0 }
 0x38e   : > { %1568 = vmatmul.mubr.bf16.gmra.mrb[64].mxu1 %v4058_v41  ;;  %2017 = vmatmul.mubr.bf16.gmra.mrb[96].mxu0 %v4070_v42 }
 0x38f   : > { %1577 = vmatprep.mubr.bf16.mxu1 %v4160_v0  ;;  %2026 = vmatprep.mubr.bf16.mxu0 %v4160_v0 }
 0x396   : > { %1578 = vmatmul.mubr.bf16.gmra.mrb[68].mxu1 %v4060_v43  ;;  %2027 = vmatmul.mubr.bf16.gmra.mrb[100].mxu0 %v4072_v44 }
 0x397   : > { %1587 = vmatprep.mubr.bf16.mxu1 %v4160_v0  ;;  %2036 = vmatprep.mubr.bf16.mxu0 %v4160_v0 }
 0x39e   : > { %1588 = vmatmul.mubr.bf16.gmra.mrb[72].mxu1 %v4062_v45  ;;  %2037 = vmatmul.mubr.bf16.gmra.mrb[104].mxu0 %v4074_v47 }
 0x39f   : > { %1597 = vmatprep.mubr.bf16.mxu1 %v4160_v0  ;;  %2046 = vmatprep.mubr.bf16.mxu0 %v4160_v0 }
 0x3a6   : > { %1598 = vmatmul.mubr.bf16.gmra.mrb[76].mxu1 %v4064_v49  ;;  %2047 = vmatmul.mubr.bf16.gmra.mrb[108].mxu0 %v4076_v50 }
 0x3a7   : > { %2345 = vmatprep.mubr.bf16.mxu1 %v4160_v0  ;;  %2794 = vmatprep.mubr.bf16.mxu0 %v4160_v0 }
 0x3ae   : > { %2346 = vmatmul.mubr.bf16.vlgmr.msra.gmra.mrb[80].mxu1 %v4066_v51  ;;  %2795 = vmatmul.mubr.bf16.vlgmr.msra.gmra.mrb[112].mxu0 %v4079_v52 }
 0x3af   : > { %3954 = vmatpush1.bf16.msra.mxu1 %v4473_v14  ;;  %2355 = vmatprep.mubr.bf16.mxu1 %v4160_v0  ;;  %v4071_v14 = vld [vmem:[%s5279_s7 + $0x110] sm:$0xff]  }
 0x3b0   : > { %3947 = vmatprep.subr.bf16.mxu1 %v4483_v32  ;;  %2804 = vmatprep.mubr.bf16.mxu0 %v4160_v0  ;;  %v4073_v32 = vld [vmem:[%s5279_s7 + $0x118] sm:$0xff]  }
 0x3b3   : > { %3955 = vmatpush1.bf16.msra.mxu1 %v4481_v30  ;;  %v4083_v30 = vld [vmem:[%s5279_s7 + $0x190] sm:$0xff]  }
 0x3b4   : > { %3948 = vmatprep.subr.bf16.mxu1 %v4491_v48  ;;  %v4075_v48 = vld [vmem:[%s5279_s7 + $0x120] sm:$0xff]  }
 0x3b6   : > { %2356 = vmatmul.mubr.bf16.gmra.mrb[84].mxu1 %v4069_v54  ;;  %2805 = vmatmul.mubr.bf16.gmra.mrb[116].mxu0 %v4081_v56  ;;  %v4094_v56 = vld [vmem:[%s5279_s7 + $0x170] sm:$0xff]  }
 0x3b7   : > { %3956 = vmatpush1.bf16.msra.mxu1 %v4489_v46  ;;  %2365 = vmatprep.mubr.bf16.mxu1 %v4160_v0  ;;  %v4085_v46 = vld [vmem:[%s5279_s7 + $0x198] sm:$0xff]  }
 0x3b8   : > { %3949 = vmatprep.subr.bf16.mxu1 %v4499_v1  ;;  %2814 = vmatprep.mubr.bf16.mxu0 %v4160_v0  ;;  %v4077_v1 = vld [vmem:[%s5279_s7 + $0x128] sm:$0xff]  }
 0x3bb   : > { %3957 = vmatpush1.bf16.msra.mxu1 %v4497_v62  ;;  %v4087_v62 = vld [vmem:[%s5279_s7 + $0x1a0] sm:$0xff]  }
 0x3bc   : > { %3950 = vmatprep.subr.bf16.mxu1 %v4507_v19  ;;  %v4078_v19 = vld [vmem:[%s5279_s7 + $0x130] sm:$0xff]  }
 0x3be   : > { %2366 = vmatmul.mubr.bf16.gmra.mrb[88].mxu1 %v4071_v14  ;;  %2815 = vmatmul.mubr.bf16.gmra.mrb[120].mxu0 %v4083_v30 }
 0x3bf   : > { %3958 = vmatpush1.bf16.msra.mxu1 %v4505_v17  ;;  %2375 = vmatprep.mubr.bf16.mxu1 %v4160_v0  ;;  %v4089_v17 = vld [vmem:[%s5279_s7 + $0x1a8] sm:$0xff]  }
 0x3c0   : > { %3951 = vmatprep.subr.bf16.mxu1 %v4515_v37  ;;  %2824 = vmatprep.mubr.bf16.mxu0 %v4160_v0  ;;  %v4080_v37 = vld [vmem:[%s5279_s7 + $0x138] sm:$0xff]  }
 0x3c3   : > { %3959 = vmatpush1.bf16.msra.mxu1 %v4513_v35  ;;  %v4091_v35 = vld [vmem:[%s5279_s7 + $0x1b0] sm:$0xff]  }
 0x3c4   : > { %3952 = vmatprep.subr.bf16.mxu1 %v4523_v55  ;;  %v4082_v55 = vld [vmem:[%s5279_s7 + $0x140] sm:$0xff]  }
 0x3c6   : > { %2376 = vmatmul.mubr.bf16.gmra.mrb[92].mxu1 %v4073_v32  ;;  %2825 = vmatmul.mubr.bf16.gmra.mrb[124].mxu0 %v4085_v46 }
 0x3c7   : > { %3960 = vmatpush1.bf16.msra.mxu1 %v4521_v53  ;;  %2385 = vmatprep.mubr.bf16.mxu1 %v4160_v0  ;;  %v4093_v53 = vld [vmem:[%s5279_s7 + $0x1b8] sm:$0xff]  }
 0x3c8   : > { %3953 = vmatprep.subr.bf16.mxu1 %v4531_v9  ;;  %2834 = vmatprep.mubr.bf16.mxu0 %v4160_v0 }
 0x3cb   : > { %3961 = vmatpush1.bf16.msra.mxu1 %v4529_v8 }
 0x3ce   : > { %2386 = vmatmul.mubr.bf16.gmra.mrb[96].mxu1 %v4075_v48  ;;  %2835 = vmatmul.mubr.bf16.gmra.mrb[128].mxu0 %v4087_v62 }
 0x3cf   : > { %2395 = vmatprep.mubr.bf16.mxu1 %v4160_v0  ;;  %2844 = vmatprep.mubr.bf16.mxu0 %v4160_v0 }
 0x3d6   : > { %2396 = vmatmul.mubr.bf16.gmra.mrb[100].mxu1 %v4077_v1  ;;  %2845 = vmatmul.mubr.bf16.gmra.mrb[132].mxu0 %v4089_v17 }
 0x3d7   : > { %2405 = vmatprep.mubr.bf16.mxu1 %v4160_v0  ;;  %2854 = vmatprep.mubr.bf16.mxu0 %v4160_v0 }
 0x3de   : > { %2406 = vmatmul.mubr.bf16.gmra.mrb[104].mxu1 %v4078_v19  ;;  %2855 = vmatmul.mubr.bf16.gmra.mrb[136].mxu0 %v4091_v35 }
 0x3df   : > { %2415 = vmatprep.mubr.bf16.mxu1 %v4160_v0  ;;  %2864 = vmatprep.mubr.bf16.mxu0 %v4160_v0 }
 0x3e6   : > { %2416 = vmatmul.mubr.bf16.gmra.mrb[108].mxu1 %v4080_v37  ;;  %2865 = vmatmul.mubr.bf16.gmra.mrb[140].mxu0 %v4093_v53 }
 0x3e7   : > { %2425 = vmatprep.mubr.bf16.mxu1 %v4160_v0  ;;  %2874 = vmatprep.mubr.bf16.mxu0 %v4160_v0 }
 0x3ee   : > { %2426 = vmatmul.mubr.bf16.gmra.mrb[112].mxu1 %v4082_v55  ;;  %2875 = vmatmul.mubr.bf16.gmra.mrb[144].mxu0 %v4095_v57  ;;  %v4096_v55 = vld [vmem:[%s5279_s7 + $0x178] sm:$0xff]  }
 0x3ef   : > { %2435 = vmatprep.mubr.bf16.mxu1 %v4160_v0  ;;  %2884 = vmatprep.mubr.bf16.mxu0 %v4160_v0 }
 0x3f6   : > { %2436 = vmatmul.mubr.bf16.gmra.mrb[116].mxu1 %v4084_v58  ;;  %2885 = vmatmul.mubr.bf16.gmra.mrb[148].mxu0 %v4097_v59 }
 0x3f7   : > { %2445 = vmatprep.mubr.bf16.mxu1 %v4160_v0  ;;  %2894 = vmatprep.mubr.bf16.mxu0 %v4160_v0 }
 0x3fe   : > { %2446 = vmatmul.mubr.bf16.gmra.mrb[120].mxu1 %v4086_v60  ;;  %2895 = vmatmul.mubr.bf16.gmra.mrb[152].mxu0 %v4098_v61 }
 0x3ff   : > { %2455 = vmatprep.mubr.bf16.mxu1 %v4160_v0  ;;  %2904 = vmatprep.mubr.bf16.mxu0 %v4160_v0 }
 0x401   : > { %v1449_v63 = vpop.f32.mrb[16].mxu1  ;;  %v1898_v2 = vpop.f32.mrb[48].mxu0 }
 0x402   : > { %v1451_v3 = vpop.f32.mrb[17].mxu1  ;;  %v1900_v5 = vpop.f32.mrb[49].mxu0 }
 0x403   : > { %v1453_v7 = vpop.f32.mrb[18].mxu1  ;;  %v1902_v8 = vpop.f32.mrb[50].mxu0  ;;  %v1672_v9 = vmax.f32 %v1449_v63, %v1451_v3  ;;  %v2121_v11 = vmax.f32 %v1898_v2, %v1900_v5 }
 0x404   : > { %v1455_v10 = vpop.f32.mrb[19].mxu1  ;;  %v1904_v12 = vpop.f32.mrb[51].mxu0 }
 0x405   : > { %1704 = vst [vmem:[%s4809_s30] sm:$0xff] %v1672_v9  ;;  %v1673_v13 = vmax.f32 %v1453_v7, %v1455_v10  ;;  %2153 = vst [vmem:[%s4809_s30 + $0x100] sm:$0xff] %v2121_v11  ;;  %v2122_v15 = vmax.f32 %v1902_v8, %v1904_v12  ;;  %v4099_v8 = vld [vmem:[%s5279_s7 + $0x1e8] sm:$0xff]  }
 0x406   : > { %2456 = vmatmul.mubr.bf16.gmra.mrb[124].mxu1 %v4088_v4  ;;  %2905 = vmatmul.mubr.bf16.gmra.mrb[156].mxu0 %v4100_v6 }
 0x407   : > { %2465 = vmatprep.mubr.bf16.mxu1 %v4160_v0  ;;  %2914 = vmatprep.mubr.bf16.mxu0 %v4160_v0  ;;  %1705 = vst [vmem:[%s4809_s30 + $0x8] sm:$0xff] %v1673_v13  ;;  %2154 = vst [vmem:[%s4809_s30 + $0x108] sm:$0xff] %v2122_v15 }
 0x409   : > { %v1459_v18 = vpop.f32.mrb[20].mxu1  ;;  %v1908_v20 = vpop.f32.mrb[52].mxu0 }
 0x40a   : > { %v1461_v21 = vpop.f32.mrb[21].mxu1  ;;  %v1910_v23 = vpop.f32.mrb[53].mxu0 }
 0x40b   : > { %v1463_v25 = vpop.f32.mrb[22].mxu1  ;;  %v1912_v16 = vpop.f32.mrb[54].mxu0  ;;  %v1674_v26 = vmax.f32 %v1459_v18, %v1461_v21  ;;  %v2123_v28 = vmax.f32 %v1908_v20, %v1910_v23 }
 0x40c   : > { %v1465_v27 = vpop.f32.mrb[23].mxu1  ;;  %v1914_v29 = vpop.f32.mrb[55].mxu0 }
 0x40d   : > { %1706 = vst [vmem:[%s4809_s30 + $0x10] sm:$0xff] %v1674_v26  ;;  %v1675_v31 = vmax.f32 %v1463_v25, %v1465_v27  ;;  %2155 = vst [vmem:[%s4809_s30 + $0x110] sm:$0xff] %v2123_v28  ;;  %v2124_v33 = vmax.f32 %v1912_v16, %v1914_v29  ;;  %v4101_v25 = vld [vmem:[%s5279_s7 + $0x1f0] sm:$0xff]  }
 0x40e   : > { %2466 = vmatmul.mubr.bf16.gmra.mrb[128].mxu1 %v4090_v22  ;;  %2915 = vmatmul.mubr.bf16.gmra.mrb[160].mxu0 %v4102_v24 }
 0x40f   : > { %2475 = vmatprep.mubr.bf16.mxu1 %v4160_v0  ;;  %1707 = vst [vmem:[%s4809_s30 + $0x18] sm:$0xff] %v1675_v31  ;;  %2156 = vst [vmem:[%s4809_s30 + $0x118] sm:$0xff] %v2124_v33 }
 0x411   : > { %v1469_v34 = vpop.f32.mrb[24].mxu1  ;;  %v1918_v36 = vpop.f32.mrb[56].mxu0 }
 0x412   : > { %v1471_v38 = vpop.f32.mrb[25].mxu1  ;;  %v1920_v40 = vpop.f32.mrb[57].mxu0 }
 0x413   : > { %v1473_v41 = vpop.f32.mrb[26].mxu1  ;;  %v1922_v42 = vpop.f32.mrb[58].mxu0  ;;  %v1676_v43 = vmax.f32 %v1469_v34, %v1471_v38  ;;  %v2125_v45 = vmax.f32 %v1918_v36, %v1920_v40 }
 0x414   : > { %v1475_v44 = vpop.f32.mrb[27].mxu1  ;;  %v1924_v47 = vpop.f32.mrb[59].mxu0 }
 0x415   : > { %1708 = vst [vmem:[%s4809_s30 + $0x20] sm:$0xff] %v1676_v43  ;;  %v1677_v49 = vmax.f32 %v1473_v41, %v1475_v44  ;;  %2157 = vst [vmem:[%s4809_s30 + $0x120] sm:$0xff] %v2125_v45  ;;  %v2126_v50 = vmax.f32 %v1922_v42, %v1924_v47  ;;  %v4103_v41 = vld [vmem:[%s5279_s7 + $0x1f8] sm:$0xff]  }
 0x416   : > { %2476 = vmatmul.mubr.bf16.gmra.mrb[132].mxu1 %v4092_v39 }
 0x417   : > { %2485 = vmatprep.mubr.bf16.mxu1 %v4160_v0  ;;  %1709 = vst [vmem:[%s4809_s30 + $0x28] sm:$0xff] %v1677_v49  ;;  %2158 = vst [vmem:[%s4809_s30 + $0x128] sm:$0xff] %v2126_v50 }
 0x419   : > { %v1479_v51 = vpop.f32.mrb[28].mxu1  ;;  %v1928_v52 = vpop.f32.mrb[60].mxu0 }
 0x41a   : > { %v1481_v54 = vpop.f32.mrb[29].mxu1  ;;  %v1930_v14 = vpop.f32.mrb[61].mxu0 }
 0x41b   : > { %v1483_v30 = vpop.f32.mrb[30].mxu1  ;;  %v1932_v32 = vpop.f32.mrb[62].mxu0  ;;  %v1678_v46 = vmax.f32 %v1479_v51, %v1481_v54  ;;  %v2127_v62 = vmax.f32 %v1928_v52, %v1930_v14 }
 0x41c   : > { %v1485_v48 = vpop.f32.mrb[31].mxu1  ;;  %v1934_v1 = vpop.f32.mrb[63].mxu0 }
 0x41d   : > { %1710 = vst [vmem:[%s4809_s30 + $0x30] sm:$0xff] %v1678_v46  ;;  %v1679_v17 = vmax.f32 %v1483_v30, %v1485_v48  ;;  %2159 = vst [vmem:[%s4809_s30 + $0x130] sm:$0xff] %v2127_v62  ;;  %v2128_v19 = vmax.f32 %v1932_v32, %v1934_v1 }
 0x41e   : > { %2486 = vmatmul.mubr.bf16.gmra.mrb[136].mxu1 %v4094_v56 }
 0x41f   : > { %2495 = vmatprep.mubr.bf16.mxu1 %v4160_v0  ;;  %1711 = vst [vmem:[%s4809_s30 + $0x38] sm:$0xff] %v1679_v17  ;;  %2160 = vst [vmem:[%s4809_s30 + $0x138] sm:$0xff] %v2128_v19 }
 0x421   : > { %v1489_v35 = vpop.f32.mrb[32].mxu1  ;;  %v1938_v37 = vpop.f32.mrb[64].mxu0 }
 0x422   : > { %v1491_v53 = vpop.f32.mrb[33].mxu1  ;;  %v1940_v57 = vpop.f32.mrb[65].mxu0 }
 0x423   : > { %v1493_v58 = vpop.f32.mrb[34].mxu1  ;;  %v1942_v59 = vpop.f32.mrb[66].mxu0  ;;  %v1680_v60 = vmax.f32 %v1489_v35, %v1491_v53  ;;  %v2129_v63 = vmax.f32 %v1938_v37, %v1940_v57 }
 0x424   : > { %v1495_v61 = vpop.f32.mrb[35].mxu1  ;;  %v1944_v2 = vpop.f32.mrb[67].mxu0 }
 0x425   : > { %1712 = vst [vmem:[%s4809_s30 + $0x40] sm:$0xff] %v1680_v60  ;;  %v1681_v3 = vmax.f32 %v1493_v58, %v1495_v61  ;;  %2161 = vst [vmem:[%s4809_s30 + $0x140] sm:$0xff] %v2129_v63  ;;  %v2130_v4 = vmax.f32 %v1942_v59, %v1944_v2 }
 0x426   : > { %2496 = vmatmul.mubr.bf16.gmra.mrb[140].mxu1 %v4096_v55 }
 0x427   : > { %2924 = vmatprep.mubr.bf16.mxu1 %v4160_v0  ;;  %1713 = vst [vmem:[%s4809_s30 + $0x48] sm:$0xff] %v1681_v3  ;;  %2162 = vst [vmem:[%s4809_s30 + $0x148] sm:$0xff] %v2130_v4 }
 0x429   : > { %v1499_v5 = vpop.f32.mrb[36].mxu1  ;;  %v1948_v6 = vpop.f32.mrb[68].mxu0 }
 0x42a   : > { %v1501_v7 = vpop.f32.mrb[37].mxu1  ;;  %v1950_v9 = vpop.f32.mrb[69].mxu0 }
 0x42b   : > { %v1503_v10 = vpop.f32.mrb[38].mxu1  ;;  %v1952_v11 = vpop.f32.mrb[70].mxu0  ;;  %v1682_v12 = vmax.f32 %v1499_v5, %v1501_v7  ;;  %v2131_v15 = vmax.f32 %v1948_v6, %v1950_v9 }
 0x42c   : > { %v1505_v13 = vpop.f32.mrb[39].mxu1  ;;  %v1954_v18 = vpop.f32.mrb[71].mxu0 }
 0x42d   : > { %1714 = vst [vmem:[%s4809_s30 + $0x50] sm:$0xff] %v1682_v12  ;;  %v1683_v20 = vmax.f32 %v1503_v10, %v1505_v13  ;;  %2163 = vst [vmem:[%s4809_s30 + $0x150] sm:$0xff] %v2131_v15  ;;  %v2132_v21 = vmax.f32 %v1952_v11, %v1954_v18 }
 0x42e   : > { %2925 = vmatmul.mubr.bf16.vlgmr.msra.gmra.mrb[144].mxu1 %v4099_v8 }
 0x42f   : > { %2934 = vmatprep.mubr.bf16.mxu1 %v4160_v0  ;;  %1715 = vst [vmem:[%s4809_s30 + $0x58] sm:$0xff] %v1683_v20  ;;  %2164 = vst [vmem:[%s4809_s30 + $0x158] sm:$0xff] %v2132_v21 }
 0x431   : > { %v1509_v22 = vpop.f32.mrb[40].mxu1  ;;  %v1958_v23 = vpop.f32.mrb[72].mxu0 }
 0x432   : > { %v1511_v24 = vpop.f32.mrb[41].mxu1  ;;  %v1960_v16 = vpop.f32.mrb[73].mxu0 }
 0x433   : > { %v1513_v26 = vpop.f32.mrb[42].mxu1  ;;  %v1962_v27 = vpop.f32.mrb[74].mxu0  ;;  %v1684_v28 = vmax.f32 %v1509_v22, %v1511_v24  ;;  %v2133_v31 = vmax.f32 %v1958_v23, %v1960_v16 }
 0x434   : > { %v1515_v29 = vpop.f32.mrb[43].mxu1  ;;  %v1964_v33 = vpop.f32.mrb[75].mxu0 }
 0x435   : > { %1716 = vst [vmem:[%s4809_s30 + $0x60] sm:$0xff] %v1684_v28  ;;  %v1685_v34 = vmax.f32 %v1513_v26, %v1515_v29  ;;  %2165 = vst [vmem:[%s4809_s30 + $0x160] sm:$0xff] %v2133_v31  ;;  %v2134_v36 = vmax.f32 %v1962_v27, %v1964_v33 }
 0x436   : > { %2935 = vmatmul.mubr.bf16.gmra.mrb[148].mxu1 %v4101_v25 }
 0x437   : > { %2944 = vmatprep.mubr.bf16.mxu1 %v4160_v0  ;;  %1717 = vst [vmem:[%s4809_s30 + $0x68] sm:$0xff] %v1685_v34  ;;  %2166 = vst [vmem:[%s4809_s30 + $0x168] sm:$0xff] %v2134_v36 }
 0x439   : > { %v1519_v38 = vpop.f32.mrb[44].mxu1  ;;  %v1968_v39 = vpop.f32.mrb[76].mxu0 }
 0x43a   : > { %v1521_v40 = vpop.f32.mrb[45].mxu1  ;;  %v1970_v42 = vpop.f32.mrb[77].mxu0 }
 0x43b   : > { %v1523_v43 = vpop.f32.mrb[46].mxu1  ;;  %v1972_v44 = vpop.f32.mrb[78].mxu0  ;;  %v1686_v45 = vmax.f32 %v1519_v38, %v1521_v40  ;;  %v2135_v49 = vmax.f32 %v1968_v39, %v1970_v42 }
 0x43c   : > { %v1525_v47 = vpop.f32.mrb[47].mxu1  ;;  %v1974_v50 = vpop.f32.mrb[79].mxu0 }
 0x43d   : > { %1718 = vst [vmem:[%s4809_s30 + $0x70] sm:$0xff] %v1686_v45  ;;  %v1687_v0 = vmax.f32 %v1523_v43, %v1525_v47  ;;  %2167 = vst [vmem:[%s4809_s30 + $0x170] sm:$0xff] %v2135_v49  ;;  %v2136_v51 = vmax.f32 %v1972_v44, %v1974_v50 }
 0x43e   : > { %2945 = vmatmul.mubr.bf16.gmra.mrb[152].mxu1 %v4103_v41 }
 0x43f   : > { %1719 = vst [vmem:[%s4809_s30 + $0x78] sm:$0xff] %v1687_v0  ;;  %2168 = vst [vmem:[%s4809_s30 + $0x178] sm:$0xff] %v2136_v51 }
 0x441   : > { %v1529_v52 = vpop.f32.mrb[48].mxu1  ;;  %v1978_v54 = vpop.f32.mrb[80].mxu0 }
 0x442   : > { %v1531_v56 = vpop.f32.mrb[49].mxu1  ;;  %v1980_v14 = vpop.f32.mrb[81].mxu0 }
 0x443   : > { %v1533_v30 = vpop.f32.mrb[50].mxu1  ;;  %v1982_v32 = vpop.f32.mrb[82].mxu0  ;;  %v1688_v46 = vmax.f32 %v1529_v52, %v1531_v56  ;;  %v2137_v62 = vmax.f32 %v1978_v54, %v1980_v14 }
 0x444   : > { %v1535_v48 = vpop.f32.mrb[51].mxu1  ;;  %v1984_v1 = vpop.f32.mrb[83].mxu0 }
 0x445   : > { %1720 = vst [vmem:[%s4809_s30 + $0x80] sm:$0xff] %v1688_v46  ;;  %v1689_v17 = vmax.f32 %v1533_v30, %v1535_v48  ;;  %2169 = vst [vmem:[%s4809_s30 + $0x180] sm:$0xff] %v2137_v62  ;;  %v2138_v19 = vmax.f32 %v1982_v32, %v1984_v1 }
 0x447   : > { %1721 = vst [vmem:[%s4809_s30 + $0x88] sm:$0xff] %v1689_v17  ;;  %2170 = vst [vmem:[%s4809_s30 + $0x188] sm:$0xff] %v2138_v19 }
 0x449   : > { %v1539_v35 = vpop.f32.mrb[52].mxu1  ;;  %v1988_v37 = vpop.f32.mrb[84].mxu0 }
 0x44a   : > { %v1541_v53 = vpop.f32.mrb[53].mxu1  ;;  %v1990_v55 = vpop.f32.mrb[85].mxu0 }
 0x44b   : > { %v1543_v57 = vpop.f32.mrb[54].mxu1  ;;  %v1992_v58 = vpop.f32.mrb[86].mxu0  ;;  %v1690_v59 = vmax.f32 %v1539_v35, %v1541_v53  ;;  %v2139_v61 = vmax.f32 %v1988_v37, %v1990_v55 }
 0x44c   : > { %v1545_v60 = vpop.f32.mrb[55].mxu1  ;;  %v1994_v63 = vpop.f32.mrb[87].mxu0 }
 0x44d   : > { %1722 = vst [vmem:[%s4809_s30 + $0x90] sm:$0xff] %v1690_v59  ;;  %v1691_v2 = vmax.f32 %v1543_v57, %v1545_v60  ;;  %2171 = vst [vmem:[%s4809_s30 + $0x190] sm:$0xff] %v2139_v61  ;;  %v2140_v3 = vmax.f32 %v1992_v58, %v1994_v63 }
 0x44f   : > { %1723 = vst [vmem:[%s4809_s30 + $0x98] sm:$0xff] %v1691_v2  ;;  %2172 = vst [vmem:[%s4809_s30 + $0x198] sm:$0xff] %v2140_v3 }
 0x451   : > { %v1549_v4 = vpop.f32.mrb[56].mxu1  ;;  %v1998_v5 = vpop.f32.mrb[88].mxu0 }
 0x452   : > { %v1551_v6 = vpop.f32.mrb[57].mxu1  ;;  %v2000_v7 = vpop.f32.mrb[89].mxu0 }
 0x453   : > { %v1553_v8 = vpop.f32.mrb[58].mxu1  ;;  %v2002_v9 = vpop.f32.mrb[90].mxu0  ;;  %v1692_v10 = vmax.f32 %v1549_v4, %v1551_v6  ;;  %v2141_v12 = vmax.f32 %v1998_v5, %v2000_v7 }
 0x454   : > { %v1555_v11 = vpop.f32.mrb[59].mxu1  ;;  %v2004_v13 = vpop.f32.mrb[91].mxu0 }
 0x455   : > { %1724 = vst [vmem:[%s4809_s30 + $0xa0] sm:$0xff] %v1692_v10  ;;  %v1693_v15 = vmax.f32 %v1553_v8, %v1555_v11  ;;  %2173 = vst [vmem:[%s4809_s30 + $0x1a0] sm:$0xff] %v2141_v12  ;;  %v2142_v18 = vmax.f32 %v2002_v9, %v2004_v13 }
 0x457   : > { %1725 = vst [vmem:[%s4809_s30 + $0xa8] sm:$0xff] %v1693_v15  ;;  %2174 = vst [vmem:[%s4809_s30 + $0x1a8] sm:$0xff] %v2142_v18 }
 0x459   : > { %v1559_v20 = vpop.f32.mrb[60].mxu1  ;;  %v2008_v21 = vpop.f32.mrb[92].mxu0 }
 0x45a   : > { %v1561_v22 = vpop.f32.mrb[61].mxu1  ;;  %v2010_v23 = vpop.f32.mrb[93].mxu0 }
 0x45b   : > { %v1563_v24 = vpop.f32.mrb[62].mxu1  ;;  %v2012_v25 = vpop.f32.mrb[94].mxu0  ;;  %v1694_v16 = vmax.f32 %v1559_v20, %v1561_v22  ;;  %v2143_v27 = vmax.f32 %v2008_v21, %v2010_v23 }
 0x45c   : > { %v1565_v26 = vpop.f32.mrb[63].mxu1  ;;  %v2014_v28 = vpop.f32.mrb[95].mxu0 }
 0x45d   : > { %1726 = vst [vmem:[%s4809_s30 + $0xb0] sm:$0xff] %v1694_v16  ;;  %v1695_v29 = vmax.f32 %v1563_v24, %v1565_v26  ;;  %2175 = vst [vmem:[%s4809_s30 + $0x1b0] sm:$0xff] %v2143_v27  ;;  %v2144_v31 = vmax.f32 %v2012_v25, %v2014_v28 }
 0x45f   : > { %1727 = vst [vmem:[%s4809_s30 + $0xb8] sm:$0xff] %v1695_v29  ;;  %2176 = vst [vmem:[%s4809_s30 + $0x1b8] sm:$0xff] %v2144_v31 }
 0x461   : > { %v1569_v33 = vpop.f32.mrb[64].mxu1  ;;  %v2018_v34 = vpop.f32.mrb[96].mxu0 }
 0x462   : > { %v1571_v36 = vpop.f32.mrb[65].mxu1  ;;  %v2020_v38 = vpop.f32.mrb[97].mxu0 }
 0x463   : > { %v1573_v39 = vpop.f32.mrb[66].mxu1  ;;  %v2022_v40 = vpop.f32.mrb[98].mxu0  ;;  %v1696_v41 = vmax.f32 %v1569_v33, %v1571_v36  ;;  %v2145_v43 = vmax.f32 %v2018_v34, %v2020_v38 }
 0x464   : > { %v1575_v42 = vpop.f32.mrb[67].mxu1  ;;  %v2024_v44 = vpop.f32.mrb[99].mxu0 }
 0x465   : > { %1728 = vst [vmem:[%s4809_s30 + $0xc0] sm:$0xff] %v1696_v41  ;;  %v1697_v45 = vmax.f32 %v1573_v39, %v1575_v42  ;;  %2177 = vst [vmem:[%s4809_s30 + $0x1c0] sm:$0xff] %v2145_v43  ;;  %v2146_v47 = vmax.f32 %v2022_v40, %v2024_v44 }
 0x467   : > { %1729 = vst [vmem:[%s4809_s30 + $0xc8] sm:$0xff] %v1697_v45  ;;  %2178 = vst [vmem:[%s4809_s30 + $0x1c8] sm:$0xff] %v2146_v47 }
 0x469   : > { %v1579_v49 = vpop.f32.mrb[68].mxu1  ;;  %v2028_v50 = vpop.f32.mrb[100].mxu0 }
 0x46a   : > { %v1581_v0 = vpop.f32.mrb[69].mxu1  ;;  %v2030_v51 = vpop.f32.mrb[101].mxu0 }
 0x46b   : > { %v1583_v52 = vpop.f32.mrb[70].mxu1  ;;  %v2032_v54 = vpop.f32.mrb[102].mxu0  ;;  %v1698_v56 = vmax.f32 %v1579_v49, %v1581_v0  ;;  %v2147_v30 = vmax.f32 %v2028_v50, %v2030_v51 }
 0x46c   : > { %v1585_v14 = vpop.f32.mrb[71].mxu1  ;;  %v2034_v32 = vpop.f32.mrb[103].mxu0 }
 0x46d   : > { %1730 = vst [vmem:[%s4809_s30 + $0xd0] sm:$0xff] %v1698_v56  ;;  %v1699_v46 = vmax.f32 %v1583_v52, %v1585_v14  ;;  %2179 = vst [vmem:[%s4809_s30 + $0x1d0] sm:$0xff] %v2147_v30  ;;  %v2148_v48 = vmax.f32 %v2032_v54, %v2034_v32 }
 0x46f   : > { %1731 = vst [vmem:[%s4809_s30 + $0xd8] sm:$0xff] %v1699_v46  ;;  %2180 = vst [vmem:[%s4809_s30 + $0x1d8] sm:$0xff] %v2148_v48 }
 0x471   : > { %v1589_v62 = vpop.f32.mrb[72].mxu1  ;;  %v2038_v1 = vpop.f32.mrb[104].mxu0 }
 0x472   : > { %v1591_v17 = vpop.f32.mrb[73].mxu1  ;;  %v2040_v19 = vpop.f32.mrb[105].mxu0 }
 0x473   : > { %v1593_v35 = vpop.f32.mrb[74].mxu1  ;;  %v2042_v37 = vpop.f32.mrb[106].mxu0  ;;  %v1700_v53 = vmax.f32 %v1589_v62, %v1591_v17  ;;  %v2149_v57 = vmax.f32 %v2038_v1, %v2040_v19 }
 0x474   : > { %v1595_v55 = vpop.f32.mrb[75].mxu1  ;;  %v2044_v58 = vpop.f32.mrb[107].mxu0 }
 0x475   : > { %1732 = vst [vmem:[%s4809_s30 + $0xe0] sm:$0xff] %v1700_v53  ;;  %v1701_v59 = vmax.f32 %v1593_v35, %v1595_v55  ;;  %2181 = vst [vmem:[%s4809_s30 + $0x1e0] sm:$0xff] %v2149_v57  ;;  %v2150_v60 = vmax.f32 %v2042_v37, %v2044_v58 }
 0x477   : > { %1733 = vst [vmem:[%s4809_s30 + $0xe8] sm:$0xff] %v1701_v59  ;;  %2182 = vst [vmem:[%s4809_s30 + $0x1e8] sm:$0xff] %v2150_v60 }
 0x479   : > { %v1599_v61 = vpop.f32.mrb[76].mxu1  ;;  %v2048_v63 = vpop.f32.mrb[108].mxu0 }
 0x47a   : > { %v1601_v2 = vpop.f32.mrb[77].mxu1  ;;  %v2050_v3 = vpop.f32.mrb[109].mxu0 }
 0x47b   : > { %v1603_v4 = vpop.f32.mrb[78].mxu1  ;;  %v2052_v5 = vpop.f32.mrb[110].mxu0  ;;  %v1702_v6 = vmax.f32 %v1599_v61, %v1601_v2  ;;  %v2151_v8 = vmax.f32 %v2048_v63, %v2050_v3 }
 0x47c   : > { %v1605_v7 = vpop.f32.mrb[79].mxu1  ;;  %v2054_v9 = vpop.f32.mrb[111].mxu0 }
 0x47d   : > { %1734 = vst [vmem:[%s4809_s30 + $0xf0] sm:$0xff] %v1702_v6  ;;  %v1703_v10 = vmax.f32 %v1603_v4, %v1605_v7  ;;  %2183 = vst [vmem:[%s4809_s30 + $0x1f0] sm:$0xff] %v2151_v8  ;;  %v2152_v11 = vmax.f32 %v2052_v5, %v2054_v9 }
 0x47f   : > { %1735 = vst [vmem:[%s4809_s30 + $0xf8] sm:$0xff] %v1703_v10  ;;  %2184 = vst [vmem:[%s4809_s30 + $0x1f8] sm:$0xff] %v2152_v11 }
 0x481   : > { %v2347_v12 = vpop.f32.mrb[80].mxu1  ;;  %v2796_v13 = vpop.f32.mrb[112].mxu0 }
 0x482   : > { %v2349_v15 = vpop.f32.mrb[81].mxu1  ;;  %v2798_v18 = vpop.f32.mrb[113].mxu0 }
 0x483   : > { %v2351_v20 = vpop.f32.mrb[82].mxu1  ;;  %v2800_v21 = vpop.f32.mrb[114].mxu0  ;;  %v2570_v22 = vmax.f32 %v2347_v12, %v2349_v15  ;;  %v3019_v24 = vmax.f32 %v2796_v13, %v2798_v18 }
 0x484   : > { %v2353_v23 = vpop.f32.mrb[83].mxu1  ;;  %v2802_v25 = vpop.f32.mrb[115].mxu0 }
 0x485   : > { %2602 = vst [vmem:[%s4809_s30 + $0x200] sm:$0xff] %v2570_v22  ;;  %v2571_v16 = vmax.f32 %v2351_v20, %v2353_v23  ;;  %3051 = vst [vmem:[%s4809_s30 + $0x300] sm:$0xff] %v3019_v24  ;;  %v3020_v26 = vmax.f32 %v2800_v21, %v2802_v25 }
 0x487   : > { %2603 = vst [vmem:[%s4809_s30 + $0x208] sm:$0xff] %v2571_v16  ;;  %3052 = vst [vmem:[%s4809_s30 + $0x308] sm:$0xff] %v3020_v26 }
 0x489   : > { %v2357_v27 = vpop.f32.mrb[84].mxu1  ;;  %v2806_v28 = vpop.f32.mrb[116].mxu0 }
 0x48a   : > { %v2359_v29 = vpop.f32.mrb[85].mxu1  ;;  %v2808_v31 = vpop.f32.mrb[117].mxu0 }
 0x48b   : > { %v2361_v33 = vpop.f32.mrb[86].mxu1  ;;  %v2810_v34 = vpop.f32.mrb[118].mxu0  ;;  %v2572_v36 = vmax.f32 %v2357_v27, %v2359_v29  ;;  %v3021_v39 = vmax.f32 %v2806_v28, %v2808_v31 }
 0x48c   : > { %v2363_v38 = vpop.f32.mrb[87].mxu1  ;;  %v2812_v40 = vpop.f32.mrb[119].mxu0 }
 0x48d   : > { %2604 = vst [vmem:[%s4809_s30 + $0x210] sm:$0xff] %v2572_v36  ;;  %v2573_v41 = vmax.f32 %v2361_v33, %v2363_v38  ;;  %3053 = vst [vmem:[%s4809_s30 + $0x310] sm:$0xff] %v3021_v39  ;;  %v3022_v42 = vmax.f32 %v2810_v34, %v2812_v40 }
 0x48f   : > { %2605 = vst [vmem:[%s4809_s30 + $0x218] sm:$0xff] %v2573_v41  ;;  %3054 = vst [vmem:[%s4809_s30 + $0x318] sm:$0xff] %v3022_v42 }
 0x491   : > { %v2367_v43 = vpop.f32.mrb[88].mxu1  ;;  %v2816_v44 = vpop.f32.mrb[120].mxu0 }
 0x492   : > { %v2369_v45 = vpop.f32.mrb[89].mxu1  ;;  %v2818_v47 = vpop.f32.mrb[121].mxu0 }
 0x493   : > { %v2371_v49 = vpop.f32.mrb[90].mxu1  ;;  %v2820_v50 = vpop.f32.mrb[122].mxu0  ;;  %v2574_v0 = vmax.f32 %v2367_v43, %v2369_v45  ;;  %v3023_v52 = vmax.f32 %v2816_v44, %v2818_v47 }
 0x494   : > { %v2373_v51 = vpop.f32.mrb[91].mxu1  ;;  %v2822_v54 = vpop.f32.mrb[123].mxu0 }
 0x495   : > { %2606 = vst [vmem:[%s4809_s30 + $0x220] sm:$0xff] %v2574_v0  ;;  %v2575_v56 = vmax.f32 %v2371_v49, %v2373_v51  ;;  %3055 = vst [vmem:[%s4809_s30 + $0x320] sm:$0xff] %v3023_v52  ;;  %v3024_v14 = vmax.f32 %v2820_v50, %v2822_v54 }
 0x497   : > { %2607 = vst [vmem:[%s4809_s30 + $0x228] sm:$0xff] %v2575_v56  ;;  %3056 = vst [vmem:[%s4809_s30 + $0x328] sm:$0xff] %v3024_v14 }
 0x499   : > { %v2377_v30 = vpop.f32.mrb[92].mxu1  ;;  %v2826_v32 = vpop.f32.mrb[124].mxu0 }
 0x49a   : > { %v2379_v46 = vpop.f32.mrb[93].mxu1  ;;  %v2828_v48 = vpop.f32.mrb[125].mxu0 }
 0x49b   : > { %v2381_v62 = vpop.f32.mrb[94].mxu1  ;;  %v2830_v1 = vpop.f32.mrb[126].mxu0  ;;  %v2576_v17 = vmax.f32 %v2377_v30, %v2379_v46  ;;  %v3025_v35 = vmax.f32 %v2826_v32, %v2828_v48 }
 0x49c   : > { %v2383_v19 = vpop.f32.mrb[95].mxu1  ;;  %v2832_v37 = vpop.f32.mrb[127].mxu0 }
 0x49d   : > { %2608 = vst [vmem:[%s4809_s30 + $0x230] sm:$0xff] %v2576_v17  ;;  %v2577_v53 = vmax.f32 %v2381_v62, %v2383_v19  ;;  %3057 = vst [vmem:[%s4809_s30 + $0x330] sm:$0xff] %v3025_v35  ;;  %v3026_v55 = vmax.f32 %v2830_v1, %v2832_v37 }
 0x49f   : > { %2609 = vst [vmem:[%s4809_s30 + $0x238] sm:$0xff] %v2577_v53  ;;  %3058 = vst [vmem:[%s4809_s30 + $0x338] sm:$0xff] %v3026_v55 }
 0x4a1   : > { %v2387_v57 = vpop.f32.mrb[96].mxu1  ;;  %v2836_v58 = vpop.f32.mrb[128].mxu0 }
 0x4a2   : > { %v2389_v59 = vpop.f32.mrb[97].mxu1  ;;  %v2838_v60 = vpop.f32.mrb[129].mxu0 }
 0x4a3   : > { %v2391_v61 = vpop.f32.mrb[98].mxu1  ;;  %v2840_v63 = vpop.f32.mrb[130].mxu0  ;;  %v2578_v2 = vmax.f32 %v2387_v57, %v2389_v59  ;;  %v3027_v4 = vmax.f32 %v2836_v58, %v2838_v60 }
 0x4a4   : > { %v2393_v3 = vpop.f32.mrb[99].mxu1  ;;  %v2842_v5 = vpop.f32.mrb[131].mxu0 }
 0x4a5   : > { %2610 = vst [vmem:[%s4809_s30 + $0x240] sm:$0xff] %v2578_v2  ;;  %v2579_v6 = vmax.f32 %v2391_v61, %v2393_v3  ;;  %3059 = vst [vmem:[%s4809_s30 + $0x340] sm:$0xff] %v3027_v4  ;;  %v3028_v7 = vmax.f32 %v2840_v63, %v2842_v5 }
 0x4a7   : > { %2611 = vst [vmem:[%s4809_s30 + $0x248] sm:$0xff] %v2579_v6  ;;  %3060 = vst [vmem:[%s4809_s30 + $0x348] sm:$0xff] %v3028_v7 }
 0x4a9   : > { %v2397_v8 = vpop.f32.mrb[100].mxu1  ;;  %v2846_v9 = vpop.f32.mrb[132].mxu0 }
 0x4aa   : > { %v2399_v10 = vpop.f32.mrb[101].mxu1  ;;  %v2848_v11 = vpop.f32.mrb[133].mxu0 }
 0x4ab   : > { %v2401_v12 = vpop.f32.mrb[102].mxu1  ;;  %v2850_v13 = vpop.f32.mrb[134].mxu0  ;;  %v2580_v15 = vmax.f32 %v2397_v8, %v2399_v10  ;;  %v3029_v20 = vmax.f32 %v2846_v9, %v2848_v11 }
 0x4ac   : > { %v2403_v18 = vpop.f32.mrb[103].mxu1  ;;  %v2852_v21 = vpop.f32.mrb[135].mxu0 }
 0x4ad   : > { %2612 = vst [vmem:[%s4809_s30 + $0x250] sm:$0xff] %v2580_v15  ;;  %v2581_v22 = vmax.f32 %v2401_v12, %v2403_v18  ;;  %3061 = vst [vmem:[%s4809_s30 + $0x350] sm:$0xff] %v3029_v20  ;;  %v3030_v23 = vmax.f32 %v2850_v13, %v2852_v21 }
 0x4af   : > { %2613 = vst [vmem:[%s4809_s30 + $0x258] sm:$0xff] %v2581_v22  ;;  %3062 = vst [vmem:[%s4809_s30 + $0x358] sm:$0xff] %v3030_v23 }
 0x4b1   : > { %v2407_v24 = vpop.f32.mrb[104].mxu1  ;;  %v2856_v25 = vpop.f32.mrb[136].mxu0 }
 0x4b2   : > { %v2409_v16 = vpop.f32.mrb[105].mxu1  ;;  %v2858_v26 = vpop.f32.mrb[137].mxu0 }
 0x4b3   : > { %v2411_v27 = vpop.f32.mrb[106].mxu1  ;;  %v2860_v28 = vpop.f32.mrb[138].mxu0  ;;  %v2582_v29 = vmax.f32 %v2407_v24, %v2409_v16  ;;  %v3031_v33 = vmax.f32 %v2856_v25, %v2858_v26 }
 0x4b4   : > { %v2413_v31 = vpop.f32.mrb[107].mxu1  ;;  %v2862_v34 = vpop.f32.mrb[139].mxu0 }
 0x4b5   : > { %2614 = vst [vmem:[%s4809_s30 + $0x260] sm:$0xff] %v2582_v29  ;;  %v2583_v36 = vmax.f32 %v2411_v27, %v2413_v31  ;;  %3063 = vst [vmem:[%s4809_s30 + $0x360] sm:$0xff] %v3031_v33  ;;  %v3032_v38 = vmax.f32 %v2860_v28, %v2862_v34 }
 0x4b7   : > { %2615 = vst [vmem:[%s4809_s30 + $0x268] sm:$0xff] %v2583_v36  ;;  %3064 = vst [vmem:[%s4809_s30 + $0x368] sm:$0xff] %v3032_v38 }
 0x4b9   : > { %v2417_v39 = vpop.f32.mrb[108].mxu1  ;;  %v2866_v40 = vpop.f32.mrb[140].mxu0 }
 0x4ba   : > { %v2419_v41 = vpop.f32.mrb[109].mxu1  ;;  %v2868_v42 = vpop.f32.mrb[141].mxu0 }
 0x4bb   : > { %v2421_v43 = vpop.f32.mrb[110].mxu1  ;;  %v2870_v44 = vpop.f32.mrb[142].mxu0  ;;  %v2584_v45 = vmax.f32 %v2417_v39, %v2419_v41  ;;  %v3033_v49 = vmax.f32 %v2866_v40, %v2868_v42 }
 0x4bc   : > { %v2423_v47 = vpop.f32.mrb[111].mxu1  ;;  %v2872_v50 = vpop.f32.mrb[143].mxu0 }
 0x4bd   : > { %2616 = vst [vmem:[%s4809_s30 + $0x270] sm:$0xff] %v2584_v45  ;;  %v2585_v0 = vmax.f32 %v2421_v43, %v2423_v47  ;;  %3065 = vst [vmem:[%s4809_s30 + $0x370] sm:$0xff] %v3033_v49  ;;  %v3034_v51 = vmax.f32 %v2870_v44, %v2872_v50 }
 0x4bf   : > { %2617 = vst [vmem:[%s4809_s30 + $0x278] sm:$0xff] %v2585_v0  ;;  %3066 = vst [vmem:[%s4809_s30 + $0x378] sm:$0xff] %v3034_v51 }
 0x4c1   : > { %v2427_v52 = vpop.f32.mrb[112].mxu1  ;;  %v2876_v54 = vpop.f32.mrb[144].mxu0 }
 0x4c2   : > { %v2429_v56 = vpop.f32.mrb[113].mxu1  ;;  %v2878_v14 = vpop.f32.mrb[145].mxu0 }
 0x4c3   : > { %v2431_v30 = vpop.f32.mrb[114].mxu1  ;;  %v2880_v32 = vpop.f32.mrb[146].mxu0  ;;  %v2586_v46 = vmax.f32 %v2427_v52, %v2429_v56  ;;  %v3035_v62 = vmax.f32 %v2876_v54, %v2878_v14 }
 0x4c4   : > { %v2433_v48 = vpop.f32.mrb[115].mxu1  ;;  %v2882_v1 = vpop.f32.mrb[147].mxu0 }
 0x4c5   : > { %2618 = vst [vmem:[%s4809_s30 + $0x280] sm:$0xff] %v2586_v46  ;;  %v2587_v17 = vmax.f32 %v2431_v30, %v2433_v48  ;;  %3067 = vst [vmem:[%s4809_s30 + $0x380] sm:$0xff] %v3035_v62  ;;  %v3036_v19 = vmax.f32 %v2880_v32, %v2882_v1 }
 0x4c7   : > { %2619 = vst [vmem:[%s4809_s30 + $0x288] sm:$0xff] %v2587_v17  ;;  %3068 = vst [vmem:[%s4809_s30 + $0x388] sm:$0xff] %v3036_v19 }
 0x4c9   : > { %v2437_v35 = vpop.f32.mrb[116].mxu1  ;;  %v2886_v37 = vpop.f32.mrb[148].mxu0 }
 0x4ca   : > { %v2439_v53 = vpop.f32.mrb[117].mxu1  ;;  %v2888_v55 = vpop.f32.mrb[149].mxu0 }
 0x4cb   : > { %v2441_v57 = vpop.f32.mrb[118].mxu1  ;;  %v2890_v58 = vpop.f32.mrb[150].mxu0  ;;  %v2588_v59 = vmax.f32 %v2437_v35, %v2439_v53  ;;  %v3037_v61 = vmax.f32 %v2886_v37, %v2888_v55 }
 0x4cc   : > { %v2443_v60 = vpop.f32.mrb[119].mxu1  ;;  %v2892_v63 = vpop.f32.mrb[151].mxu0 }
 0x4cd   : > { %2620 = vst [vmem:[%s4809_s30 + $0x290] sm:$0xff] %v2588_v59  ;;  %v2589_v2 = vmax.f32 %v2441_v57, %v2443_v60  ;;  %3069 = vst [vmem:[%s4809_s30 + $0x390] sm:$0xff] %v3037_v61  ;;  %v3038_v3 = vmax.f32 %v2890_v58, %v2892_v63 }
 0x4cf   : > { %2621 = vst [vmem:[%s4809_s30 + $0x298] sm:$0xff] %v2589_v2  ;;  %3070 = vst [vmem:[%s4809_s30 + $0x398] sm:$0xff] %v3038_v3 }
 0x4d1   : > { %v2447_v4 = vpop.f32.mrb[120].mxu1  ;;  %v2896_v5 = vpop.f32.mrb[152].mxu0 }
 0x4d2   : > { %v2449_v6 = vpop.f32.mrb[121].mxu1  ;;  %v2898_v7 = vpop.f32.mrb[153].mxu0 }
 0x4d3   : > { %v2451_v8 = vpop.f32.mrb[122].mxu1  ;;  %v2900_v9 = vpop.f32.mrb[154].mxu0  ;;  %v2590_v10 = vmax.f32 %v2447_v4, %v2449_v6  ;;  %v3039_v12 = vmax.f32 %v2896_v5, %v2898_v7 }
 0x4d4   : > { %v2453_v11 = vpop.f32.mrb[123].mxu1  ;;  %v2902_v13 = vpop.f32.mrb[155].mxu0 }
 0x4d5   : > { %2622 = vst [vmem:[%s4809_s30 + $0x2a0] sm:$0xff] %v2590_v10  ;;  %v2591_v15 = vmax.f32 %v2451_v8, %v2453_v11  ;;  %3071 = vst [vmem:[%s4809_s30 + $0x3a0] sm:$0xff] %v3039_v12  ;;  %v3040_v18 = vmax.f32 %v2900_v9, %v2902_v13  ;;  %v3141_v12 = vld [vmem:[%s4423_s26] sm:$0xff] (%p4257_p5)  ;;  %v3143_v13 = vld [vmem:[%s4423_s26 + $0x8] sm:$0xff] (%p4257_p5) }
 0x4d6   : > { %3142 = vst [vmem:[%s3099_s14] sm:$0xff] (%p4257_p5), %v3141_v12  ;;  %3144 = vst [vmem:[%s3099_s14 + $0x10] sm:$0xff] (%p4257_p5), %v3143_v13 }
 0x4d7   : > { %2623 = vst [vmem:[%s4809_s30 + $0x2a8] sm:$0xff] %v2591_v15  ;;  %3072 = vst [vmem:[%s4809_s30 + $0x3a8] sm:$0xff] %v3040_v18  ;;  %v3145_v15 = vld [vmem:[%s4423_s26 + $0x10] sm:$0xff] (%p4257_p5)  ;;  %v3147_v18 = vld [vmem:[%s4423_s26 + $0x18] sm:$0xff] (%p4257_p5) }
 0x4d8   : > { %3146 = vst [vmem:[%s3099_s14 + $0x20] sm:$0xff] (%p4257_p5), %v3145_v15  ;;  %3148 = vst [vmem:[%s3099_s14 + $0x30] sm:$0xff] (%p4257_p5), %v3147_v18 }
 0x4d9   : > { %v2457_v20 = vpop.f32.mrb[124].mxu1  ;;  %v2906_v21 = vpop.f32.mrb[156].mxu0 }
 0x4da   : > { %v2459_v22 = vpop.f32.mrb[125].mxu1  ;;  %v2908_v23 = vpop.f32.mrb[157].mxu0 }
 0x4db   : > { %v2461_v24 = vpop.f32.mrb[126].mxu1  ;;  %v2910_v25 = vpop.f32.mrb[158].mxu0  ;;  %v2592_v16 = vmax.f32 %v2457_v20, %v2459_v22  ;;  %v3041_v27 = vmax.f32 %v2906_v21, %v2908_v23  ;;  %v3149_v20 = vld [vmem:[%s4423_s26 + $0x20] sm:$0xff] (%p4257_p5)  ;;  %v3151_v21 = vld [vmem:[%s4423_s26 + $0x28] sm:$0xff] (%p4257_p5)  ;;  %v3153_v22 = vld [vmem:[%s4423_s26 + $0x30] sm:$0xff] (%p4257_p5) }
 0x4dc   : > { %v2463_v26 = vpop.f32.mrb[127].mxu1  ;;  %v2912_v28 = vpop.f32.mrb[159].mxu0  ;;  %v3155_v23 = vld [vmem:[%s4423_s26 + $0x38] sm:$0xff] (%p4257_p5)  ;;  %3150 = vst [vmem:[%s3099_s14 + $0x40] sm:$0xff] (%p4257_p5), %v3149_v20  ;;  %3152 = vst [vmem:[%s3099_s14 + $0x50] sm:$0xff] (%p4257_p5), %v3151_v21 }
 0x4dd   : > { %2624 = vst [vmem:[%s4809_s30 + $0x2b0] sm:$0xff] %v2592_v16  ;;  %v2593_v29 = vmax.f32 %v2461_v24, %v2463_v26  ;;  %3073 = vst [vmem:[%s4809_s30 + $0x3b0] sm:$0xff] %v3041_v27  ;;  %v3042_v31 = vmax.f32 %v2910_v25, %v2912_v28 }
 0x4de   : > { %3154 = vst [vmem:[%s3099_s14 + $0x60] sm:$0xff] (%p4257_p5), %v3153_v22  ;;  %3156 = vst [vmem:[%s3099_s14 + $0x70] sm:$0xff] (%p4257_p5), %v3155_v23 }
 0x4df   : > { %2625 = vst [vmem:[%s4809_s30 + $0x2b8] sm:$0xff] %v2593_v29  ;;  %3074 = vst [vmem:[%s4809_s30 + $0x3b8] sm:$0xff] %v3042_v31 }
 0x4e1   : > { %v2467_v33 = vpop.f32.mrb[128].mxu1  ;;  %v2916_v34 = vpop.f32.mrb[160].mxu0 }
 0x4e2   : > { %v2469_v36 = vpop.f32.mrb[129].mxu1  ;;  %v2918_v38 = vpop.f32.mrb[161].mxu0 }
 0x4e3   : > { %v2471_v39 = vpop.f32.mrb[130].mxu1  ;;  %v2920_v40 = vpop.f32.mrb[162].mxu0  ;;  %v2594_v41 = vmax.f32 %v2467_v33, %v2469_v36  ;;  %v3043_v43 = vmax.f32 %v2916_v34, %v2918_v38 }
 0x4e4   : > { %v2473_v42 = vpop.f32.mrb[131].mxu1  ;;  %v2922_v44 = vpop.f32.mrb[163].mxu0 }
 0x4e5   : > { %2626 = vst [vmem:[%s4809_s30 + $0x2c0] sm:$0xff] %v2594_v41  ;;  %v2595_v45 = vmax.f32 %v2471_v39, %v2473_v42  ;;  %3075 = vst [vmem:[%s4809_s30 + $0x3c0] sm:$0xff] %v3043_v43  ;;  %v3044_v47 = vmax.f32 %v2920_v40, %v2922_v44 }
 0x4e7   : > { %2627 = vst [vmem:[%s4809_s30 + $0x2c8] sm:$0xff] %v2595_v45  ;;  %3076 = vst [vmem:[%s4809_s30 + $0x3c8] sm:$0xff] %v3044_v47 }
 0x4e9   : > { %v2477_v49 = vpop.f32.mrb[132].mxu1 }
 0x4ea   : > { %v2479_v50 = vpop.f32.mrb[133].mxu1 }
 0x4eb   : > { %v2481_v0 = vpop.f32.mrb[134].mxu1  ;;  %v2596_v51 = vmax.f32 %v2477_v49, %v2479_v50 }
 0x4ec   : > { %v2483_v52 = vpop.f32.mrb[135].mxu1 }
 0x4ed   : > { %2628 = vst [vmem:[%s4809_s30 + $0x2d0] sm:$0xff] %v2596_v51  ;;  %v2597_v54 = vmax.f32 %v2481_v0, %v2483_v52 }
 0x4ef   : > { %2629 = vst [vmem:[%s4809_s30 + $0x2d8] sm:$0xff] %v2597_v54 }
 0x4f1   : > { %v2487_v56 = vpop.f32.mrb[136].mxu1 }
 0x4f2   : > { %v2489_v14 = vpop.f32.mrb[137].mxu1 }
 0x4f3   : > { %v2491_v30 = vpop.f32.mrb[138].mxu1  ;;  %v2598_v32 = vmax.f32 %v2487_v56, %v2489_v14 }
 0x4f4   : > { %v2493_v46 = vpop.f32.mrb[139].mxu1 }
 0x4f5   : > { %2630 = vst [vmem:[%s4809_s30 + $0x2e0] sm:$0xff] %v2598_v32  ;;  %v2599_v48 = vmax.f32 %v2491_v30, %v2493_v46 }
 0x4f7   : > { %2631 = vst [vmem:[%s4809_s30 + $0x2e8] sm:$0xff] %v2599_v48 }
 0x4f9   : > { %v2497_v62 = vpop.f32.mrb[140].mxu1 }
 0x4fa   : > { %v2499_v1 = vpop.f32.mrb[141].mxu1 }
 0x4fb   : > { %v2501_v17 = vpop.f32.mrb[142].mxu1  ;;  %v2600_v19 = vmax.f32 %v2497_v62, %v2499_v1 }
 0x4fc   : > { %v2503_v35 = vpop.f32.mrb[143].mxu1 }
 0x4fd   : > { %2632 = vst [vmem:[%s4809_s30 + $0x2f0] sm:$0xff] %v2600_v19  ;;  %v2601_v37 = vmax.f32 %v2501_v17, %v2503_v35 }
 0x4ff   : > { %2633 = vst [vmem:[%s4809_s30 + $0x2f8] sm:$0xff] %v2601_v37 }
 0x501   : > { %v2926_v53 = vpop.f32.mrb[144].mxu1 }
 0x502   : > { %v2928_v55 = vpop.f32.mrb[145].mxu1 }
 0x503   : > { %v2930_v57 = vpop.f32.mrb[146].mxu1  ;;  %v3045_v58 = vmax.f32 %v2926_v53, %v2928_v55 }
 0x504   : > { %v2932_v59 = vpop.f32.mrb[147].mxu1 }
 0x505   : > { %3077 = vst [vmem:[%s4809_s30 + $0x3d0] sm:$0xff] %v3045_v58  ;;  %v3046_v60 = vmax.f32 %v2930_v57, %v2932_v59 }
 0x507   : > { %3078 = vst [vmem:[%s4809_s30 + $0x3d8] sm:$0xff] %v3046_v60 }
 0x509   : > { %v2936_v61 = vpop.f32.mrb[148].mxu1 }
 0x50a   : > { %v2938_v63 = vpop.f32.mrb[149].mxu1 }
 0x50b   : > { %v2940_v2 = vpop.f32.mrb[150].mxu1  ;;  %v3047_v3 = vmax.f32 %v2936_v61, %v2938_v63 }
 0x50c   : > { %v2942_v4 = vpop.f32.mrb[151].mxu1 }
 0x50d   : > { %3079 = vst [vmem:[%s4809_s30 + $0x3e0] sm:$0xff] %v3047_v3  ;;  %v3048_v5 = vmax.f32 %v2940_v2, %v2942_v4 }
 0x50f   : > { %3080 = vst [vmem:[%s4809_s30 + $0x3e8] sm:$0xff] %v3048_v5 }
 0x511   : > { %v2946_v6 = vpop.f32.mrb[152].mxu1  ;;  %3093 = sbr.rel (!%p4257_p5) target bundleno = 1304 (0x518), region = 60 }
 0x512   : > { %v2948_v7 = vpop.f32.mrb[153].mxu1 }
 0x513   : > { %v2950_v8 = vpop.f32.mrb[154].mxu1  ;;  %v3049_v9 = vmax.f32 %v2946_v6, %v2948_v7 }
 0x514   : > { %v2952_v10 = vpop.f32.mrb[155].mxu1 }
 0x515   : > { %3081 = vst [vmem:[%s4809_s30 + $0x3f0] sm:$0xff] %v3049_v9  ;;  %v3050_v11 = vmax.f32 %v2950_v8, %v2952_v10 }
 0x517   : > { %3082 = vst [vmem:[%s4809_s30 + $0x3f8] sm:$0xff] %v3050_v11 }
 0x518 PF: > { %3162 = sbr.rel (!%p4257_p5) target bundleno = 1372 (0x55c), region = 98  ;;  %s3934_s25 = sshll.u32 (%p4257_p5), %s4142_s11, 8  ;;  %v3448_v24 = vld [vmem:[%s4809_s30] sm:$0xff] (%p4257_p5)  ;;  %v3450_v25 = vld [vmem:[%s4809_s30 + $0x8] sm:$0xff] (%p4257_p5)  ;;  %v3452_v16 = vld [vmem:[%s4809_s30 + $0x10] sm:$0xff] (%p4257_p5) }
 0x519   : > { %s3164_s20 = sadd.s32 (%p4257_p5), %s4146_s12, %s3934_s25  ;;  %v3454_v26 = vld [vmem:[%s4809_s30 + $0x18] sm:$0xff] (%p4257_p5)  ;;  %v3456_v27 = vld [vmem:[%s4809_s30 + $0x20] sm:$0xff] (%p4257_p5)  ;;  %v3458_v28 = vld [vmem:[%s4809_s30 + $0x28] sm:$0xff] (%p4257_p5) }
 0x51a   : > { %s3935_s26 = sshll.u32 (%p4257_p5), %s3164_s20, 3  ;;  %v3460_v29 = vld [vmem:[%s4809_s30 + $0x30] sm:$0xff] (%p4257_p5)  ;;  %v3462_v31 = vld [vmem:[%s4809_s30 + $0x38] sm:$0xff] (%p4257_p5)  ;;  %v3464_v33 = vld [vmem:[%s4809_s30 + $0x40] sm:$0xff] (%p4257_p5) }
 0x51b   : > { %s5002_s29 = scalar_lea.vmem (%p4257_p5), %s5281_s9, %s3935_s26  ;;  %v3466_v34 = vld [vmem:[%s4809_s30 + $0x48] sm:$0xff] (%p4257_p5)  ;;  %v3468_v36 = vld [vmem:[%s4809_s30 + $0x50] sm:$0xff] (%p4257_p5)  ;;  %v3470_v38 = vld [vmem:[%s4809_s30 + $0x58] sm:$0xff] (%p4257_p5) }
 0x51c   : > { %3449 = vst [vmem:[%s5002_s29] sm:$0xff] (%p4257_p5), %v3448_v24  ;;  %3451 = vst [vmem:[%s5002_s29 + $0x10] sm:$0xff] (%p4257_p5), %v3450_v25  ;;  %v3472_v39 = vld [vmem:[%s4809_s30 + $0x60] sm:$0xff] (%p4257_p5)  ;;  %v3474_v40 = vld [vmem:[%s4809_s30 + $0x68] sm:$0xff] (%p4257_p5) }
 0x51d   : > { %3453 = vst [vmem:[%s5002_s29 + $0x20] sm:$0xff] (%p4257_p5), %v3452_v16  ;;  %3455 = vst [vmem:[%s5002_s29 + $0x30] sm:$0xff] (%p4257_p5), %v3454_v26  ;;  %v3476_v41 = vld [vmem:[%s4809_s30 + $0x70] sm:$0xff] (%p4257_p5)  ;;  %v3478_v42 = vld [vmem:[%s4809_s30 + $0x78] sm:$0xff] (%p4257_p5) }
 0x51e   : > { %3457 = vst [vmem:[%s5002_s29 + $0x40] sm:$0xff] (%p4257_p5), %v3456_v27  ;;  %3459 = vst [vmem:[%s5002_s29 + $0x50] sm:$0xff] (%p4257_p5), %v3458_v28  ;;  %v3480_v43 = vld [vmem:[%s4809_s30 + $0x80] sm:$0xff] (%p4257_p5)  ;;  %v3482_v44 = vld [vmem:[%s4809_s30 + $0x88] sm:$0xff] (%p4257_p5) }
 0x51f   : > { %3461 = vst [vmem:[%s5002_s29 + $0x60] sm:$0xff] %v3460_v29  ;;  %3463 = vst [vmem:[%s5002_s29 + $0x70] sm:$0xff] %v3462_v31  ;;  %v3484_v45 = vld [vmem:[%s4809_s30 + $0x90] sm:$0xff]  ;;  %v3486_v47 = vld [vmem:[%s4809_s30 + $0x98] sm:$0xff] }
 0x520   : > { %3465 = vst [vmem:[%s5002_s29 + $0x80] sm:$0xff] %v3464_v33  ;;  %3467 = vst [vmem:[%s5002_s29 + $0x90] sm:$0xff] %v3466_v34  ;;  %v3488_v49 = vld [vmem:[%s4809_s30 + $0xa0] sm:$0xff]  ;;  %v3490_v50 = vld [vmem:[%s4809_s30 + $0xa8] sm:$0xff] }
 0x521   : > { %3469 = vst [vmem:[%s5002_s29 + $0xa0] sm:$0xff] %v3468_v36  ;;  %3471 = vst [vmem:[%s5002_s29 + $0xb0] sm:$0xff] %v3470_v38  ;;  %v3492_v0 = vld [vmem:[%s4809_s30 + $0xb0] sm:$0xff]  ;;  %v3494_v51 = vld [vmem:[%s4809_s30 + $0xb8] sm:$0xff] }
 0x522   : > { %3473 = vst [vmem:[%s5002_s29 + $0xc0] sm:$0xff] %v3472_v39  ;;  %3475 = vst [vmem:[%s5002_s29 + $0xd0] sm:$0xff] %v3474_v40  ;;  %v3496_v52 = vld [vmem:[%s4809_s30 + $0xc0] sm:$0xff]  ;;  %v3498_v54 = vld [vmem:[%s4809_s30 + $0xc8] sm:$0xff] }
 0x523   : > { %3477 = vst [vmem:[%s5002_s29 + $0xe0] sm:$0xff] %v3476_v41  ;;  %3479 = vst [vmem:[%s5002_s29 + $0xf0] sm:$0xff] %v3478_v42  ;;  %v3500_v56 = vld [vmem:[%s4809_s30 + $0xd0] sm:$0xff]  ;;  %v3502_v14 = vld [vmem:[%s4809_s30 + $0xd8] sm:$0xff] }
 0x524   : > { %3481 = vst [vmem:[%s5002_s29 + $0x100] sm:$0xff] %v3480_v43  ;;  %3483 = vst [vmem:[%s5002_s29 + $0x110] sm:$0xff] %v3482_v44  ;;  %v3504_v30 = vld [vmem:[%s4809_s30 + $0xe0] sm:$0xff]  ;;  %v3506_v32 = vld [vmem:[%s4809_s30 + $0xe8] sm:$0xff] }
 0x525   : > { %3485 = vst [vmem:[%s5002_s29 + $0x120] sm:$0xff] %v3484_v45  ;;  %3487 = vst [vmem:[%s5002_s29 + $0x130] sm:$0xff] %v3486_v47  ;;  %v3508_v46 = vld [vmem:[%s4809_s30 + $0xf0] sm:$0xff]  ;;  %v3510_v48 = vld [vmem:[%s4809_s30 + $0xf8] sm:$0xff] }
 0x526   : > { %3489 = vst [vmem:[%s5002_s29 + $0x140] sm:$0xff] %v3488_v49  ;;  %3491 = vst [vmem:[%s5002_s29 + $0x150] sm:$0xff] %v3490_v50  ;;  %v3512_v62 = vld [vmem:[%s4809_s30 + $0x100] sm:$0xff]  ;;  %v3514_v1 = vld [vmem:[%s4809_s30 + $0x108] sm:$0xff] }
 0x527   : > { %3493 = vst [vmem:[%s5002_s29 + $0x160] sm:$0xff] %v3492_v0  ;;  %3495 = vst [vmem:[%s5002_s29 + $0x170] sm:$0xff] %v3494_v51  ;;  %v3516_v17 = vld [vmem:[%s4809_s30 + $0x110] sm:$0xff]  ;;  %v3518_v19 = vld [vmem:[%s4809_s30 + $0x118] sm:$0xff] }
 0x528   : > { %3497 = vst [vmem:[%s5002_s29 + $0x180] sm:$0xff] %v3496_v52  ;;  %3499 = vst [vmem:[%s5002_s29 + $0x190] sm:$0xff] %v3498_v54  ;;  %v3520_v35 = vld [vmem:[%s4809_s30 + $0x120] sm:$0xff]  ;;  %v3522_v37 = vld [vmem:[%s4809_s30 + $0x128] sm:$0xff] }
 0x529   : > { %3501 = vst [vmem:[%s5002_s29 + $0x1a0] sm:$0xff] %v3500_v56  ;;  %3503 = vst [vmem:[%s5002_s29 + $0x1b0] sm:$0xff] %v3502_v14  ;;  %v3524_v53 = vld [vmem:[%s4809_s30 + $0x130] sm:$0xff]  ;;  %v3526_v55 = vld [vmem:[%s4809_s30 + $0x138] sm:$0xff] }
 0x52a   : > { %3505 = vst [vmem:[%s5002_s29 + $0x1c0] sm:$0xff] %v3504_v30  ;;  %3507 = vst [vmem:[%s5002_s29 + $0x1d0] sm:$0xff] %v3506_v32  ;;  %v3528_v57 = vld [vmem:[%s4809_s30 + $0x140] sm:$0xff]  ;;  %v3530_v58 = vld [vmem:[%s4809_s30 + $0x148] sm:$0xff] }
 0x52b   : > { %3509 = vst [vmem:[%s5002_s29 + $0x1e0] sm:$0xff] %v3508_v46  ;;  %3511 = vst [vmem:[%s5002_s29 + $0x1f0] sm:$0xff] %v3510_v48  ;;  %v3532_v59 = vld [vmem:[%s4809_s30 + $0x150] sm:$0xff]  ;;  %v3534_v60 = vld [vmem:[%s4809_s30 + $0x158] sm:$0xff] }
 0x52c   : > { %3513 = vst [vmem:[%s5002_s29 + $0x200] sm:$0xff] %v3512_v62  ;;  %3515 = vst [vmem:[%s5002_s29 + $0x210] sm:$0xff] %v3514_v1  ;;  %v3536_v61 = vld [vmem:[%s4809_s30 + $0x160] sm:$0xff]  ;;  %v3538_v63 = vld [vmem:[%s4809_s30 + $0x168] sm:$0xff] }
 0x52d   : > { %3517 = vst [vmem:[%s5002_s29 + $0x220] sm:$0xff] %v3516_v17  ;;  %3519 = vst [vmem:[%s5002_s29 + $0x230] sm:$0xff] %v3518_v19  ;;  %v3540_v2 = vld [vmem:[%s4809_s30 + $0x170] sm:$0xff]  ;;  %v3542_v3 = vld [vmem:[%s4809_s30 + $0x178] sm:$0xff] }
 0x52e   : > { %3521 = vst [vmem:[%s5002_s29 + $0x240] sm:$0xff] %v3520_v35  ;;  %3523 = vst [vmem:[%s5002_s29 + $0x250] sm:$0xff] %v3522_v37  ;;  %v3544_v4 = vld [vmem:[%s4809_s30 + $0x180] sm:$0xff]  ;;  %v3546_v5 = vld [vmem:[%s4809_s30 + $0x188] sm:$0xff] }
 0x52f   : > { %3525 = vst [vmem:[%s5002_s29 + $0x260] sm:$0xff] %v3524_v53  ;;  %3527 = vst [vmem:[%s5002_s29 + $0x270] sm:$0xff] %v3526_v55  ;;  %v3548_v6 = vld [vmem:[%s4809_s30 + $0x190] sm:$0xff]  ;;  %v3550_v7 = vld [vmem:[%s4809_s30 + $0x198] sm:$0xff] }
 0x530   : > { %3529 = vst [vmem:[%s5002_s29 + $0x280] sm:$0xff] %v3528_v57  ;;  %3531 = vst [vmem:[%s5002_s29 + $0x290] sm:$0xff] %v3530_v58  ;;  %v3552_v8 = vld [vmem:[%s4809_s30 + $0x1a0] sm:$0xff]  ;;  %v3554_v9 = vld [vmem:[%s4809_s30 + $0x1a8] sm:$0xff] }
 0x531   : > { %3533 = vst [vmem:[%s5002_s29 + $0x2a0] sm:$0xff] %v3532_v59  ;;  %3535 = vst [vmem:[%s5002_s29 + $0x2b0] sm:$0xff] %v3534_v60  ;;  %v3556_v10 = vld [vmem:[%s4809_s30 + $0x1b0] sm:$0xff]  ;;  %v3558_v11 = vld [vmem:[%s4809_s30 + $0x1b8] sm:$0xff] }
 0x532   : > { %3537 = vst [vmem:[%s5002_s29 + $0x2c0] sm:$0xff] %v3536_v61  ;;  %3539 = vst [vmem:[%s5002_s29 + $0x2d0] sm:$0xff] %v3538_v63  ;;  %v3560_v12 = vld [vmem:[%s4809_s30 + $0x1c0] sm:$0xff]  ;;  %v3562_v13 = vld [vmem:[%s4809_s30 + $0x1c8] sm:$0xff] }
 0x533   : > { %3541 = vst [vmem:[%s5002_s29 + $0x2e0] sm:$0xff] %v3540_v2  ;;  %3543 = vst [vmem:[%s5002_s29 + $0x2f0] sm:$0xff] %v3542_v3  ;;  %v3564_v15 = vld [vmem:[%s4809_s30 + $0x1d0] sm:$0xff]  ;;  %v3566_v18 = vld [vmem:[%s4809_s30 + $0x1d8] sm:$0xff] }
 0x534   : > { %3545 = vst [vmem:[%s5002_s29 + $0x300] sm:$0xff] %v3544_v4  ;;  %3547 = vst [vmem:[%s5002_s29 + $0x310] sm:$0xff] %v3546_v5  ;;  %v3568_v20 = vld [vmem:[%s4809_s30 + $0x1e0] sm:$0xff]  ;;  %v3570_v21 = vld [vmem:[%s4809_s30 + $0x1e8] sm:$0xff] }
 0x535   : > { %3549 = vst [vmem:[%s5002_s29 + $0x320] sm:$0xff] %v3548_v6  ;;  %3551 = vst [vmem:[%s5002_s29 + $0x330] sm:$0xff] %v3550_v7  ;;  %v3572_v22 = vld [vmem:[%s4809_s30 + $0x1f0] sm:$0xff]  ;;  %v3574_v23 = vld [vmem:[%s4809_s30 + $0x1f8] sm:$0xff] }
 0x536   : > { %3553 = vst [vmem:[%s5002_s29 + $0x340] sm:$0xff] %v3552_v8  ;;  %3555 = vst [vmem:[%s5002_s29 + $0x350] sm:$0xff] %v3554_v9  ;;  %v3576_v24 = vld [vmem:[%s4809_s30 + $0x200] sm:$0xff]  ;;  %v3578_v25 = vld [vmem:[%s4809_s30 + $0x208] sm:$0xff] }
 0x537   : > { %3557 = vst [vmem:[%s5002_s29 + $0x360] sm:$0xff] %v3556_v10  ;;  %3559 = vst [vmem:[%s5002_s29 + $0x370] sm:$0xff] %v3558_v11  ;;  %v3580_v16 = vld [vmem:[%s4809_s30 + $0x210] sm:$0xff]  ;;  %v3582_v26 = vld [vmem:[%s4809_s30 + $0x218] sm:$0xff] }
 0x538   : > { %3561 = vst [vmem:[%s5002_s29 + $0x380] sm:$0xff] %v3560_v12  ;;  %3563 = vst [vmem:[%s5002_s29 + $0x390] sm:$0xff] %v3562_v13  ;;  %v3584_v27 = vld [vmem:[%s4809_s30 + $0x220] sm:$0xff]  ;;  %v3586_v28 = vld [vmem:[%s4809_s30 + $0x228] sm:$0xff] }
 0x539   : > { %3565 = vst [vmem:[%s5002_s29 + $0x3a0] sm:$0xff] %v3564_v15  ;;  %3567 = vst [vmem:[%s5002_s29 + $0x3b0] sm:$0xff] %v3566_v18  ;;  %v3588_v29 = vld [vmem:[%s4809_s30 + $0x230] sm:$0xff]  ;;  %v3590_v31 = vld [vmem:[%s4809_s30 + $0x238] sm:$0xff] }
 0x53a   : > { %3569 = vst [vmem:[%s5002_s29 + $0x3c0] sm:$0xff] %v3568_v20  ;;  %3571 = vst [vmem:[%s5002_s29 + $0x3d0] sm:$0xff] %v3570_v21  ;;  %v3592_v33 = vld [vmem:[%s4809_s30 + $0x240] sm:$0xff]  ;;  %v3594_v34 = vld [vmem:[%s4809_s30 + $0x248] sm:$0xff] }
 0x53b   : > { %3573 = vst [vmem:[%s5002_s29 + $0x3e0] sm:$0xff] %v3572_v22  ;;  %3575 = vst [vmem:[%s5002_s29 + $0x3f0] sm:$0xff] %v3574_v23  ;;  %v3596_v36 = vld [vmem:[%s4809_s30 + $0x250] sm:$0xff]  ;;  %v3598_v38 = vld [vmem:[%s4809_s30 + $0x258] sm:$0xff] }
 0x53c   : > { %3577 = vst [vmem:[%s5002_s29 + $0x400] sm:$0xff] %v3576_v24  ;;  %3579 = vst [vmem:[%s5002_s29 + $0x410] sm:$0xff] %v3578_v25  ;;  %v3600_v39 = vld [vmem:[%s4809_s30 + $0x260] sm:$0xff]  ;;  %v3602_v40 = vld [vmem:[%s4809_s30 + $0x268] sm:$0xff] }
 0x53d   : > { %3581 = vst [vmem:[%s5002_s29 + $0x420] sm:$0xff] %v3580_v16  ;;  %3583 = vst [vmem:[%s5002_s29 + $0x430] sm:$0xff] %v3582_v26  ;;  %v3604_v41 = vld [vmem:[%s4809_s30 + $0x270] sm:$0xff]  ;;  %v3606_v42 = vld [vmem:[%s4809_s30 + $0x278] sm:$0xff] }
 0x53e   : > { %3585 = vst [vmem:[%s5002_s29 + $0x440] sm:$0xff] %v3584_v27  ;;  %3587 = vst [vmem:[%s5002_s29 + $0x450] sm:$0xff] %v3586_v28  ;;  %v3608_v43 = vld [vmem:[%s4809_s30 + $0x280] sm:$0xff]  ;;  %v3610_v44 = vld [vmem:[%s4809_s30 + $0x288] sm:$0xff] }
 0x53f   : > { %3589 = vst [vmem:[%s5002_s29 + $0x460] sm:$0xff] %v3588_v29  ;;  %3591 = vst [vmem:[%s5002_s29 + $0x470] sm:$0xff] %v3590_v31  ;;  %v3612_v45 = vld [vmem:[%s4809_s30 + $0x290] sm:$0xff]  ;;  %v3614_v47 = vld [vmem:[%s4809_s30 + $0x298] sm:$0xff] }
 0x540   : > { %3593 = vst [vmem:[%s5002_s29 + $0x480] sm:$0xff] %v3592_v33  ;;  %3595 = vst [vmem:[%s5002_s29 + $0x490] sm:$0xff] %v3594_v34  ;;  %v3616_v49 = vld [vmem:[%s4809_s30 + $0x2a0] sm:$0xff]  ;;  %v3618_v50 = vld [vmem:[%s4809_s30 + $0x2a8] sm:$0xff] }
 0x541   : > { %3597 = vst [vmem:[%s5002_s29 + $0x4a0] sm:$0xff] %v3596_v36  ;;  %3599 = vst [vmem:[%s5002_s29 + $0x4b0] sm:$0xff] %v3598_v38  ;;  %v3620_v0 = vld [vmem:[%s4809_s30 + $0x2b0] sm:$0xff]  ;;  %v3622_v51 = vld [vmem:[%s4809_s30 + $0x2b8] sm:$0xff] }
 0x542   : > { %3601 = vst [vmem:[%s5002_s29 + $0x4c0] sm:$0xff] %v3600_v39  ;;  %3603 = vst [vmem:[%s5002_s29 + $0x4d0] sm:$0xff] %v3602_v40  ;;  %v3624_v52 = vld [vmem:[%s4809_s30 + $0x2c0] sm:$0xff]  ;;  %v3626_v54 = vld [vmem:[%s4809_s30 + $0x2c8] sm:$0xff] }
 0x543   : > { %3605 = vst [vmem:[%s5002_s29 + $0x4e0] sm:$0xff] %v3604_v41  ;;  %3607 = vst [vmem:[%s5002_s29 + $0x4f0] sm:$0xff] %v3606_v42  ;;  %v3628_v56 = vld [vmem:[%s4809_s30 + $0x2d0] sm:$0xff]  ;;  %v3630_v14 = vld [vmem:[%s4809_s30 + $0x2d8] sm:$0xff] }
 0x544   : > { %3609 = vst [vmem:[%s5002_s29 + $0x500] sm:$0xff] %v3608_v43  ;;  %3611 = vst [vmem:[%s5002_s29 + $0x510] sm:$0xff] %v3610_v44  ;;  %v3632_v30 = vld [vmem:[%s4809_s30 + $0x2e0] sm:$0xff]  ;;  %v3634_v32 = vld [vmem:[%s4809_s30 + $0x2e8] sm:$0xff] }
 0x545   : > { %3613 = vst [vmem:[%s5002_s29 + $0x520] sm:$0xff] %v3612_v45  ;;  %3615 = vst [vmem:[%s5002_s29 + $0x530] sm:$0xff] %v3614_v47  ;;  %v3636_v46 = vld [vmem:[%s4809_s30 + $0x2f0] sm:$0xff]  ;;  %v3638_v48 = vld [vmem:[%s4809_s30 + $0x2f8] sm:$0xff] }
 0x546   : > { %3617 = vst [vmem:[%s5002_s29 + $0x540] sm:$0xff] %v3616_v49  ;;  %3619 = vst [vmem:[%s5002_s29 + $0x550] sm:$0xff] %v3618_v50  ;;  %v3640_v62 = vld [vmem:[%s4809_s30 + $0x300] sm:$0xff]  ;;  %v3642_v1 = vld [vmem:[%s4809_s30 + $0x308] sm:$0xff] }
 0x547   : > { %3621 = vst [vmem:[%s5002_s29 + $0x560] sm:$0xff] %v3620_v0  ;;  %3623 = vst [vmem:[%s5002_s29 + $0x570] sm:$0xff] %v3622_v51  ;;  %v3644_v17 = vld [vmem:[%s4809_s30 + $0x310] sm:$0xff]  ;;  %v3646_v19 = vld [vmem:[%s4809_s30 + $0x318] sm:$0xff] }
 0x548   : > { %3625 = vst [vmem:[%s5002_s29 + $0x580] sm:$0xff] %v3624_v52  ;;  %3627 = vst [vmem:[%s5002_s29 + $0x590] sm:$0xff] %v3626_v54  ;;  %v3648_v35 = vld [vmem:[%s4809_s30 + $0x320] sm:$0xff]  ;;  %v3650_v37 = vld [vmem:[%s4809_s30 + $0x328] sm:$0xff] }
 0x549   : > { %3629 = vst [vmem:[%s5002_s29 + $0x5a0] sm:$0xff] %v3628_v56  ;;  %3631 = vst [vmem:[%s5002_s29 + $0x5b0] sm:$0xff] %v3630_v14  ;;  %v3652_v53 = vld [vmem:[%s4809_s30 + $0x330] sm:$0xff]  ;;  %v3654_v55 = vld [vmem:[%s4809_s30 + $0x338] sm:$0xff] }
 0x54a   : > { %3633 = vst [vmem:[%s5002_s29 + $0x5c0] sm:$0xff] %v3632_v30  ;;  %3635 = vst [vmem:[%s5002_s29 + $0x5d0] sm:$0xff] %v3634_v32  ;;  %v3656_v57 = vld [vmem:[%s4809_s30 + $0x340] sm:$0xff]  ;;  %v3658_v58 = vld [vmem:[%s4809_s30 + $0x348] sm:$0xff] }
 0x54b   : > { %3637 = vst [vmem:[%s5002_s29 + $0x5e0] sm:$0xff] %v3636_v46  ;;  %3639 = vst [vmem:[%s5002_s29 + $0x5f0] sm:$0xff] %v3638_v48  ;;  %v3660_v59 = vld [vmem:[%s4809_s30 + $0x350] sm:$0xff]  ;;  %v3662_v60 = vld [vmem:[%s4809_s30 + $0x358] sm:$0xff] }
 0x54c   : > { %3641 = vst [vmem:[%s5002_s29 + $0x600] sm:$0xff] %v3640_v62  ;;  %3643 = vst [vmem:[%s5002_s29 + $0x610] sm:$0xff] %v3642_v1  ;;  %v3664_v61 = vld [vmem:[%s4809_s30 + $0x360] sm:$0xff]  ;;  %v3666_v63 = vld [vmem:[%s4809_s30 + $0x368] sm:$0xff] }
 0x54d   : > { %3645 = vst [vmem:[%s5002_s29 + $0x620] sm:$0xff] %v3644_v17  ;;  %3647 = vst [vmem:[%s5002_s29 + $0x630] sm:$0xff] %v3646_v19  ;;  %v3668_v2 = vld [vmem:[%s4809_s30 + $0x370] sm:$0xff]  ;;  %v3670_v3 = vld [vmem:[%s4809_s30 + $0x378] sm:$0xff] }
 0x54e   : > { %3649 = vst [vmem:[%s5002_s29 + $0x640] sm:$0xff] %v3648_v35  ;;  %3651 = vst [vmem:[%s5002_s29 + $0x650] sm:$0xff] %v3650_v37  ;;  %v3672_v4 = vld [vmem:[%s4809_s30 + $0x380] sm:$0xff]  ;;  %v3674_v5 = vld [vmem:[%s4809_s30 + $0x388] sm:$0xff] }
 0x54f   : > { %3653 = vst [vmem:[%s5002_s29 + $0x660] sm:$0xff] %v3652_v53  ;;  %3655 = vst [vmem:[%s5002_s29 + $0x670] sm:$0xff] %v3654_v55  ;;  %v3676_v6 = vld [vmem:[%s4809_s30 + $0x390] sm:$0xff]  ;;  %v3678_v7 = vld [vmem:[%s4809_s30 + $0x398] sm:$0xff] }
 0x550   : > { %3657 = vst [vmem:[%s5002_s29 + $0x680] sm:$0xff] %v3656_v57  ;;  %3659 = vst [vmem:[%s5002_s29 + $0x690] sm:$0xff] %v3658_v58  ;;  %v3680_v8 = vld [vmem:[%s4809_s30 + $0x3a0] sm:$0xff]  ;;  %v3682_v9 = vld [vmem:[%s4809_s30 + $0x3a8] sm:$0xff] }
 0x551   : > { %3661 = vst [vmem:[%s5002_s29 + $0x6a0] sm:$0xff] %v3660_v59  ;;  %3663 = vst [vmem:[%s5002_s29 + $0x6b0] sm:$0xff] %v3662_v60  ;;  %v3684_v10 = vld [vmem:[%s4809_s30 + $0x3b0] sm:$0xff]  ;;  %v3686_v11 = vld [vmem:[%s4809_s30 + $0x3b8] sm:$0xff] }
 0x552   : > { %3665 = vst [vmem:[%s5002_s29 + $0x6c0] sm:$0xff] %v3664_v61  ;;  %3667 = vst [vmem:[%s5002_s29 + $0x6d0] sm:$0xff] %v3666_v63  ;;  %v3688_v12 = vld [vmem:[%s4809_s30 + $0x3c0] sm:$0xff]  ;;  %v3690_v13 = vld [vmem:[%s4809_s30 + $0x3c8] sm:$0xff] }
 0x553   : > { %3669 = vst [vmem:[%s5002_s29 + $0x6e0] sm:$0xff] %v3668_v2  ;;  %3671 = vst [vmem:[%s5002_s29 + $0x6f0] sm:$0xff] %v3670_v3  ;;  %v3692_v15 = vld [vmem:[%s4809_s30 + $0x3d0] sm:$0xff]  ;;  %v3694_v18 = vld [vmem:[%s4809_s30 + $0x3d8] sm:$0xff] }
 0x554   : > { %3673 = vst [vmem:[%s5002_s29 + $0x700] sm:$0xff] %v3672_v4  ;;  %3675 = vst [vmem:[%s5002_s29 + $0x710] sm:$0xff] %v3674_v5  ;;  %v3696_v20 = vld [vmem:[%s4809_s30 + $0x3e0] sm:$0xff]  ;;  %v3698_v21 = vld [vmem:[%s4809_s30 + $0x3e8] sm:$0xff] }
 0x555   : > { %3677 = vst [vmem:[%s5002_s29 + $0x720] sm:$0xff] %v3676_v6  ;;  %3679 = vst [vmem:[%s5002_s29 + $0x730] sm:$0xff] %v3678_v7  ;;  %v3700_v22 = vld [vmem:[%s4809_s30 + $0x3f0] sm:$0xff]  ;;  %v3702_v23 = vld [vmem:[%s4809_s30 + $0x3f8] sm:$0xff] }
 0x556   : > { %3681 = vst [vmem:[%s5002_s29 + $0x740] sm:$0xff] %v3680_v8  ;;  %3683 = vst [vmem:[%s5002_s29 + $0x750] sm:$0xff] %v3682_v9 }
 0x557   : > { %3685 = vst [vmem:[%s5002_s29 + $0x760] sm:$0xff] %v3684_v10  ;;  %3687 = vst [vmem:[%s5002_s29 + $0x770] sm:$0xff] %v3686_v11 }
 0x558   : > { %3689 = vst [vmem:[%s5002_s29 + $0x780] sm:$0xff] %v3688_v12  ;;  %3691 = vst [vmem:[%s5002_s29 + $0x790] sm:$0xff] %v3690_v13 }
 0x559   : > { %3693 = vst [vmem:[%s5002_s29 + $0x7a0] sm:$0xff] %v3692_v15  ;;  %3695 = vst [vmem:[%s5002_s29 + $0x7b0] sm:$0xff] %v3694_v18 }
 0x55a   : > { %3697 = vst [vmem:[%s5002_s29 + $0x7c0] sm:$0xff] %v3696_v20  ;;  %3699 = vst [vmem:[%s5002_s29 + $0x7d0] sm:$0xff] %v3698_v21 }
 0x55b   : > { %3701 = vst [vmem:[%s5002_s29 + $0x7e0] sm:$0xff] %v3700_v22  ;;  %3703 = vst [vmem:[%s5002_s29 + $0x7f0] sm:$0xff] %v3702_v23 }
 0x55c PF: > { %s20_s15 = sadd.s32 1, %s4158_s15   ;;  %s5294_s30 = sld [smem:[#allocation4_spill]] }
 0x55d   : > { %p17_p11 = scmp.ge.s32.totalorder %s20_s15, 6   ;;  %s5295_s10 = sld [smem:[#allocation9_spill]] }
 0x55e   : > { %s5296_s11 = sld [smem:[#allocation5_spill]]  ;;  %s5297_s12 = sld [smem:[#allocation6_spill]] }
 0x55f   : > { %s5298_s13 = sld [smem:[#allocation7_spill]]  ;;  %s5299_s14 = sld [smem:[#allocation8_spill]] }
 0x560   :  { %19 = sbr.rel (!%p17_p11) target bundleno = 4 (0x4), region = 174 }

// kernel: seg_model_forward.3
= control target key start
LH: loop header
LB: loop body
LE: loop exit
PB: predicated region body
PF: predicated region fallthrough
CT: control target
= control target key end

     0   :  { %s3937_s30 = smov 0   ;;  %s3939_s10 = smov 0   ;;  %s4713_s0 = inlined_call_operand.vmem [shape: bf16[2,64,512], index: 0, kind: input, shape index: {}]   ;;  %s4714_s1 = inlined_call_operand.vmem [shape: f32[2,512,1], index: 1, kind: input, shape index: {}]   ;;  %s4715_s2 = inlined_call_operand.vmem [shape: bf16[512,64], index: 2, kind: input, shape index: {}]   ;;  %s4716_s3 = inlined_call_operand.vmem [shape: bf16[256,512], index: 3, kind: input, shape index: {}]   ;;  %s4717_s4 = inlined_call_operand.vmem [shape: f32[256,1], index: 4, kind: input, shape index: {}]   ;;  %s4718_s5 = inlined_call_operand.vmem [shape: bf16[128,256], index: 5, kind: input, shape index: {}]   ;;  %s4719_s6 = inlined_call_operand.vmem [shape: f32[128,1], index: 6, kind: input, shape index: {}]   ;;  %s4720_s7 = inlined_call_operand.vmem [shape: bf16[8,128], index: 7, kind: input, shape index: {}]   ;;  %s4721_s8 = inlined_call_operand.vmem [shape: f32[8,1], index: 8, kind: input, shape index: {}]   ;;  %s4722_s9 = inlined_call_operand.vmem [shape: f32[2,8,512], index: 9, kind: output, shape index: {}]  }
   0x1   :  { %s3941_s11 = smov 0   ;;  %s3943_s12 = smov 0  }
   0x2   :  { %s3945_s13 = smov 0   ;;  %s3947_s14 = smov 0  }
   0x3   :  { %s3949_s15 = smov 0  }
   0x4 LB: > { %s28_s16 = sadd.s32 1, %s3876_s13  ;;  %s31_s17 = sadd.s32 1, %s3880_s14  ;;  %s3884_s15 = sphi %s3949_s15, %s19_s15   ;;  %s3880_s14 = sphi %s3947_s14, %s4731_s14   ;;  %s3876_s13 = sphi %s3945_s13, %s4730_s13   ;;  %s3872_s12 = sphi %s3943_s12, %s4729_s12   ;;  %s3868_s11 = sphi %s3941_s11, %s4728_s11   ;;  %s3864_s10 = sphi %s3939_s10, %s4727_s10   ;;  %s3860_s30 = sphi %s3937_s30, %s4726_s30  }
   0x5   : > { %p29_p0 = scmp.ge.s32.totalorder %s28_s16, 2  ;;  %p47_p1 = scmp.ne.s32.totalorder %s3864_s10, %s3860_s30 }
   0x6   : > { %p48_p2 = scmp.eq.s32.totalorder %s3884_s15, 0  ;;  %s40_s21 = sadd.s32 1, %s3864_s10 }
   0x7   : > { %s4733_s16 = smov (%p29_p0, %s28_s16), 0  ;;  %s4735_s17 = smov (!%p29_p0, %s31_s17), %s3880_s14 }
   0x8   : > { %p49_p3 = por %p48_p2, %p47_p1  ;;  %p33_p4 = scmp.ge.s32.totalorder %s4735_s17, 2 }
   0x9   : > { %s36_s18 = ssub.s32 %s3876_s13, %s4733_s16  ;;  %p3312_p6 = scmp.ge.s32.totalorder %s3884_s15, 4 }
   0xa   : > { %s4737_s17 = smov (%p33_p4, %s4735_s17), 0 }
   0xb   : > { %4724 = sst [smem:[#allocation3_spill]] %s4737_s17  ;;  %s35_s19 = ssub.s32 %s3880_s14, %s4737_s17 }
   0xc   : > { %s37_s20 = sor.u32 %s36_s18, %s35_s19  ;;  %295 = sbr.rel (%p3312_p6) target bundleno = 30 (0x1e), region = 44 }
   0xd   : > { %p38_p5 = scmp.eq.s32.totalorder %s37_s20, 0 }
   0xf   : > { %s3988_s22 = scalar_select %p38_p5, %s3864_s10, %s40_s21  }
  0x13   : > { %298 = sbr.rel (!%p49_p3) target bundleno = 30 (0x1e), region = 48  ;;  %s300_s23 = sand.u32 (%p49_p3), 1, %s3864_s10  }
  0x14   : > { %s3314_s24 = sshll.u32 (%p49_p3), %s3876_s13, 1  ;;  %s3313_s25 = sshll.u32 (%p49_p3), %s300_s23, 6 }
  0x15   : > { %s3315_s26 = sshll.u32 (%p49_p3), %s3880_s14, 5  ;;  %s302_s19 = scalar_lea.vmem (%p49_p3), [#allocation2], %s3313_s25 }
  0x16   : > { %s305_s27 = sadd.s32 (%p49_p3), %s3315_s26, %s3314_s24 }
  0x17   : > { %s3316_s28 = sshll.u32 (%p49_p3), %s305_s27, 2 }
  0x18   : > { %s307_s18 = scalar_lea.vmem (%p49_p3), %s4713_s0, %s3316_s28 }
  0x19   : > { %v349_v0 = vld [vmem:[%s307_s18] sm:$0xff] (%p49_p3)  ;;  %v351_v1 = vld [vmem:[%s307_s18 + $0x10] sm:$0xff] (%p49_p3) }
  0x1a   : > { %v353_v2 = vld [vmem:[%s307_s18 + $0x20] sm:$0xff]  ;;  %350 = vst [vmem:[%s302_s19] sm:$0xff] %v349_v0  ;;  %352 = vst [vmem:[%s302_s19 + $0x8] sm:$0xff] %v351_v1  ;;  %v355_v3 = vld [vmem:[%s307_s18 + $0x30] sm:$0xff] }
  0x1b   : > { %354 = vst [vmem:[%s302_s19 + $0x10] sm:$0xff] %v353_v2  ;;  %v357_v4 = vld [vmem:[%s307_s18 + $0x40] sm:$0xff]  ;;  %v359_v5 = vld [vmem:[%s307_s18 + $0x50] sm:$0xff]  ;;  %356 = vst [vmem:[%s302_s19 + $0x18] sm:$0xff] %v355_v3 }
  0x1c   : > { %358 = vst [vmem:[%s302_s19 + $0x20] sm:$0xff] %v357_v4  ;;  %360 = vst [vmem:[%s302_s19 + $0x28] sm:$0xff] %v359_v5  ;;  %v361_v6 = vld [vmem:[%s307_s18 + $0x60] sm:$0xff]  ;;  %v363_v7 = vld [vmem:[%s307_s18 + $0x70] sm:$0xff] }
  0x1d   : > { %362 = vst [vmem:[%s302_s19 + $0x30] sm:$0xff] %v361_v6  ;;  %364 = vst [vmem:[%s302_s19 + $0x38] sm:$0xff] %v363_v7 }
  0x1e PF: > { %p3317_p7 = scmp.ge.s32.totalorder %s3884_s15, 1  ;;  %p377_p8 = scmp.lt.s32.totalorder %s3884_s15, 5 }
  0x20   : > { %p378_p9 = pnand %p3317_p7, %p377_p8 }
  0x21   : > { %s384_s17 = sand.u32 (!%p378_p9), 1, %s3860_s30   ;;  %p429_p10 = scmp.lt.s32.totalorder (!%p378_p9), %s3872_s12, 1  ;;  %v3886_v8 = vmov (!%p378_p9), 0   ;;  %v3678_v25 = vld [vmem:[%s4715_s2] sm:$0xff] (!%p378_p9)   ;;  %vm1101_vm0 = vcmask (!%p378_p9), 523264   ;;  %v3679_v29 = vld [vmem:[%s4715_s2 + $0x8] sm:$0xff] (!%p378_p9)  }
  0x22   : > { %381 = sbr.rel (%p378_p9) target bundleno = 1369 (0x559), region = 90  ;;  %3665 = vset.pattern.permute.xlu1 (!%p378_p9), %v3886_v8  ;;  %3664 = vset.pattern.permute.xlu0 (!%p378_p9), %v3886_v8  ;;  %s3318_s20 = sshll.u32 (!%p378_p9), %s384_s17, 6  ;;  %v3680_v35 = vld [vmem:[%s4715_s2 + $0x10] sm:$0xff] (!%p378_p9)   ;;  %v3681_v40 = vld [vmem:[%s4715_s2 + $0x18] sm:$0xff] (!%p378_p9)   ;;  %v3682_v45 = vld [vmem:[%s4715_s2 + $0x20] sm:$0xff] (!%p378_p9)  }
  0x23   : > { %1230 = vmatprep.mubr.bf16.mxu0 (!%p378_p9), %v3886_v8  ;;  %s386_s21 = scalar_lea.vmem (!%p378_p9), [#allocation2], %s3318_s20  ;;  %v3683_v50 = vld [vmem:[%s4715_s2 + $0x28] sm:$0xff] (!%p378_p9)   ;;  %v3684_v55 = vld [vmem:[%s4715_s2 + $0x30] sm:$0xff] (!%p378_p9)   ;;  %v3685_v60 = vld [vmem:[%s4715_s2 + $0x38] sm:$0xff] (!%p378_p9)   ;;  %s3321_s27 = sshll.u32 (!%p378_p9), %s3868_s11, 1 }
  0x24   : > { %v3666_v9 = vld [vmem:[%s386_s21 + $0x4] ss:$8 sps:$4 sm:$0xff] (!%p378_p9)   ;;  %v3668_v10 = vld [vmem:[%s386_s21] ss:$8 sps:$4 sm:$0xff] (!%p378_p9)   ;;  %v3669_v11 = vld [vmem:[%s386_s21 + $0x14] ss:$8 sps:$4 sm:$0xff] (!%p378_p9)  }
  0x25   : > { %1198 = vmatprep.subr.bf16.mxu0 (!%p378_p9), %v3666_v9  ;;  %v3671_v12 = vld [vmem:[%s386_s21 + $0x10] ss:$8 sps:$4 sm:$0xff] (!%p378_p9)   ;;  %v3672_v15 = vld [vmem:[%s386_s21 + $0x24] ss:$8 sps:$4 sm:$0xff] (!%p378_p9)   ;;  %v3674_v18 = vld [vmem:[%s386_s21 + $0x20] ss:$8 sps:$4 sm:$0xff] (!%p378_p9)  }
  0x26   : > { %1199 = vmatpush1.bf16.msra.mxu0 (!%p378_p9), %v3668_v10  ;;  %v3675_v19 = vld [vmem:[%s386_s21 + $0x34] ss:$8 sps:$4 sm:$0xff] (!%p378_p9)   ;;  %v3677_v22 = vld [vmem:[%s386_s21 + $0x30] ss:$8 sps:$4 sm:$0xff] (!%p378_p9)   ;;  %v3686_v1 = vld [vmem:[%s4715_s2 + $0x40] sm:$0xff] (!%p378_p9)   ;;  %p437_p11 = scmp.lt.s32.totalorder (!%p378_p9), %s3321_s27, 3 }
  0x27   : > { %1200 = vmatprep.subr.bf16.mxu0 (!%p378_p9), %v3669_v11  ;;  %v3687_v6 = vld [vmem:[%s4715_s2 + $0x48] sm:$0xff] (!%p378_p9)  }
  0x29   : > { %s4739_s12 = smov (!%p429_p10, %s3872_s12), 1  ;;  %s4741_s27 = smov (!%p437_p11, %s3321_s27), 3 }
  0x2a   : > { %s3478_s23 = sshll.u32 %s4739_s12, 9  ;;  %1201 = vmatpush1.bf16.msra.mxu0 %v3671_v12  ;;  %v3688_v12 = vld [vmem:[%s4715_s2 + $0x50] sm:$0xff]   ;;  %s3322_s28 = sshll.u32 %s4739_s12, 2 }
  0x2b   : > { %s4011_s25 = scalar_lea.vmem %s4714_s1, %s3478_s23  ;;  %1202 = vmatprep.subr.bf16.mxu0 %v3672_v15  ;;  %s440_s29 = sadd.s32 %s3322_s28, %s4741_s27 }
  0x2c   : > { %v455_v13 = vld [vmem:[%s4011_s25 + $0x10] sm:$0xff]  ;;  %v453_v14 = vld [vmem:[%s4011_s25] sm:$0xff]  ;;  %v456_v16 = vld [vmem:[%s4011_s25 + $0x18] sm:$0xff]  ;;  %s3323_s18 = sshll.u32 %s440_s29, 3 }
  0x2d   : > { %593 = vperm.xlu1 %3665, %v455_v13   ;;  %583 = vperm.xlu0 %3664, %v453_v14   ;;  %v454_v17 = vld [vmem:[%s4011_s25 + $0x8] sm:$0xff]  ;;  %v457_v21 = vld [vmem:[%s4011_s25 + $0x20] sm:$0xff]  ;;  %v460_v23 = vld [vmem:[%s4011_s25 + $0x38] sm:$0xff]  ;;  %s442_s20 = scalar_lea.vmem %s4722_s9, %s3323_s18 }
  0x2e   : > { %v458_v20 = vld [vmem:[%s4011_s25 + $0x28] sm:$0xff]  ;;  %1203 = vmatpush1.bf16.msra.mxu0 %v3674_v18  ;;  %v459_v24 = vld [vmem:[%s4011_s25 + $0x30] sm:$0xff]  ;;  %v461_v27 = vld [vmem:[%s4011_s25 + $0x40] sm:$0xff] }
  0x2f   : > { %1204 = vmatprep.subr.bf16.mxu0 %v3675_v19  ;;  %v462_v26 = vld [vmem:[%s4011_s25 + $0x48] sm:$0xff]  ;;  %v464_v28 = vld [vmem:[%s4011_s25 + $0x58] sm:$0xff]  ;;  %v463_v30 = vld [vmem:[%s4011_s25 + $0x50] sm:$0xff] }
  0x30   : > { %v466_v31 = vld [vmem:[%s4011_s25 + $0x68] sm:$0xff]  ;;  %v465_v32 = vld [vmem:[%s4011_s25 + $0x60] sm:$0xff]  ;;  %v468_v33 = vld [vmem:[%s4011_s25 + $0x78] sm:$0xff] }
  0x31   : > { %598 = vperm.xlu1 %3665, %v456_v16   ;;  %588 = vperm.xlu0 %3664, %v454_v17   ;;  %v467_v34 = vld [vmem:[%s4011_s25 + $0x70] sm:$0xff]  ;;  %v470_v36 = vld [vmem:[%s4011_s25 + $0x88] sm:$0xff]  ;;  %v469_v37 = vld [vmem:[%s4011_s25 + $0x80] sm:$0xff] }
  0x32   : > { %1205 = vmatpush1.bf16.msra.mxu0 %v3677_v22  ;;  %v472_v38 = vld [vmem:[%s4011_s25 + $0x98] sm:$0xff]  ;;  %v471_v39 = vld [vmem:[%s4011_s25 + $0x90] sm:$0xff]  ;;  %v474_v41 = vld [vmem:[%s4011_s25 + $0xa8] sm:$0xff] }
  0x33   : > { %v473_v42 = vld [vmem:[%s4011_s25 + $0xa0] sm:$0xff]  ;;  %v476_v43 = vld [vmem:[%s4011_s25 + $0xb8] sm:$0xff]  ;;  %v475_v44 = vld [vmem:[%s4011_s25 + $0xb0] sm:$0xff] }
  0x34   : > { %v478_v46 = vld [vmem:[%s4011_s25 + $0xc8] sm:$0xff]  ;;  %v477_v47 = vld [vmem:[%s4011_s25 + $0xc0] sm:$0xff]  ;;  %v480_v48 = vld [vmem:[%s4011_s25 + $0xd8] sm:$0xff] }
  0x35   : > { %608 = vperm.xlu1 %3665, %v458_v20   ;;  %603 = vperm.xlu0 %3664, %v457_v21   ;;  %v479_v49 = vld [vmem:[%s4011_s25 + $0xd0] sm:$0xff]  ;;  %v482_v51 = vld [vmem:[%s4011_s25 + $0xe8] sm:$0xff]  ;;  %v481_v52 = vld [vmem:[%s4011_s25 + $0xe0] sm:$0xff] }
  0x36   : > { %3364 = vmatmul.mubr.msk.bf16.vlgmr.msra.gmra.mrb[0].mxu0 %vm1101_vm0, %v3678_v25  ;;  %v484_v53 = vld [vmem:[%s4011_s25 + $0xf8] sm:$0xff]  ;;  %v483_v54 = vld [vmem:[%s4011_s25 + $0xf0] sm:$0xff]  ;;  %v486_v56 = vld [vmem:[%s4011_s25 + $0x108] sm:$0xff] }
  0x37   : > { %1240 = vmatprep.mubr.bf16.mxu0 %v3886_v8  ;;  %v485_v57 = vld [vmem:[%s4011_s25 + $0x100] sm:$0xff]  ;;  %v488_v58 = vld [vmem:[%s4011_s25 + $0x118] sm:$0xff]  ;;  %v487_v59 = vld [vmem:[%s4011_s25 + $0x110] sm:$0xff] }
  0x38   : > { %v490_v61 = vld [vmem:[%s4011_s25 + $0x128] sm:$0xff]  ;;  %v489_v62 = vld [vmem:[%s4011_s25 + $0x120] sm:$0xff]  ;;  %v492_v63 = vld [vmem:[%s4011_s25 + $0x138] sm:$0xff] }
  0x39   : > { %618 = vperm.xlu1 %3665, %v460_v23   ;;  %613 = vperm.xlu0 %3664, %v459_v24   ;;  %v491_v0 = vld [vmem:[%s4011_s25 + $0x130] sm:$0xff]  ;;  %v494_v2 = vld [vmem:[%s4011_s25 + $0x148] sm:$0xff]  ;;  %v493_v3 = vld [vmem:[%s4011_s25 + $0x140] sm:$0xff] }
  0x3a   : > { %v496_v4 = vld [vmem:[%s4011_s25 + $0x158] sm:$0xff]  ;;  %v495_v5 = vld [vmem:[%s4011_s25 + $0x150] sm:$0xff]  ;;  %v498_v7 = vld [vmem:[%s4011_s25 + $0x168] sm:$0xff] }
  0x3b   : > { %v497_v9 = vld [vmem:[%s4011_s25 + $0x160] sm:$0xff]  ;;  %v500_v10 = vld [vmem:[%s4011_s25 + $0x178] sm:$0xff]  ;;  %v499_v11 = vld [vmem:[%s4011_s25 + $0x170] sm:$0xff] }
  0x3c   : > { %v502_v13 = vld [vmem:[%s4011_s25 + $0x188] sm:$0xff]  ;;  %v501_v14 = vld [vmem:[%s4011_s25 + $0x180] sm:$0xff]  ;;  %v504_v15 = vld [vmem:[%s4011_s25 + $0x198] sm:$0xff] }
  0x3d   : > { %628 = vperm.xlu1 %3665, %v462_v26   ;;  %623 = vperm.xlu0 %3664, %v461_v27   ;;  %v503_v16 = vld [vmem:[%s4011_s25 + $0x190] sm:$0xff]  ;;  %v3689_v17 = vld [vmem:[%s4715_s2 + $0x58] sm:$0xff]   ;;  %v506_v18 = vld [vmem:[%s4011_s25 + $0x1a8] sm:$0xff] }
  0x3e   : > { %3365 = vmatmul.mubr.msk.bf16.gmra.mrb[4].mxu0 %vm1101_vm0, %v3679_v29  ;;  %v505_v19 = vld [vmem:[%s4011_s25 + $0x1a0] sm:$0xff]  ;;  %v508_v20 = vld [vmem:[%s4011_s25 + $0x1b8] sm:$0xff]  ;;  %v507_v21 = vld [vmem:[%s4011_s25 + $0x1b0] sm:$0xff] }
  0x3f   : > { %1250 = vmatprep.mubr.bf16.mxu0 %v3886_v8  ;;  %v3690_v22 = vld [vmem:[%s4715_s2 + $0x60] sm:$0xff]   ;;  %v510_v23 = vld [vmem:[%s4011_s25 + $0x1c8] sm:$0xff]  ;;  %v512_v25 = vld [vmem:[%s4011_s25 + $0x1d8] sm:$0xff] }
  0x40   : > { %v509_v24 = vld [vmem:[%s4011_s25 + $0x1c0] sm:$0xff]  ;;  %v511_v26 = vld [vmem:[%s4011_s25 + $0x1d0] sm:$0xff]  ;;  %v3691_v27 = vld [vmem:[%s4715_s2 + $0x68] sm:$0xff]  }
  0x41   : > { %638 = vperm.xlu1 %3665, %v464_v28   ;;  %633 = vperm.xlu0 %3664, %v463_v30   ;;  %v514_v28 = vld [vmem:[%s4011_s25 + $0x1e8] sm:$0xff]  ;;  %v513_v29 = vld [vmem:[%s4011_s25 + $0x1e0] sm:$0xff]  ;;  %v516_v30 = vld [vmem:[%s4011_s25 + $0x1f8] sm:$0xff] }
  0x45   : > { %648 = vperm.xlu1 %3665, %v466_v31   ;;  %643 = vperm.xlu0 %3664, %v465_v32   ;;  %v515_v31 = vld [vmem:[%s4011_s25 + $0x1f0] sm:$0xff] }
  0x46   : > { %3366 = vmatmul.mubr.msk.bf16.gmra.mrb[8].mxu0 %vm1101_vm0, %v3680_v35  ;;  %v3692_v32 = vld [vmem:[%s4715_s2 + $0x70] sm:$0xff]   ;;  %v1810_v35 = vld [vmem:[%s4717_s4 + $0x18] sm:$0xff] }
  0x47   : > { %1260 = vmatprep.mubr.bf16.mxu0 %v3886_v8 }
  0x49   : > { %658 = vperm.xlu1 %3665, %v468_v33   ;;  %653 = vperm.xlu0 %3664, %v467_v34   ;;  %v1808_v33 = vld [vmem:[%s4717_s4 + $0x8] sm:$0xff]  ;;  %v1807_v34 = vld [vmem:[%s4717_s4] sm:$0xff] }
  0x4d   : > { %668 = vperm.xlu1 %3665, %v470_v36   ;;  %663 = vperm.xlu0 %3664, %v469_v37   ;;  %v1809_v36 = vld [vmem:[%s4717_s4 + $0x10] sm:$0xff]  ;;  %v3693_v37 = vld [vmem:[%s4715_s2 + $0x78] sm:$0xff]  }
  0x4e   : > { %3367 = vmatmul.mubr.msk.bf16.gmra.mrb[12].mxu0 %vm1101_vm0, %v3681_v40  ;;  %v1814_v40 = vld [vmem:[%s4717_s4 + $0x38] sm:$0xff] }
  0x4f   : > { %1270 = vmatprep.mubr.bf16.mxu0 %v3886_v8 }
  0x51   : > { %678 = vperm.xlu1 %3665, %v472_v38   ;;  %673 = vperm.xlu0 %3664, %v471_v39   ;;  %v1812_v38 = vld [vmem:[%s4717_s4 + $0x28] sm:$0xff]  ;;  %v1811_v39 = vld [vmem:[%s4717_s4 + $0x20] sm:$0xff] }
  0x55   : > { %688 = vperm.xlu1 %3665, %v474_v41   ;;  %683 = vperm.xlu0 %3664, %v473_v42   ;;  %v1813_v41 = vld [vmem:[%s4717_s4 + $0x30] sm:$0xff]  ;;  %v3694_v42 = vld [vmem:[%s4715_s2 + $0x80] sm:$0xff]  }
  0x56   : > { %3368 = vmatmul.mubr.msk.bf16.gmra.mrb[16].mxu0 %vm1101_vm0, %v3682_v45  ;;  %v1818_v45 = vld [vmem:[%s4717_s4 + $0x58] sm:$0xff] }
  0x57   : > { %1280 = vmatprep.mubr.bf16.mxu0 %v3886_v8 }
  0x59   : > { %698 = vperm.xlu1 %3665, %v476_v43   ;;  %693 = vperm.xlu0 %3664, %v475_v44   ;;  %v1816_v43 = vld [vmem:[%s4717_s4 + $0x48] sm:$0xff]  ;;  %v1815_v44 = vld [vmem:[%s4717_s4 + $0x40] sm:$0xff] }
  0x5d   : > { %708 = vperm.xlu1 %3665, %v478_v46   ;;  %703 = vperm.xlu0 %3664, %v477_v47   ;;  %v1817_v46 = vld [vmem:[%s4717_s4 + $0x50] sm:$0xff]  ;;  %v3695_v47 = vld [vmem:[%s4715_s2 + $0x88] sm:$0xff]  }
  0x5e   : > { %3369 = vmatmul.mubr.msk.bf16.gmra.mrb[20].mxu0 %vm1101_vm0, %v3683_v50  ;;  %v1822_v50 = vld [vmem:[%s4717_s4 + $0x78] sm:$0xff] }
  0x5f   : > { %1290 = vmatprep.mubr.bf16.mxu0 %v3886_v8 }
  0x61   : > { %718 = vperm.xlu1 %3665, %v480_v48   ;;  %713 = vperm.xlu0 %3664, %v479_v49   ;;  %v1820_v48 = vld [vmem:[%s4717_s4 + $0x68] sm:$0xff]  ;;  %v1819_v49 = vld [vmem:[%s4717_s4 + $0x60] sm:$0xff] }
  0x65   : > { %728 = vperm.xlu1 %3665, %v482_v51   ;;  %723 = vperm.xlu0 %3664, %v481_v52   ;;  %v1821_v51 = vld [vmem:[%s4717_s4 + $0x70] sm:$0xff] }
  0x66   : > { %3370 = vmatmul.mubr.msk.bf16.gmra.mrb[24].mxu0 %vm1101_vm0, %v3684_v55  ;;  %v3696_v52 = vld [vmem:[%s4715_s2 + $0x90] sm:$0xff]   ;;  %v1826_v55 = vld [vmem:[%s4717_s4 + $0x98] sm:$0xff] }
  0x67   : > { %1300 = vmatprep.mubr.bf16.mxu0 %v3886_v8 }
  0x69   : > { %738 = vperm.xlu1 %3665, %v484_v53   ;;  %733 = vperm.xlu0 %3664, %v483_v54   ;;  %v1824_v53 = vld [vmem:[%s4717_s4 + $0x88] sm:$0xff]  ;;  %v1823_v54 = vld [vmem:[%s4717_s4 + $0x80] sm:$0xff] }
  0x6d   : > { %748 = vperm.xlu1 %3665, %v486_v56   ;;  %743 = vperm.xlu0 %3664, %v485_v57   ;;  %v1825_v56 = vld [vmem:[%s4717_s4 + $0x90] sm:$0xff]  ;;  %v3697_v57 = vld [vmem:[%s4715_s2 + $0x98] sm:$0xff]  }
  0x6e   : > { %3371 = vmatmul.mubr.msk.bf16.gmra.mrb[28].mxu0 %vm1101_vm0, %v3685_v60  ;;  %v1830_v60 = vld [vmem:[%s4717_s4 + $0xb8] sm:$0xff] }
  0x6f   : > { %1310 = vmatprep.mubr.bf16.mxu0 %v3886_v8 }
  0x71   : > { %758 = vperm.xlu1 %3665, %v488_v58   ;;  %753 = vperm.xlu0 %3664, %v487_v59   ;;  %v1828_v58 = vld [vmem:[%s4717_s4 + $0xa8] sm:$0xff]  ;;  %v1827_v59 = vld [vmem:[%s4717_s4 + $0xa0] sm:$0xff] }
  0x75   : > { %768 = vperm.xlu1 %3665, %v490_v61   ;;  %763 = vperm.xlu0 %3664, %v489_v62   ;;  %v1829_v61 = vld [vmem:[%s4717_s4 + $0xb0] sm:$0xff]  ;;  %v3698_v62 = vld [vmem:[%s4715_s2 + $0xa0] sm:$0xff]  }
  0x76   : > { %3372 = vmatmul.mubr.msk.bf16.gmra.mrb[32].mxu0 %vm1101_vm0, %v3686_v1  ;;  %v1834_v1 = vld [vmem:[%s4717_s4 + $0xd8] sm:$0xff] }
  0x77   : > { %1320 = vmatprep.mubr.bf16.mxu0 %v3886_v8 }
  0x79   : > { %778 = vperm.xlu1 %3665, %v492_v63   ;;  %773 = vperm.xlu0 %3664, %v491_v0   ;;  %v1832_v63 = vld [vmem:[%s4717_s4 + $0xc8] sm:$0xff]  ;;  %v1831_v0 = vld [vmem:[%s4717_s4 + $0xc0] sm:$0xff] }
  0x7d   : > { %788 = vperm.xlu1 %3665, %v494_v2   ;;  %783 = vperm.xlu0 %3664, %v493_v3   ;;  %v1833_v2 = vld [vmem:[%s4717_s4 + $0xd0] sm:$0xff]  ;;  %v3699_v3 = vld [vmem:[%s4715_s2 + $0xa8] sm:$0xff]  }
  0x7e   : > { %3373 = vmatmul.mubr.msk.bf16.gmra.mrb[36].mxu0 %vm1101_vm0, %v3687_v6 }
  0x7f   : > { %1330 = vmatprep.mubr.bf16.mxu0 %v3886_v8 }
  0x81   : > { %798 = vperm.xlu1 %3665, %v496_v4   ;;  %793 = vperm.xlu0 %3664, %v495_v5   ;;  %v1836_v4 = vld [vmem:[%s4717_s4 + $0xe8] sm:$0xff]  ;;  %v1835_v5 = vld [vmem:[%s4717_s4 + $0xe0] sm:$0xff] }
  0x85   : > { %808 = vperm.xlu1 %3665, %v498_v7   ;;  %803 = vperm.xlu0 %3664, %v497_v9   ;;  %v1838_v9 = vld [vmem:[%s4717_s4 + $0xf8] sm:$0xff] }
  0x86   : > { %3374 = vmatmul.mubr.msk.bf16.gmra.mrb[40].mxu0 %vm1101_vm0, %v3688_v12 }
  0x87   : > { %1340 = vmatprep.mubr.bf16.mxu0 %v3886_v8 }
  0x89   : > { %818 = vperm.xlu1 %3665, %v500_v10   ;;  %813 = vperm.xlu0 %3664, %v499_v11   ;;  %v1837_v10 = vld [vmem:[%s4717_s4 + $0xf0] sm:$0xff] }
  0x8a   : > { %v3700_v11 = vld [vmem:[%s4715_s2 + $0xb0] sm:$0xff]  }
  0x8d   : > { %828 = vperm.xlu1 %3665, %v502_v13   ;;  %823 = vperm.xlu0 %3664, %v501_v14   ;;  %v2818_v13 = vld [vmem:[%s4719_s6 + $0x8] sm:$0xff]  ;;  %v2817_v14 = vld [vmem:[%s4719_s6] sm:$0xff] }
  0x8e   : > { %3375 = vmatmul.mubr.msk.bf16.gmra.mrb[44].mxu0 %vm1101_vm0, %v3689_v17  ;;  %v2819_v17 = vld [vmem:[%s4719_s6 + $0x10] sm:$0xff] }
  0x8f   : > { %1350 = vmatprep.mubr.bf16.mxu0 %v3886_v8 }
  0x91   : > { %838 = vperm.xlu1 %3665, %v504_v15   ;;  %833 = vperm.xlu0 %3664, %v503_v16   ;;  %v2820_v16 = vld [vmem:[%s4719_s6 + $0x18] sm:$0xff] }
  0x95   : > { %848 = vperm.xlu1 %3665, %v506_v18   ;;  %843 = vperm.xlu0 %3664, %v505_v19   ;;  %v3701_v18 = vld [vmem:[%s4715_s2 + $0xb8] sm:$0xff]  }
  0x96   : > { %3376 = vmatmul.mubr.msk.bf16.gmra.mrb[48].mxu0 %vm1101_vm0, %v3690_v22  ;;  %v2821_v22 = vld [vmem:[%s4719_s6 + $0x20] sm:$0xff] }
  0x97   : > { %1360 = vmatprep.mubr.bf16.mxu0 %v3886_v8 }
  0x99   : > { %858 = vperm.xlu1 %3665, %v508_v20   ;;  %853 = vperm.xlu0 %3664, %v507_v21   ;;  %v2822_v21 = vld [vmem:[%s4719_s6 + $0x28] sm:$0xff] }
  0x9d   : > { %868 = vperm.xlu1 %3665, %v510_v23   ;;  %863 = vperm.xlu0 %3664, %v509_v24   ;;  %v2824_v24 = vld [vmem:[%s4719_s6 + $0x38] sm:$0xff] }
  0x9e   : > { %3377 = vmatmul.mubr.msk.bf16.gmra.mrb[52].mxu0 %vm1101_vm0, %v3691_v27 }
  0x9f   : > { %1370 = vmatprep.mubr.bf16.mxu0 %v3886_v8 }
  0xa1   : > { %878 = vperm.xlu1 %3665, %v512_v25   ;;  %873 = vperm.xlu0 %3664, %v511_v26   ;;  %v2823_v25 = vld [vmem:[%s4719_s6 + $0x30] sm:$0xff]  ;;  %v3702_v26 = vld [vmem:[%s4715_s2 + $0xc0] sm:$0xff]  }
  0xa5   : > { %888 = vperm.xlu1 %3665, %v514_v28   ;;  %883 = vperm.xlu0 %3664, %v513_v29   ;;  %v2826_v28 = vld [vmem:[%s4719_s6 + $0x48] sm:$0xff]  ;;  %v2825_v29 = vld [vmem:[%s4719_s6 + $0x40] sm:$0xff] }
  0xa6   : > { %3378 = vmatmul.mubr.msk.bf16.gmra.mrb[56].mxu0 %vm1101_vm0, %v3692_v32  ;;  %v2828_v32 = vld [vmem:[%s4719_s6 + $0x58] sm:$0xff] }
  0xa7   : > { %1380 = vmatprep.mubr.bf16.mxu0 %v3886_v8 }
  0xa9   : > { %898 = vperm.xlu1 %3665, %v516_v30   ;;  %893 = vperm.xlu0 %3664, %v515_v31  }
  0xac   : > { %v4276_v6 = vpop.permute.xlu0 %583  ;;  %v4279_v7 = vpop.permute.xlu1 %593 }
  0xad   : > { %1846 = vperm.xlu1 %3665, %v1808_v33   ;;  %1841 = vperm.xlu0 %3664, %v1807_v34   ;;  %v2827_v33 = vld [vmem:[%s4719_s6 + $0x50] sm:$0xff]  ;;  %v3703_v34 = vld [vmem:[%s4715_s2 + $0xc8] sm:$0xff]  }
  0xae   : > { %3379 = vmatmul.mubr.msk.bf16.gmra.mrb[60].mxu0 %vm1101_vm0, %v3693_v37  ;;  %v2829_v37 = vld [vmem:[%s4719_s6 + $0x60] sm:$0xff] }
  0xaf   : > { %1390 = vmatprep.mubr.bf16.mxu0 %v3886_v8 }
  0xb0   : > { %v4290_v12 = vpop.permute.xlu0 %588  ;;  %v4299_v15 = vpop.permute.xlu1 %598 }
  0xb1   : > { %1856 = vperm.xlu1 %3665, %v1810_v35   ;;  %1851 = vperm.xlu0 %3664, %v1809_v36   ;;  %v2830_v36 = vld [vmem:[%s4719_s6 + $0x68] sm:$0xff] }
  0xb4   : > { %v4311_v19 = vpop.permute.xlu0 %603  ;;  %v4313_v20 = vpop.permute.xlu1 %608 }
  0xb5   : > { %1866 = vperm.xlu1 %3665, %v1812_v38   ;;  %1861 = vperm.xlu0 %3664, %v1811_v39   ;;  %v2832_v39 = vld [vmem:[%s4719_s6 + $0x78] sm:$0xff] }
  0xb6   : > { %3380 = vmatmul.mubr.msk.bf16.gmra.mrb[64].mxu0 %vm1101_vm0, %v3694_v42 }
  0xb7   : > { %1400 = vmatprep.mubr.bf16.mxu0 %v3886_v8 }
  0xb8   : > { %v4323_v23 = vpop.permute.xlu0 %613  ;;  %v4334_v27 = vpop.permute.xlu1 %618 }
  0xb9   : > { %1876 = vperm.xlu1 %3665, %v1814_v40   ;;  %1871 = vperm.xlu0 %3664, %v1813_v41   ;;  %v2831_v40 = vld [vmem:[%s4719_s6 + $0x70] sm:$0xff] }
  0xba   : > { %v3704_v41 = vld [vmem:[%s4715_s2 + $0xd0] sm:$0xff]  }
  0xbc   : > { %v4343_v30 = vpop.permute.xlu0 %623  ;;  %v4346_v31 = vpop.permute.xlu1 %628 }
  0xbd   : > { %1886 = vperm.xlu1 %3665, %v1816_v43   ;;  %1881 = vperm.xlu0 %3664, %v1815_v44   ;;  %v3155_v44 = vld [vmem:[%s4721_s8] sm:$0xff] }
  0xbe   : > { %3381 = vmatmul.mubr.msk.bf16.gmra.mrb[68].mxu0 %vm1101_vm0, %v3695_v47 }
  0xbf   : > { %1410 = vmatprep.mubr.bf16.mxu0 %v3886_v8 }
  0xc0   : > { %v4357_v35 = vpop.permute.xlu0 %633  ;;  %v4366_v38 = vpop.permute.xlu1 %638 }
  0xc1   : > { %1896 = vperm.xlu1 %3665, %v1818_v45   ;;  %1891 = vperm.xlu0 %3664, %v1817_v46  }
  0xc4   : > { %v4378_v42 = vpop.permute.xlu0 %643  ;;  %v4380_v43 = vpop.permute.xlu1 %648 }
  0xc5   : > { %1906 = vperm.xlu1 %3665, %v1820_v48   ;;  %1901 = vperm.xlu0 %3664, %v1819_v49   ;;  %v3705_v49 = vld [vmem:[%s4715_s2 + $0xd8] sm:$0xff]  }
  0xc6   : > { %3382 = vmatmul.mubr.msk.bf16.gmra.mrb[72].mxu0 %vm1101_vm0, %v3696_v52 }
  0xc7   : > { %1420 = vmatprep.mubr.bf16.mxu0 %v3886_v8 }
  0xc8   : > { %v4387_v45 = vpop.permute.xlu0 %653 }
  0xc9   : > { %1916 = vperm.xlu1 %3665, %v1822_v50   ;;  %1911 = vperm.xlu0 %3664, %v1821_v51  }
  0xcd   : > { %1926 = vperm.xlu1 %3665, %v1824_v53   ;;  %1921 = vperm.xlu0 %3664, %v1823_v54   ;;  %v3712_v54 = vld [vmem:[%s4716_s3 + $0x4] ss:$16 sps:$4 sm:$0xff]  }
  0xce   : > { %3383 = vmatmul.mubr.msk.bf16.gmra.mrb[76].mxu0 %vm1101_vm0, %v3697_v57  ;;  %2351 = vmatprep.mubr.bf16.mxu1 %v3712_v54 }
  0xcf   : > { %1430 = vmatprep.mubr.bf16.mxu0 %v3886_v8 }
  0xd1   : > { %1936 = vperm.xlu1 %3665, %v1826_v55   ;;  %1931 = vperm.xlu0 %3664, %v1825_v56  }
  0xd5   : > { %1946 = vperm.xlu1 %3665, %v1828_v58   ;;  %1941 = vperm.xlu0 %3664, %v1827_v59  }
  0xd6   : > { %3384 = vmatmul.mubr.msk.bf16.gmra.mrb[80].mxu0 %vm1101_vm0, %v3698_v62 }
  0xd7   : > { %1440 = vmatprep.mubr.bf16.mxu0 %v3886_v8 }
  0xd9   : > { %1956 = vperm.xlu1 %3665, %v1830_v60   ;;  %1951 = vperm.xlu0 %3664, %v1829_v61  }
  0xdd   : > { %1966 = vperm.xlu1 %3665, %v1832_v63   ;;  %1961 = vperm.xlu0 %3664, %v1831_v0  }
  0xde   : > { %3385 = vmatmul.mubr.msk.bf16.gmra.mrb[84].mxu0 %vm1101_vm0, %v3699_v3 }
  0xdf   : > { %1450 = vmatprep.mubr.bf16.mxu0 %v3886_v8 }
  0xe1   : > { %1976 = vperm.xlu1 %3665, %v1834_v1   ;;  %1971 = vperm.xlu0 %3664, %v1833_v2   ;;  %v3706_v1 = vld [vmem:[%s4715_s2 + $0xe0] sm:$0xff]  }
  0xe5   : > { %1986 = vperm.xlu1 %3665, %v1836_v4   ;;  %1981 = vperm.xlu0 %3664, %v1835_v5  }
  0xe6   : > { %3386 = vmatmul.mubr.msk.bf16.gmra.mrb[88].mxu0 %vm1101_vm0, %v3700_v11 }
  0xe7   : > { %1460 = vmatprep.mubr.bf16.mxu0 %v3886_v8 }
  0xe9   : > { %1996 = vperm.xlu1 %3665, %v1838_v9   ;;  %1991 = vperm.xlu0 %3664, %v1837_v10  }
  0xed   : > { %2840 = vperm.xlu1 %3665, %v2818_v13   ;;  %2835 = vperm.xlu0 %3664, %v2817_v14  }
  0xee   : > { %3387 = vmatmul.mubr.msk.bf16.gmra.mrb[92].mxu0 %vm1101_vm0, %v3701_v18  ;;  %v3707_v18 = vld [vmem:[%s4715_s2 + $0xe8] sm:$0xff]  }
  0xef   : > { %1470 = vmatprep.mubr.bf16.mxu0 %v3886_v8 }
  0xf1   : > { %2850 = vperm.xlu1 %3665, %v2820_v16   ;;  %2845 = vperm.xlu0 %3664, %v2819_v17  }
  0xf5   : > { %2860 = vperm.xlu1 %3665, %v2822_v21   ;;  %2855 = vperm.xlu0 %3664, %v2821_v22  }
  0xf6   : > { %3388 = vmatmul.mubr.msk.bf16.gmra.mrb[96].mxu0 %vm1101_vm0, %v3702_v26 }
  0xf7   : > { %1480 = vmatprep.mubr.bf16.mxu0 %v3886_v8 }
  0xf9   : > { %2870 = vperm.xlu1 %3665, %v2824_v24   ;;  %2865 = vperm.xlu0 %3664, %v2823_v25  }
  0xfd   : > { %2880 = vperm.xlu1 %3665, %v2826_v28   ;;  %2875 = vperm.xlu0 %3664, %v2825_v29  }
  0xfe   : > { %3389 = vmatmul.mubr.msk.bf16.gmra.mrb[100].mxu0 %vm1101_vm0, %v3703_v34 }
  0xff   : > { %1490 = vmatprep.mubr.bf16.mxu0 %v3886_v8 }
 0x101   : > { %2890 = vperm.xlu1 %3665, %v2828_v32   ;;  %2885 = vperm.xlu0 %3664, %v2827_v33  }
 0x105   : > { %2900 = vperm.xlu1 %3665, %v2830_v36   ;;  %2895 = vperm.xlu0 %3664, %v2829_v37  }
 0x106   : > { %3390 = vmatmul.mubr.msk.bf16.gmra.mrb[104].mxu0 %vm1101_vm0, %v3704_v41 }
 0x107   : > { %1500 = vmatprep.mubr.bf16.mxu0 %v3886_v8 }
 0x109   : > { %2910 = vperm.xlu1 %3665, %v2832_v39   ;;  %2905 = vperm.xlu0 %3664, %v2831_v40   ;;  %v1232_v46 = vpop.f32.mrb[0].mxu0  ;;  %v3708_v39 = vld [vmem:[%s4715_s2 + $0xf0] sm:$0xff]  }
 0x10a   : > { %v1233_v47 = vadd.f32 %v1232_v46, %v4276_v6  ;;  %v1234_v48 = vpop.f32.mrb[1].mxu0 }
 0x10b   : > { %v1236_v50 = vpop.f32.mrb[2].mxu0  ;;  %v1235_v51 = vadd.f32 %v1234_v48, %v4276_v6 }
 0x10c   : > { %v1237_v52 = vadd.f32 %v1236_v50, %v4290_v12  ;;  %v1238_v53 = vpop.f32.mrb[3].mxu0  ;;  %v1551_v55 = vmax.f32 %v1233_v47, 0.0 }
 0x10d   : > { %3158 = vperm.xlu0 %3664, %v3155_v44   ;;  %v1239_v57 = vadd.f32 %v1238_v53, %v4290_v12  ;;  %v1552_v58 = vmax.f32 %v1235_v51, 0.0 }
 0x10e   : > { %v1553_v56 = vmax.f32 %v1237_v52, 0.0  ;;  %3391 = vmatmul.mubr.msk.bf16.gmra.mrb[108].mxu0 %vm1101_vm0, %v3705_v49 }
 0x10f   : > { %1510 = vmatprep.mubr.bf16.mxu0 %v3886_v8  ;;  %v1554_v59 = vmax.f32 %v1239_v57, 0.0 }
 0x110   : > { %v1743_v60 = vpack.c.bf16 %v1553_v56, %v1551_v55  ;;  %v3709_v55 = vld [vmem:[%s4715_s2 + $0xf8] sm:$0xff]  }
 0x111   : > { %v1242_v61 = vpop.f32.mrb[4].mxu0  ;;  %v1744_v0 = vpack.c.bf16 %v1554_v59, %v1552_v58 }
 0x112   : > { %v1243_v62 = vadd.f32 %v1242_v61, %v4279_v7  ;;  %v1244_v63 = vpop.f32.mrb[5].mxu0 }
 0x113   : > { %v1246_v2 = vpop.f32.mrb[6].mxu0  ;;  %v1245_v3 = vadd.f32 %v1244_v63, %v4279_v7  ;;  %2319 = vmatprep.subr.bf16.mxu1 %v1744_v0 }
 0x114   : > { %v1247_v4 = vadd.f32 %v1246_v2, %v4299_v15  ;;  %v1248_v5 = vpop.f32.mrb[7].mxu0  ;;  %2320 = vmatpush1.bf16.msra.mxu1 %v1743_v60  ;;  %v1555_v6 = vmax.f32 %v1243_v62, 0.0 }
 0x115   : > { %v1249_v10 = vadd.f32 %v1248_v5, %v4299_v15  ;;  %v1556_v11 = vmax.f32 %v1245_v3, 0.0 }
 0x116   : > { %v1557_v9 = vmax.f32 %v1247_v4, 0.0  ;;  %3392 = vmatmul.mubr.msk.bf16.gmra.mrb[112].mxu0 %vm1101_vm0, %v3706_v1 }
 0x117   : > { %1520 = vmatprep.mubr.bf16.mxu0 %v3886_v8  ;;  %v1558_v13 = vmax.f32 %v1249_v10, 0.0 }
 0x118   : > { %v1745_v12 = vpack.c.bf16 %v1557_v9, %v1555_v6 }
 0x119   : > { %v1252_v14 = vpop.f32.mrb[8].mxu0  ;;  %v1746_v16 = vpack.c.bf16 %v1558_v13, %v1556_v11 }
 0x11a   : > { %v1253_v7 = vadd.f32 %v1252_v14, %v4311_v19  ;;  %v1254_v17 = vpop.f32.mrb[9].mxu0 }
 0x11b   : > { %v1256_v21 = vpop.f32.mrb[10].mxu0  ;;  %v1255_v22 = vadd.f32 %v1254_v17, %v4311_v19  ;;  %2321 = vmatprep.subr.bf16.mxu1 %v1746_v16 }
 0x11c   : > { %v1257_v15 = vadd.f32 %v1256_v21, %v4313_v20  ;;  %v1258_v24 = vpop.f32.mrb[11].mxu0  ;;  %2322 = vmatpush1.bf16.msra.mxu1 %v1745_v12  ;;  %v1559_v25 = vmax.f32 %v1253_v7, 0.0 }
 0x11d   : > { %v1259_v28 = vadd.f32 %v1258_v24, %v4313_v20  ;;  %v1560_v29 = vmax.f32 %v1255_v22, 0.0 }
 0x11e   : > { %v1561_v26 = vmax.f32 %v1257_v15, 0.0  ;;  %3393 = vmatmul.mubr.msk.bf16.gmra.mrb[116].mxu0 %vm1101_vm0, %v3707_v18 }
 0x11f   : > { %1530 = vmatprep.mubr.bf16.mxu0 %v3886_v8  ;;  %v1562_v33 = vmax.f32 %v1259_v28, 0.0 }
 0x120   : > { %v1747_v32 = vpack.c.bf16 %v1561_v26, %v1559_v25 }
 0x121   : > { %v1262_v34 = vpop.f32.mrb[12].mxu0  ;;  %v1748_v36 = vpack.c.bf16 %v1562_v33, %v1560_v29 }
 0x122   : > { %v1263_v19 = vadd.f32 %v1262_v34, %v4323_v23  ;;  %v1264_v37 = vpop.f32.mrb[13].mxu0 }
 0x123   : > { %v1266_v40 = vpop.f32.mrb[14].mxu0  ;;  %v1265_v41 = vadd.f32 %v1264_v37, %v4323_v23  ;;  %2323 = vmatprep.subr.bf16.mxu1 %v1748_v36 }
 0x124   : > { %v1267_v20 = vadd.f32 %v1266_v40, %v4334_v27  ;;  %v1268_v44 = vpop.f32.mrb[15].mxu0  ;;  %2324 = vmatpush1.bf16.msra.mxu1 %v1747_v32  ;;  %v1563_v46 = vmax.f32 %v1263_v19, 0.0  ;;  %v659_v19 = vpop.permute.xlu1 %658 }
 0x125   : > { %v1269_v48 = vadd.f32 %v1268_v44, %v4334_v27  ;;  %v1564_v49 = vmax.f32 %v1265_v41, 0.0 }
 0x126   : > { %v1565_v47 = vmax.f32 %v1267_v20, 0.0  ;;  %3394 = vmatmul.mubr.msk.bf16.gmra.mrb[120].mxu0 %vm1101_vm0, %v3708_v39 }
 0x127   : > { %1540 = vmatprep.mubr.bf16.mxu0 %v3886_v8  ;;  %v1566_v51 = vmax.f32 %v1269_v48, 0.0  ;;  %v664_v48 = vpop.permute.xlu0 %663 }
 0x128   : > { %v1749_v50 = vpack.c.bf16 %v1565_v47, %v1563_v46 }
 0x129   : > { %v1272_v52 = vpop.f32.mrb[16].mxu0  ;;  %v1750_v53 = vpack.c.bf16 %v1566_v51, %v1564_v49 }
 0x12a   : > { %v1273_v23 = vadd.f32 %v1272_v52, %v4343_v30  ;;  %v1274_v54 = vpop.f32.mrb[17].mxu0 }
 0x12b   : > { %v1276_v56 = vpop.f32.mrb[18].mxu0  ;;  %v1275_v57 = vadd.f32 %v1274_v54, %v4343_v30  ;;  %2325 = vmatprep.subr.bf16.mxu1 %v1750_v53  ;;  %v669_v53 = vpop.permute.xlu1 %668 }
 0x12c   : > { %v1277_v27 = vadd.f32 %v1276_v56, %v4346_v31  ;;  %v1278_v58 = vpop.f32.mrb[19].mxu0  ;;  %2326 = vmatpush1.bf16.msra.mxu1 %v1749_v50  ;;  %v1567_v59 = vmax.f32 %v1273_v23, 0.0 }
 0x12d   : > { %v1279_v61 = vadd.f32 %v1278_v58, %v4346_v31  ;;  %v1568_v62 = vmax.f32 %v1275_v57, 0.0 }
 0x12e   : > { %v1569_v60 = vmax.f32 %v1277_v27, 0.0  ;;  %3395 = vmatmul.mubr.msk.bf16.gmra.mrb[124].mxu0 %vm1101_vm0, %v3709_v55 }
 0x12f   : > { %v1570_v0 = vmax.f32 %v1279_v61, 0.0  ;;  %v674_v61 = vpop.permute.xlu0 %673 }
 0x130   : > { %v1751_v63 = vpack.c.bf16 %v1569_v60, %v1567_v59 }
 0x131   : > { %v1282_v1 = vpop.f32.mrb[20].mxu0  ;;  %v1752_v2 = vpack.c.bf16 %v1570_v0, %v1568_v62 }
 0x132   : > { %v1283_v3 = vadd.f32 %v1282_v1, %v4357_v35  ;;  %v1284_v4 = vpop.f32.mrb[21].mxu0 }
 0x133   : > { %v1286_v30 = vpop.f32.mrb[22].mxu0  ;;  %v1285_v5 = vadd.f32 %v1284_v4, %v4357_v35  ;;  %2327 = vmatprep.subr.bf16.mxu1 %v1752_v2  ;;  %v679_v2 = vpop.permute.xlu1 %678 }
 0x134   : > { %v1287_v6 = vadd.f32 %v1286_v30, %v4366_v38  ;;  %v1288_v9 = vpop.f32.mrb[23].mxu0  ;;  %2328 = vmatpush1.bf16.msra.mxu1 %v1751_v63  ;;  %v1571_v10 = vmax.f32 %v1283_v3, 0.0 }
 0x135   : > { %v1289_v11 = vadd.f32 %v1288_v9, %v4366_v38  ;;  %v1572_v12 = vmax.f32 %v1285_v5, 0.0 }
 0x136   : > { %v1573_v31 = vmax.f32 %v1287_v6, 0.0 }
 0x137   : > { %v1574_v14 = vmax.f32 %v1289_v11, 0.0 }
 0x138   : > { %v1753_v13 = vpack.c.bf16 %v1573_v31, %v1571_v10 }
 0x139   : > { %v1292_v16 = vpop.f32.mrb[24].mxu0  ;;  %v1754_v7 = vpack.c.bf16 %v1574_v14, %v1572_v12 }
 0x13a   : > { %v1293_v17 = vadd.f32 %v1292_v16, %v4378_v42  ;;  %v1294_v18 = vpop.f32.mrb[25].mxu0 }
 0x13b   : > { %v1296_v21 = vpop.f32.mrb[26].mxu0  ;;  %v1295_v35 = vadd.f32 %v1294_v18, %v4378_v42  ;;  %2329 = vmatprep.subr.bf16.mxu1 %v1754_v7  ;;  %v689_v18 = vpop.permute.xlu1 %688 }
 0x13c   : > { %v1297_v22 = vadd.f32 %v1296_v21, %v4380_v43  ;;  %v1298_v15 = vpop.f32.mrb[27].mxu0  ;;  %2330 = vmatpush1.bf16.msra.mxu1 %v1753_v13  ;;  %v1575_v24 = vmax.f32 %v1293_v17, 0.0  ;;  %v684_v13 = vpop.permute.xlu0 %683 }
 0x13d   : > { %v1299_v38 = vadd.f32 %v1298_v15, %v4380_v43  ;;  %v1576_v26 = vmax.f32 %v1295_v35, 0.0 }
 0x13e   : > { %v1577_v25 = vmax.f32 %v1297_v22, 0.0 }
 0x13f   : > { %v1578_v29 = vmax.f32 %v1299_v38, 0.0 }
 0x140   : > { %v1755_v28 = vpack.c.bf16 %v1577_v25, %v1575_v24 }
 0x141   : > { %v1302_v32 = vpop.f32.mrb[28].mxu0  ;;  %v1756_v33 = vpack.c.bf16 %v1578_v29, %v1576_v26 }
 0x142   : > { %v1303_v34 = vadd.f32 %v1302_v32, %v4387_v45  ;;  %v1304_v36 = vpop.f32.mrb[29].mxu0  ;;  %v694_v32 = vpop.permute.xlu0 %693 }
 0x143   : > { %v1306_v37 = vpop.f32.mrb[30].mxu0  ;;  %v1305_v42 = vadd.f32 %v1304_v36, %v4387_v45  ;;  %2331 = vmatprep.subr.bf16.mxu1 %v1756_v33 }
 0x144   : > { %v1307_v39 = vadd.f32 %v1306_v37, %v659_v19  ;;  %v1308_v40 = vpop.f32.mrb[31].mxu0  ;;  %2332 = vmatpush1.bf16.msra.mxu1 %v1755_v28  ;;  %v1579_v41 = vmax.f32 %v1303_v34, 0.0  ;;  %v699_v37 = vpop.permute.xlu1 %698 }
 0x145   : > { %v1309_v44 = vadd.f32 %v1308_v40, %v659_v19  ;;  %v1580_v43 = vmax.f32 %v1305_v42, 0.0 }
 0x146   : > { %v1581_v20 = vmax.f32 %v1307_v39, 0.0 }
 0x147   : > { %v1582_v47 = vmax.f32 %v1309_v44, 0.0 }
 0x148   : > { %v1757_v46 = vpack.c.bf16 %v1581_v20, %v1579_v41 }
 0x149   : > { %v1312_v49 = vpop.f32.mrb[32].mxu0  ;;  %v1758_v50 = vpack.c.bf16 %v1582_v47, %v1580_v43 }
 0x14a   : > { %v1313_v51 = vadd.f32 %v1312_v49, %v664_v48  ;;  %v1314_v52 = vpop.f32.mrb[33].mxu0  ;;  %v704_v49 = vpop.permute.xlu0 %703 }
 0x14b   : > { %v1316_v23 = vpop.f32.mrb[34].mxu0  ;;  %v1315_v54 = vadd.f32 %v1314_v52, %v664_v48  ;;  %2333 = vmatprep.subr.bf16.mxu1 %v1758_v50 }
 0x14c   : > { %v1317_v55 = vadd.f32 %v1316_v23, %v669_v53  ;;  %v1318_v45 = vpop.f32.mrb[35].mxu0  ;;  %2334 = vmatpush1.bf16.msra.mxu1 %v1757_v46  ;;  %v1583_v56 = vmax.f32 %v1313_v51, 0.0  ;;  %v709_v23 = vpop.permute.xlu1 %708 }
 0x14d   : > { %v1319_v27 = vadd.f32 %v1318_v45, %v669_v53  ;;  %v1584_v58 = vmax.f32 %v1315_v54, 0.0 }
 0x14e   : > { %v1585_v57 = vmax.f32 %v1317_v55, 0.0 }
 0x14f   : > { %v1586_v60 = vmax.f32 %v1319_v27, 0.0 }
 0x150   : > { %v1759_v59 = vpack.c.bf16 %v1585_v57, %v1583_v56 }
 0x151   : > { %v1322_v62 = vpop.f32.mrb[36].mxu0  ;;  %v1760_v63 = vpack.c.bf16 %v1586_v60, %v1584_v58 }
 0x152   : > { %v1323_v0 = vadd.f32 %v1322_v62, %v674_v61  ;;  %v1324_v1 = vpop.f32.mrb[37].mxu0  ;;  %v714_v62 = vpop.permute.xlu0 %713 }
 0x153   : > { %v1326_v3 = vpop.f32.mrb[38].mxu0  ;;  %v1325_v4 = vadd.f32 %v1324_v1, %v674_v61  ;;  %2335 = vmatprep.subr.bf16.mxu1 %v1760_v63 }
 0x154   : > { %v1327_v30 = vadd.f32 %v1326_v3, %v679_v2  ;;  %v1328_v5 = vpop.f32.mrb[39].mxu0  ;;  %2336 = vmatpush1.bf16.msra.mxu1 %v1759_v59  ;;  %v1587_v6 = vmax.f32 %v1323_v0, 0.0  ;;  %v719_v3 = vpop.permute.xlu1 %718 }
 0x155   : > { %v1329_v10 = vadd.f32 %v1328_v5, %v679_v2  ;;  %v1588_v31 = vmax.f32 %v1325_v4, 0.0 }
 0x156   : > { %v1589_v9 = vmax.f32 %v1327_v30, 0.0 }
 0x157   : > { %v1590_v12 = vmax.f32 %v1329_v10, 0.0 }
 0x158   : > { %v1761_v11 = vpack.c.bf16 %v1589_v9, %v1587_v6 }
 0x159   : > { %v1332_v14 = vpop.f32.mrb[40].mxu0  ;;  %v1762_v16 = vpack.c.bf16 %v1590_v12, %v1588_v31 }
 0x15a   : > { %v1333_v7 = vadd.f32 %v1332_v14, %v684_v13  ;;  %v1334_v17 = vpop.f32.mrb[41].mxu0  ;;  %v724_v14 = vpop.permute.xlu0 %723 }
 0x15b   : > { %v1336_v21 = vpop.f32.mrb[42].mxu0  ;;  %v1335_v35 = vadd.f32 %v1334_v17, %v684_v13  ;;  %2337 = vmatprep.subr.bf16.mxu1 %v1762_v16 }
 0x15c   : > { %v1337_v22 = vadd.f32 %v1336_v21, %v689_v18  ;;  %v1338_v15 = vpop.f32.mrb[43].mxu0  ;;  %2338 = vmatpush1.bf16.msra.mxu1 %v1761_v11  ;;  %v1591_v24 = vmax.f32 %v1333_v7, 0.0  ;;  %v729_v21 = vpop.permute.xlu1 %728 }
 0x15d   : > { %v1339_v38 = vadd.f32 %v1338_v15, %v689_v18  ;;  %v1592_v26 = vmax.f32 %v1335_v35, 0.0 }
 0x15e   : > { %v1593_v25 = vmax.f32 %v1337_v22, 0.0 }
 0x15f   : > { %v1594_v29 = vmax.f32 %v1339_v38, 0.0 }
 0x160   : > { %v1763_v28 = vpack.c.bf16 %v1593_v25, %v1591_v24 }
 0x161   : > { %v1342_v33 = vpop.f32.mrb[44].mxu0  ;;  %v1764_v34 = vpack.c.bf16 %v1594_v29, %v1592_v26 }
 0x162   : > { %v1343_v36 = vadd.f32 %v1342_v33, %v694_v32  ;;  %v1344_v19 = vpop.f32.mrb[45].mxu0  ;;  %v734_v33 = vpop.permute.xlu0 %733 }
 0x163   : > { %v1346_v42 = vpop.f32.mrb[46].mxu0  ;;  %v1345_v39 = vadd.f32 %v1344_v19, %v694_v32  ;;  %2339 = vmatprep.subr.bf16.mxu1 %v1764_v34 }
 0x164   : > { %v1347_v40 = vadd.f32 %v1346_v42, %v699_v37  ;;  %v1348_v41 = vpop.f32.mrb[47].mxu0  ;;  %2340 = vmatpush1.bf16.msra.mxu1 %v1763_v28  ;;  %v1595_v20 = vmax.f32 %v1343_v36, 0.0  ;;  %v739_v42 = vpop.permute.xlu1 %738 }
 0x165   : > { %v1349_v43 = vadd.f32 %v1348_v41, %v699_v37  ;;  %v1596_v46 = vmax.f32 %v1345_v39, 0.0 }
 0x166   : > { %v1597_v44 = vmax.f32 %v1347_v40, 0.0 }
 0x167   : > { %v1598_v48 = vmax.f32 %v1349_v43, 0.0 }
 0x168   : > { %v1765_v47 = vpack.c.bf16 %v1597_v44, %v1595_v20 }
 0x169   : > { %v1352_v50 = vpop.f32.mrb[48].mxu0  ;;  %v1766_v51 = vpack.c.bf16 %v1598_v48, %v1596_v46 }
 0x16a   : > { %v1353_v52 = vadd.f32 %v1352_v50, %v704_v49  ;;  %v1354_v53 = vpop.f32.mrb[49].mxu0  ;;  %v744_v50 = vpop.permute.xlu0 %743 }
 0x16b   : > { %v1356_v54 = vpop.f32.mrb[50].mxu0  ;;  %v1355_v55 = vadd.f32 %v1354_v53, %v704_v49  ;;  %2341 = vmatprep.subr.bf16.mxu1 %v1766_v51 }
 0x16c   : > { %v1357_v45 = vadd.f32 %v1356_v54, %v709_v23  ;;  %v1358_v56 = vpop.f32.mrb[51].mxu0  ;;  %2342 = vmatpush1.bf16.msra.mxu1 %v1765_v47  ;;  %v1599_v57 = vmax.f32 %v1353_v52, 0.0  ;;  %v749_v54 = vpop.permute.xlu1 %748 }
 0x16d   : > { %v1359_v58 = vadd.f32 %v1358_v56, %v709_v23  ;;  %v1600_v59 = vmax.f32 %v1355_v55, 0.0 }
 0x16e   : > { %v1601_v27 = vmax.f32 %v1357_v45, 0.0 }
 0x16f   : > { %v1602_v61 = vmax.f32 %v1359_v58, 0.0 }
 0x170   : > { %v1767_v60 = vpack.c.bf16 %v1601_v27, %v1599_v57  ;;  %v3710_v27 = vld [vmem:[%s4716_s3] ss:$16 sps:$4 sm:$0xff]  }
 0x171   : > { %v1362_v63 = vpop.f32.mrb[52].mxu0  ;;  %v1768_v0 = vpack.c.bf16 %v1602_v61, %v1600_v59  ;;  %v3713_v59 = vld [vmem:[%s4716_s3 + $0x24] ss:$16 sps:$4 sm:$0xff]  }
 0x172   : > { %v1363_v1 = vadd.f32 %v1362_v63, %v714_v62  ;;  %v1364_v2 = vpop.f32.mrb[53].mxu0 }
 0x173   : > { %v1366_v4 = vpop.f32.mrb[54].mxu0  ;;  %v1365_v30 = vadd.f32 %v1364_v2, %v714_v62  ;;  %2343 = vmatprep.subr.bf16.mxu1 %v1768_v0 }
 0x174   : > { %v1367_v5 = vadd.f32 %v1366_v4, %v719_v3  ;;  %v1368_v6 = vpop.f32.mrb[55].mxu0  ;;  %2344 = vmatpush1.bf16.msra.mxu1 %v1767_v60  ;;  %v1603_v9 = vmax.f32 %v1363_v1, 0.0  ;;  %v754_v1 = vpop.permute.xlu0 %753 }
 0x175   : > { %v1369_v31 = vadd.f32 %v1368_v6, %v719_v3  ;;  %v1604_v11 = vmax.f32 %v1365_v30, 0.0 }
 0x176   : > { %v1605_v10 = vmax.f32 %v1367_v5, 0.0  ;;  %v759_v5 = vpop.permute.xlu1 %758 }
 0x177   : > { %v1606_v13 = vmax.f32 %v1369_v31, 0.0 }
 0x178   : > { %v1769_v12 = vpack.c.bf16 %v1605_v10, %v1603_v9 }
 0x179   : > { %v1372_v16 = vpop.f32.mrb[56].mxu0  ;;  %v1770_v7 = vpack.c.bf16 %v1606_v13, %v1604_v11  ;;  %v3715_v11 = vld [vmem:[%s4716_s3 + $0x20] ss:$16 sps:$4 sm:$0xff]   ;;  %v3716_v13 = vld [vmem:[%s4716_s3 + $0x44] ss:$16 sps:$4 sm:$0xff]  }
 0x17a   : > { %v1373_v17 = vadd.f32 %v1372_v16, %v724_v14  ;;  %v1374_v18 = vpop.f32.mrb[57].mxu0 }
 0x17b   : > { %v1376_v35 = vpop.f32.mrb[58].mxu0  ;;  %v1375_v22 = vadd.f32 %v1374_v18, %v724_v14  ;;  %2345 = vmatprep.subr.bf16.mxu1 %v1770_v7 }
 0x17c   : > { %v1377_v15 = vadd.f32 %v1376_v35, %v729_v21  ;;  %v1378_v24 = vpop.f32.mrb[59].mxu0  ;;  %2346 = vmatpush1.bf16.msra.mxu1 %v1769_v12  ;;  %v1607_v25 = vmax.f32 %v1373_v17, 0.0 }
 0x17d   : > { %v1379_v26 = vadd.f32 %v1378_v24, %v729_v21  ;;  %v1608_v28 = vmax.f32 %v1375_v22, 0.0  ;;  %v764_v21 = vpop.permute.xlu0 %763 }
 0x17e   : > { %v1609_v38 = vmax.f32 %v1377_v15, 0.0 }
 0x17f   : > { %v1610_v32 = vmax.f32 %v1379_v26, 0.0 }
 0x180   : > { %v1771_v29 = vpack.c.bf16 %v1609_v38, %v1607_v25  ;;  %v769_v25 = vpop.permute.xlu1 %768 }
 0x181   : > { %v1382_v34 = vpop.f32.mrb[60].mxu0  ;;  %v1772_v36 = vpack.c.bf16 %v1610_v32, %v1608_v28  ;;  %v3718_v32 = vld [vmem:[%s4716_s3 + $0x40] ss:$16 sps:$4 sm:$0xff]  }
 0x182   : > { %v1383_v19 = vadd.f32 %v1382_v34, %v734_v33  ;;  %v1384_v37 = vpop.f32.mrb[61].mxu0  ;;  %v3719_v34 = vld [vmem:[%s4716_s3 + $0x64] ss:$16 sps:$4 sm:$0xff]  }
 0x183   : > { %v1386_v39 = vpop.f32.mrb[62].mxu0  ;;  %v1385_v40 = vadd.f32 %v1384_v37, %v734_v33  ;;  %2347 = vmatprep.subr.bf16.mxu1 %v1772_v36 }
 0x184   : > { %v1387_v41 = vadd.f32 %v1386_v39, %v739_v42  ;;  %v1388_v20 = vpop.f32.mrb[63].mxu0  ;;  %2348 = vmatpush1.bf16.msra.mxu1 %v1771_v29  ;;  %v1611_v44 = vmax.f32 %v1383_v19, 0.0 }
 0x185   : > { %v1389_v46 = vadd.f32 %v1388_v20, %v739_v42  ;;  %v1612_v47 = vmax.f32 %v1385_v40, 0.0  ;;  %v774_v40 = vpop.permute.xlu0 %773 }
 0x186   : > { %v1613_v43 = vmax.f32 %v1387_v41, 0.0 }
 0x187   : > { %v1614_v49 = vmax.f32 %v1389_v46, 0.0  ;;  %v779_v46 = vpop.permute.xlu1 %778 }
 0x188   : > { %v1773_v48 = vpack.c.bf16 %v1613_v43, %v1611_v44 }
 0x189   : > { %v1392_v51 = vpop.f32.mrb[64].mxu0  ;;  %v1774_v52 = vpack.c.bf16 %v1614_v49, %v1612_v47 }
 0x18a   : > { %v1393_v53 = vadd.f32 %v1392_v51, %v744_v50  ;;  %v1394_v23 = vpop.f32.mrb[65].mxu0  ;;  %v3721_v51 = vld [vmem:[%s4716_s3 + $0x60] ss:$16 sps:$4 sm:$0xff]  }
 0x18b   : > { %v1395_v55 = vadd.f32 %v1394_v23, %v744_v50  ;;  %v1396_v45 = vpop.f32.mrb[66].mxu0  ;;  %2349 = vmatprep.subr.bf16.mxu1 %v1774_v52 }
 0x18c   : > { %v1397_v56 = vadd.f32 %v1396_v45, %v749_v54  ;;  %v1398_v57 = vpop.f32.mrb[67].mxu0  ;;  %2350 = vmatpush1.bf16.msra.mxu1 %v1773_v48  ;;  %v1615_v60 = vmax.f32 %v1393_v53, 0.0  ;;  %v3722_v53 = vld [vmem:[%s4716_s3 + $0x84] ss:$16 sps:$4 sm:$0xff]  }
 0x18d   : > { %v1399_v58 = vadd.f32 %v1398_v57, %v749_v54  ;;  %v1616_v62 = vmax.f32 %v1395_v55, 0.0  ;;  %v784_v57 = vpop.permute.xlu0 %783 }
 0x18e   : > { %v1617_v61 = vmax.f32 %v1397_v56, 0.0 }
 0x18f   : > { %v1618_v63 = vmax.f32 %v1399_v58, 0.0  ;;  %2352 = vmatmul.mubr.bf16.vlgmr.msra.gmra.mrb[0].mxu1 %v3710_v27 }
 0x190   : > { %v1775_v0 = vpack.c.bf16 %v1617_v61, %v1615_v60  ;;  %2361 = vmatprep.mubr.bf16.mxu1 %v3713_v59  ;;  %v789_v61 = vpop.permute.xlu1 %788 }
 0x191   : > { %v1776_v2 = vpack.c.bf16 %v1618_v63, %v1616_v62  ;;  %v1402_v3 = vpop.f32.mrb[68].mxu0 }
 0x192   : > { %v1403_v4 = vadd.f32 %v1402_v3, %v754_v1  ;;  %v1404_v30 = vpop.f32.mrb[69].mxu0 }
 0x193   : > { %v1405_v6 = vadd.f32 %v1404_v30, %v754_v1  ;;  %v1406_v9 = vpop.f32.mrb[70].mxu0  ;;  %2512 = vmatprep.subr.bf16.mxu1 %v1776_v2  ;;  %v3724_v2 = vld [vmem:[%s4716_s3 + $0x80] ss:$16 sps:$4 sm:$0xff]  }
 0x194   : > { %v1407_v10 = vadd.f32 %v1406_v9, %v759_v5  ;;  %v1408_v31 = vpop.f32.mrb[71].mxu0  ;;  %2513 = vmatpush1.bf16.msra.mxu1 %v1775_v0  ;;  %v1619_v14 = vmax.f32 %v1403_v4, 0.0  ;;  %v3725_v4 = vld [vmem:[%s4716_s3 + $0xa4] ss:$16 sps:$4 sm:$0xff]  }
 0x195   : > { %v1409_v12 = vadd.f32 %v1408_v31, %v759_v5  ;;  %v1620_v7 = vmax.f32 %v1405_v6, 0.0  ;;  %v794_v31 = vpop.permute.xlu0 %793 }
 0x196   : > { %v1621_v16 = vmax.f32 %v1407_v10, 0.0 }
 0x197   : > { %v1622_v17 = vmax.f32 %v1409_v12, 0.0  ;;  %2362 = vmatmul.mubr.bf16.gmra.mrb[4].mxu1 %v3715_v11 }
 0x198   : > { %v1777_v18 = vpack.c.bf16 %v1621_v16, %v1619_v14  ;;  %2371 = vmatprep.mubr.bf16.mxu1 %v3716_v13  ;;  %v799_v16 = vpop.permute.xlu1 %798 }
 0x199   : > { %v1778_v35 = vpack.c.bf16 %v1622_v17, %v1620_v7  ;;  %v1412_v22 = vpop.f32.mrb[72].mxu0 }
 0x19a   : > { %v1413_v15 = vadd.f32 %v1412_v22, %v764_v21  ;;  %v1414_v24 = vpop.f32.mrb[73].mxu0 }
 0x19b   : > { %v1415_v38 = vadd.f32 %v1414_v24, %v764_v21  ;;  %v1416_v26 = vpop.f32.mrb[74].mxu0  ;;  %2514 = vmatprep.subr.bf16.mxu1 %v1778_v35  ;;  %v3727_v35 = vld [vmem:[%s4716_s3 + $0xa0] ss:$16 sps:$4 sm:$0xff]  }
 0x19c   : > { %v1417_v28 = vadd.f32 %v1416_v26, %v769_v25  ;;  %v1418_v29 = vpop.f32.mrb[75].mxu0  ;;  %2515 = vmatpush1.bf16.msra.mxu1 %v1777_v18  ;;  %v1623_v36 = vmax.f32 %v1413_v15, 0.0  ;;  %v3728_v15 = vld [vmem:[%s4716_s3 + $0xc4] ss:$16 sps:$4 sm:$0xff]  }
 0x19d   : > { %v1419_v33 = vadd.f32 %v1418_v29, %v769_v25  ;;  %v1624_v37 = vmax.f32 %v1415_v38, 0.0  ;;  %v804_v29 = vpop.permute.xlu0 %803 }
 0x19e   : > { %v1625_v19 = vmax.f32 %v1417_v28, 0.0 }
 0x19f   : > { %v1626_v42 = vmax.f32 %v1419_v33, 0.0  ;;  %2372 = vmatmul.mubr.bf16.gmra.mrb[8].mxu1 %v3718_v32 }
 0x1a0   : > { %v1779_v39 = vpack.c.bf16 %v1625_v19, %v1623_v36  ;;  %2381 = vmatprep.mubr.bf16.mxu1 %v3719_v34  ;;  %v809_v19 = vpop.permute.xlu1 %808 }
 0x1a1   : > { %v1780_v41 = vpack.c.bf16 %v1626_v42, %v1624_v37  ;;  %v1422_v20 = vpop.f32.mrb[76].mxu0 }
 0x1a2   : > { %v1423_v44 = vadd.f32 %v1422_v20, %v774_v40  ;;  %v1424_v43 = vpop.f32.mrb[77].mxu0 }
 0x1a3   : > { %v1425_v47 = vadd.f32 %v1424_v43, %v774_v40  ;;  %v1426_v48 = vpop.f32.mrb[78].mxu0  ;;  %2516 = vmatprep.subr.bf16.mxu1 %v1780_v41  ;;  %v3730_v41 = vld [vmem:[%s4716_s3 + $0xc0] ss:$16 sps:$4 sm:$0xff]  }
 0x1a4   : > { %v1427_v49 = vadd.f32 %v1426_v48, %v779_v46  ;;  %v1428_v50 = vpop.f32.mrb[79].mxu0  ;;  %2517 = vmatpush1.bf16.msra.mxu1 %v1779_v39  ;;  %v1627_v23 = vmax.f32 %v1423_v44, 0.0  ;;  %v3731_v44 = vld [vmem:[%s4716_s3 + $0xe4] ss:$16 sps:$4 sm:$0xff]  }
 0x1a5   : > { %v1429_v52 = vadd.f32 %v1428_v50, %v779_v46  ;;  %v1628_v55 = vmax.f32 %v1425_v47, 0.0  ;;  %v814_v50 = vpop.permute.xlu0 %813 }
 0x1a6   : > { %v1629_v54 = vmax.f32 %v1427_v49, 0.0 }
 0x1a7   : > { %v1630_v45 = vmax.f32 %v1429_v52, 0.0  ;;  %2382 = vmatmul.mubr.bf16.gmra.mrb[12].mxu1 %v3721_v51 }
 0x1a8   : > { %v1781_v56 = vpack.c.bf16 %v1629_v54, %v1627_v23  ;;  %2391 = vmatprep.mubr.bf16.mxu1 %v3722_v53  ;;  %v819_v54 = vpop.permute.xlu1 %818 }
 0x1a9   : > { %v1782_v27 = vpack.c.bf16 %v1630_v45, %v1628_v55  ;;  %v1432_v58 = vpop.f32.mrb[80].mxu0 }
 0x1aa   : > { %v1433_v59 = vadd.f32 %v1432_v58, %v784_v57  ;;  %v1434_v60 = vpop.f32.mrb[81].mxu0 }
 0x1ab   : > { %v1435_v62 = vadd.f32 %v1434_v60, %v784_v57  ;;  %v1436_v63 = vpop.f32.mrb[82].mxu0  ;;  %2518 = vmatprep.subr.bf16.mxu1 %v1782_v27  ;;  %v3733_v27 = vld [vmem:[%s4716_s3 + $0xe0] ss:$16 sps:$4 sm:$0xff]  }
 0x1ac   : > { %v1437_v0 = vadd.f32 %v1436_v63, %v789_v61  ;;  %v1438_v1 = vpop.f32.mrb[83].mxu0  ;;  %2519 = vmatpush1.bf16.msra.mxu1 %v1781_v56  ;;  %v1631_v30 = vmax.f32 %v1433_v59, 0.0  ;;  %v3734_v59 = vld [vmem:[%s4716_s3 + $0x104] ss:$16 sps:$4 sm:$0xff]  }
 0x1ad   : > { %v1439_v3 = vadd.f32 %v1438_v1, %v789_v61  ;;  %v1632_v6 = vmax.f32 %v1435_v62, 0.0  ;;  %v824_v1 = vpop.permute.xlu0 %823 }
 0x1ae   : > { %v1633_v5 = vmax.f32 %v1437_v0, 0.0 }
 0x1af   : > { %v1634_v9 = vmax.f32 %v1439_v3, 0.0  ;;  %2392 = vmatmul.mubr.bf16.gmra.mrb[16].mxu1 %v3724_v2 }
 0x1b0   : > { %v1783_v10 = vpack.c.bf16 %v1633_v5, %v1631_v30  ;;  %2401 = vmatprep.mubr.bf16.mxu1 %v3725_v4  ;;  %v829_v5 = vpop.permute.xlu1 %828 }
 0x1b1   : > { %v1784_v11 = vpack.c.bf16 %v1634_v9, %v1632_v6  ;;  %v1442_v12 = vpop.f32.mrb[84].mxu0 }
 0x1b2   : > { %v1443_v13 = vadd.f32 %v1442_v12, %v794_v31  ;;  %v1444_v14 = vpop.f32.mrb[85].mxu0 }
 0x1b3   : > { %v1445_v7 = vadd.f32 %v1444_v14, %v794_v31  ;;  %v1446_v17 = vpop.f32.mrb[86].mxu0  ;;  %2520 = vmatprep.subr.bf16.mxu1 %v1784_v11  ;;  %v3736_v11 = vld [vmem:[%s4716_s3 + $0x100] ss:$16 sps:$4 sm:$0xff]  }
 0x1b4   : > { %v1447_v18 = vadd.f32 %v1446_v17, %v799_v16  ;;  %v1448_v21 = vpop.f32.mrb[87].mxu0  ;;  %2521 = vmatpush1.bf16.msra.mxu1 %v1783_v10  ;;  %v1635_v24 = vmax.f32 %v1443_v13, 0.0  ;;  %v3737_v13 = vld [vmem:[%s4716_s3 + $0x124] ss:$16 sps:$4 sm:$0xff]  }
 0x1b5   : > { %v1449_v22 = vadd.f32 %v1448_v21, %v799_v16  ;;  %v1636_v38 = vmax.f32 %v1445_v7, 0.0  ;;  %v834_v21 = vpop.permute.xlu0 %833 }
 0x1b6   : > { %v1637_v25 = vmax.f32 %v1447_v18, 0.0 }
 0x1b7   : > { %v1638_v26 = vmax.f32 %v1449_v22, 0.0  ;;  %2402 = vmatmul.mubr.bf16.gmra.mrb[20].mxu1 %v3727_v35 }
 0x1b8   : > { %v1785_v28 = vpack.c.bf16 %v1637_v25, %v1635_v24  ;;  %2411 = vmatprep.mubr.bf16.mxu1 %v3728_v15  ;;  %v839_v25 = vpop.permute.xlu1 %838 }
 0x1b9   : > { %v1786_v32 = vpack.c.bf16 %v1638_v26, %v1636_v38  ;;  %v1452_v33 = vpop.f32.mrb[88].mxu0 }
 0x1ba   : > { %v1453_v34 = vadd.f32 %v1452_v33, %v804_v29  ;;  %v1454_v36 = vpop.f32.mrb[89].mxu0 }
 0x1bb   : > { %v1455_v37 = vadd.f32 %v1454_v36, %v804_v29  ;;  %v1456_v42 = vpop.f32.mrb[90].mxu0  ;;  %2522 = vmatprep.subr.bf16.mxu1 %v1786_v32  ;;  %v3739_v32 = vld [vmem:[%s4716_s3 + $0x120] ss:$16 sps:$4 sm:$0xff]  }
 0x1bc   : > { %v1457_v39 = vadd.f32 %v1456_v42, %v809_v19  ;;  %v1458_v40 = vpop.f32.mrb[91].mxu0  ;;  %2523 = vmatpush1.bf16.msra.mxu1 %v1785_v28  ;;  %v1639_v43 = vmax.f32 %v1453_v34, 0.0  ;;  %v3740_v34 = vld [vmem:[%s4716_s3 + $0x144] ss:$16 sps:$4 sm:$0xff]  }
 0x1bd   : > { %v1459_v20 = vadd.f32 %v1458_v40, %v809_v19  ;;  %v1640_v47 = vmax.f32 %v1455_v37, 0.0  ;;  %v844_v40 = vpop.permute.xlu0 %843 }
 0x1be   : > { %v1641_v46 = vmax.f32 %v1457_v39, 0.0 }
 0x1bf   : > { %v1642_v48 = vmax.f32 %v1459_v20, 0.0  ;;  %2412 = vmatmul.mubr.bf16.gmra.mrb[24].mxu1 %v3730_v41 }
 0x1c0   : > { %v1787_v49 = vpack.c.bf16 %v1641_v46, %v1639_v43  ;;  %2421 = vmatprep.mubr.bf16.mxu1 %v3731_v44  ;;  %v849_v46 = vpop.permute.xlu1 %848 }
 0x1c1   : > { %v1788_v51 = vpack.c.bf16 %v1642_v48, %v1640_v47  ;;  %v1462_v52 = vpop.f32.mrb[92].mxu0 }
 0x1c2   : > { %v1463_v53 = vadd.f32 %v1462_v52, %v814_v50  ;;  %v1464_v23 = vpop.f32.mrb[93].mxu0 }
 0x1c3   : > { %v1465_v55 = vadd.f32 %v1464_v23, %v814_v50  ;;  %v1466_v45 = vpop.f32.mrb[94].mxu0  ;;  %2524 = vmatprep.subr.bf16.mxu1 %v1788_v51  ;;  %v3742_v51 = vld [vmem:[%s4716_s3 + $0x140] ss:$16 sps:$4 sm:$0xff]  }
 0x1c4   : > { %v1467_v56 = vadd.f32 %v1466_v45, %v819_v54  ;;  %v1468_v57 = vpop.f32.mrb[95].mxu0  ;;  %2525 = vmatpush1.bf16.msra.mxu1 %v1787_v49  ;;  %v1643_v60 = vmax.f32 %v1463_v53, 0.0  ;;  %v3743_v53 = vld [vmem:[%s4716_s3 + $0x164] ss:$16 sps:$4 sm:$0xff]  }
 0x1c5   : > { %v1469_v58 = vadd.f32 %v1468_v57, %v819_v54  ;;  %v1644_v62 = vmax.f32 %v1465_v55, 0.0  ;;  %v854_v57 = vpop.permute.xlu0 %853 }
 0x1c6   : > { %v1645_v61 = vmax.f32 %v1467_v56, 0.0 }
 0x1c7   : > { %v1646_v63 = vmax.f32 %v1469_v58, 0.0  ;;  %2422 = vmatmul.mubr.bf16.gmra.mrb[28].mxu1 %v3733_v27 }
 0x1c8   : > { %v1789_v0 = vpack.c.bf16 %v1645_v61, %v1643_v60  ;;  %2431 = vmatprep.mubr.bf16.mxu1 %v3734_v59  ;;  %v859_v61 = vpop.permute.xlu1 %858 }
 0x1c9   : > { %v1790_v2 = vpack.c.bf16 %v1646_v63, %v1644_v62  ;;  %v1472_v3 = vpop.f32.mrb[96].mxu0 }
 0x1ca   : > { %v1473_v4 = vadd.f32 %v1472_v3, %v824_v1  ;;  %v1474_v30 = vpop.f32.mrb[97].mxu0 }
 0x1cb   : > { %v1475_v6 = vadd.f32 %v1474_v30, %v824_v1  ;;  %v1476_v9 = vpop.f32.mrb[98].mxu0  ;;  %2526 = vmatprep.subr.bf16.mxu1 %v1790_v2  ;;  %v3745_v2 = vld [vmem:[%s4716_s3 + $0x160] ss:$16 sps:$4 sm:$0xff]  }
 0x1cc   : > { %v1477_v10 = vadd.f32 %v1476_v9, %v829_v5  ;;  %v1478_v31 = vpop.f32.mrb[99].mxu0  ;;  %2527 = vmatpush1.bf16.msra.mxu1 %v1789_v0  ;;  %v1647_v14 = vmax.f32 %v1473_v4, 0.0  ;;  %v3746_v4 = vld [vmem:[%s4716_s3 + $0x184] ss:$16 sps:$4 sm:$0xff]  }
 0x1cd   : > { %v1479_v12 = vadd.f32 %v1478_v31, %v829_v5  ;;  %v1648_v7 = vmax.f32 %v1475_v6, 0.0  ;;  %v864_v31 = vpop.permute.xlu0 %863 }
 0x1ce   : > { %v1649_v16 = vmax.f32 %v1477_v10, 0.0 }
 0x1cf   : > { %v1650_v17 = vmax.f32 %v1479_v12, 0.0  ;;  %2432 = vmatmul.mubr.bf16.gmra.mrb[32].mxu1 %v3736_v11 }
 0x1d0   : > { %v1791_v18 = vpack.c.bf16 %v1649_v16, %v1647_v14  ;;  %2441 = vmatprep.mubr.bf16.mxu1 %v3737_v13  ;;  %v869_v16 = vpop.permute.xlu1 %868 }
 0x1d1   : > { %v1792_v35 = vpack.c.bf16 %v1650_v17, %v1648_v7  ;;  %v1482_v22 = vpop.f32.mrb[100].mxu0 }
 0x1d2   : > { %v1483_v15 = vadd.f32 %v1482_v22, %v834_v21  ;;  %v1484_v24 = vpop.f32.mrb[101].mxu0 }
 0x1d3   : > { %v1485_v38 = vadd.f32 %v1484_v24, %v834_v21  ;;  %v1486_v26 = vpop.f32.mrb[102].mxu0  ;;  %2528 = vmatprep.subr.bf16.mxu1 %v1792_v35  ;;  %v3748_v35 = vld [vmem:[%s4716_s3 + $0x180] ss:$16 sps:$4 sm:$0xff]  }
 0x1d4   : > { %v1487_v28 = vadd.f32 %v1486_v26, %v839_v25  ;;  %v1488_v29 = vpop.f32.mrb[103].mxu0  ;;  %2529 = vmatpush1.bf16.msra.mxu1 %v1791_v18  ;;  %v1651_v36 = vmax.f32 %v1483_v15, 0.0  ;;  %v3749_v15 = vld [vmem:[%s4716_s3 + $0x1a4] ss:$16 sps:$4 sm:$0xff]  }
 0x1d5   : > { %v1489_v33 = vadd.f32 %v1488_v29, %v839_v25  ;;  %v1652_v37 = vmax.f32 %v1485_v38, 0.0  ;;  %v874_v29 = vpop.permute.xlu0 %873 }
 0x1d6   : > { %v1653_v19 = vmax.f32 %v1487_v28, 0.0 }
 0x1d7   : > { %v1654_v42 = vmax.f32 %v1489_v33, 0.0  ;;  %2442 = vmatmul.mubr.bf16.gmra.mrb[36].mxu1 %v3739_v32 }
 0x1d8   : > { %v1793_v39 = vpack.c.bf16 %v1653_v19, %v1651_v36  ;;  %2451 = vmatprep.mubr.bf16.mxu1 %v3740_v34  ;;  %v879_v19 = vpop.permute.xlu1 %878 }
 0x1d9   : > { %v1794_v41 = vpack.c.bf16 %v1654_v42, %v1652_v37  ;;  %v1492_v20 = vpop.f32.mrb[104].mxu0 }
 0x1da   : > { %v1493_v44 = vadd.f32 %v1492_v20, %v844_v40  ;;  %v1494_v43 = vpop.f32.mrb[105].mxu0 }
 0x1db   : > { %v1495_v47 = vadd.f32 %v1494_v43, %v844_v40  ;;  %v1496_v48 = vpop.f32.mrb[106].mxu0  ;;  %2530 = vmatprep.subr.bf16.mxu1 %v1794_v41  ;;  %v3751_v41 = vld [vmem:[%s4716_s3 + $0x1a0] ss:$16 sps:$4 sm:$0xff]  }
 0x1dc   : > { %v1497_v49 = vadd.f32 %v1496_v48, %v849_v46  ;;  %v1498_v50 = vpop.f32.mrb[107].mxu0  ;;  %2531 = vmatpush1.bf16.msra.mxu1 %v1793_v39  ;;  %v1655_v23 = vmax.f32 %v1493_v44, 0.0  ;;  %v3752_v44 = vld [vmem:[%s4716_s3 + $0x1c4] ss:$16 sps:$4 sm:$0xff]  }
 0x1dd   : > { %v1499_v52 = vadd.f32 %v1498_v50, %v849_v46  ;;  %v1656_v55 = vmax.f32 %v1495_v47, 0.0  ;;  %v884_v50 = vpop.permute.xlu0 %883 }
 0x1de   : > { %v1657_v54 = vmax.f32 %v1497_v49, 0.0 }
 0x1df   : > { %v1658_v45 = vmax.f32 %v1499_v52, 0.0  ;;  %2452 = vmatmul.mubr.bf16.gmra.mrb[40].mxu1 %v3742_v51 }
 0x1e0   : > { %v1795_v56 = vpack.c.bf16 %v1657_v54, %v1655_v23  ;;  %2461 = vmatprep.mubr.bf16.mxu1 %v3743_v53  ;;  %v889_v54 = vpop.permute.xlu1 %888 }
 0x1e1   : > { %v1796_v27 = vpack.c.bf16 %v1658_v45, %v1656_v55  ;;  %v1502_v58 = vpop.f32.mrb[108].mxu0 }
 0x1e2   : > { %v1503_v59 = vadd.f32 %v1502_v58, %v854_v57  ;;  %v1504_v60 = vpop.f32.mrb[109].mxu0 }
 0x1e3   : > { %v1505_v62 = vadd.f32 %v1504_v60, %v854_v57  ;;  %v1506_v63 = vpop.f32.mrb[110].mxu0  ;;  %2532 = vmatprep.subr.bf16.mxu1 %v1796_v27  ;;  %v3754_v27 = vld [vmem:[%s4716_s3 + $0x1c0] ss:$16 sps:$4 sm:$0xff]  }
 0x1e4   : > { %v1507_v0 = vadd.f32 %v1506_v63, %v859_v61  ;;  %v1508_v1 = vpop.f32.mrb[111].mxu0  ;;  %2533 = vmatpush1.bf16.msra.mxu1 %v1795_v56  ;;  %v1659_v30 = vmax.f32 %v1503_v59, 0.0  ;;  %v3755_v59 = vld [vmem:[%s4716_s3 + $0x1e4] ss:$16 sps:$4 sm:$0xff]  }
 0x1e5   : > { %v1509_v3 = vadd.f32 %v1508_v1, %v859_v61  ;;  %v1660_v6 = vmax.f32 %v1505_v62, 0.0  ;;  %v894_v1 = vpop.permute.xlu0 %893 }
 0x1e6   : > { %v1661_v5 = vmax.f32 %v1507_v0, 0.0 }
 0x1e7   : > { %v1662_v9 = vmax.f32 %v1509_v3, 0.0  ;;  %2462 = vmatmul.mubr.bf16.gmra.mrb[44].mxu1 %v3745_v2 }
 0x1e8   : > { %v1797_v10 = vpack.c.bf16 %v1661_v5, %v1659_v30  ;;  %2471 = vmatprep.mubr.bf16.mxu1 %v3746_v4  ;;  %v899_v5 = vpop.permute.xlu1 %898 }
 0x1e9   : > { %v1798_v11 = vpack.c.bf16 %v1662_v9, %v1660_v6  ;;  %v1512_v12 = vpop.f32.mrb[112].mxu0 }
 0x1ea   : > { %v1513_v13 = vadd.f32 %v1512_v12, %v864_v31  ;;  %v1514_v14 = vpop.f32.mrb[113].mxu0 }
 0x1eb   : > { %v1515_v7 = vadd.f32 %v1514_v14, %v864_v31  ;;  %v1516_v17 = vpop.f32.mrb[114].mxu0  ;;  %2534 = vmatprep.subr.bf16.mxu1 %v1798_v11  ;;  %v3757_v11 = vld [vmem:[%s4716_s3 + $0x1e0] ss:$16 sps:$4 sm:$0xff]  }
 0x1ec   : > { %v1517_v18 = vadd.f32 %v1516_v17, %v869_v16  ;;  %v1518_v21 = vpop.f32.mrb[115].mxu0  ;;  %2535 = vmatpush1.bf16.msra.mxu1 %v1797_v10  ;;  %v1663_v24 = vmax.f32 %v1513_v13, 0.0  ;;  %v3760_v13 = vld [vmem:[%s4716_s3 + $0xc] ss:$16 sps:$4 sm:$0xff]  }
 0x1ed   : > { %v1519_v22 = vadd.f32 %v1518_v21, %v869_v16  ;;  %v1664_v38 = vmax.f32 %v1515_v7, 0.0 }
 0x1ee   : > { %v1665_v25 = vmax.f32 %v1517_v18, 0.0 }
 0x1ef   : > { %v1666_v26 = vmax.f32 %v1519_v22, 0.0  ;;  %2472 = vmatmul.mubr.bf16.gmra.mrb[48].mxu1 %v3748_v35  ;;  %v3758_v35 = vld [vmem:[%s4716_s3 + $0x8] ss:$16 sps:$4 sm:$0xff]   ;;  %v3761_v22 = vld [vmem:[%s4716_s3 + $0x2c] ss:$16 sps:$4 sm:$0xff]  }
 0x1f0   : > { %v1799_v28 = vpack.c.bf16 %v1665_v25, %v1663_v24  ;;  %2481 = vmatprep.mubr.bf16.mxu1 %v3749_v15  ;;  %v3763_v15 = vld [vmem:[%s4716_s3 + $0x28] ss:$16 sps:$4 sm:$0xff]   ;;  %v3764_v24 = vld [vmem:[%s4716_s3 + $0x4c] ss:$16 sps:$4 sm:$0xff]  }
 0x1f1   : > { %v1800_v32 = vpack.c.bf16 %v1666_v26, %v1664_v38  ;;  %v1522_v33 = vpop.f32.mrb[116].mxu0  ;;  %v3766_v25 = vld [vmem:[%s4716_s3 + $0x48] ss:$16 sps:$4 sm:$0xff]   ;;  %v3767_v38 = vld [vmem:[%s4716_s3 + $0x6c] ss:$16 sps:$4 sm:$0xff]  }
 0x1f2   : > { %v1523_v34 = vadd.f32 %v1522_v33, %v874_v29  ;;  %v1524_v36 = vpop.f32.mrb[117].mxu0  ;;  %v3769_v26 = vld [vmem:[%s4716_s3 + $0x68] ss:$16 sps:$4 sm:$0xff]  }
 0x1f3   : > { %v1525_v37 = vadd.f32 %v1524_v36, %v874_v29  ;;  %v1526_v42 = vpop.f32.mrb[118].mxu0  ;;  %2536 = vmatprep.subr.bf16.mxu1 %v1800_v32  ;;  %v3772_v29 = vld [vmem:[%s4716_s3 + $0x88] ss:$16 sps:$4 sm:$0xff]   ;;  %v3773_v32 = vld [vmem:[%s4716_s3 + $0xac] ss:$16 sps:$4 sm:$0xff]  }
 0x1f4   : > { %v1527_v39 = vadd.f32 %v1526_v42, %v879_v19  ;;  %v1528_v40 = vpop.f32.mrb[119].mxu0  ;;  %2537 = vmatpush1.bf16.msra.mxu1 %v1799_v28  ;;  %v1667_v43 = vmax.f32 %v1523_v34, 0.0  ;;  %v3770_v28 = vld [vmem:[%s4716_s3 + $0x8c] ss:$16 sps:$4 sm:$0xff]   ;;  %v3775_v33 = vld [vmem:[%s4716_s3 + $0xa8] ss:$16 sps:$4 sm:$0xff]  }
 0x1f5   : > { %v1529_v20 = vadd.f32 %v1528_v40, %v879_v19  ;;  %v1668_v47 = vmax.f32 %v1525_v37, 0.0  ;;  %v3776_v34 = vld [vmem:[%s4716_s3 + $0xcc] ss:$16 sps:$4 sm:$0xff]   ;;  %v3778_v36 = vld [vmem:[%s4716_s3 + $0xc8] ss:$16 sps:$4 sm:$0xff]  }
 0x1f6   : > { %v1669_v46 = vmax.f32 %v1527_v39, 0.0  ;;  %v3779_v19 = vld [vmem:[%s4716_s3 + $0xec] ss:$16 sps:$4 sm:$0xff]   ;;  %v3781_v37 = vld [vmem:[%s4716_s3 + $0xe8] ss:$16 sps:$4 sm:$0xff]  }
 0x1f7   : > { %v1670_v48 = vmax.f32 %v1529_v20, 0.0  ;;  %2482 = vmatmul.mubr.bf16.gmra.mrb[52].mxu1 %v3751_v41  ;;  %v3782_v42 = vld [vmem:[%s4716_s3 + $0x10c] ss:$16 sps:$4 sm:$0xff]   ;;  %v3784_v39 = vld [vmem:[%s4716_s3 + $0x108] ss:$16 sps:$4 sm:$0xff]  }
 0x1f8   : > { %v1801_v49 = vpack.c.bf16 %v1669_v46, %v1667_v43  ;;  %2491 = vmatprep.mubr.bf16.mxu1 %v3752_v44  ;;  %v3785_v40 = vld [vmem:[%s4716_s3 + $0x12c] ss:$16 sps:$4 sm:$0xff]   ;;  %v3787_v41 = vld [vmem:[%s4716_s3 + $0x128] ss:$16 sps:$4 sm:$0xff]  }
 0x1f9   : > { %v1802_v51 = vpack.c.bf16 %v1670_v48, %v1668_v47  ;;  %v1532_v52 = vpop.f32.mrb[120].mxu0  ;;  %v3788_v20 = vld [vmem:[%s4716_s3 + $0x14c] ss:$16 sps:$4 sm:$0xff]   ;;  %v3790_v44 = vld [vmem:[%s4716_s3 + $0x148] ss:$16 sps:$4 sm:$0xff]  }
 0x1fa   : > { %v1533_v53 = vadd.f32 %v1532_v52, %v884_v50  ;;  %v1534_v23 = vpop.f32.mrb[121].mxu0  ;;  %v3791_v43 = vld [vmem:[%s4716_s3 + $0x16c] ss:$16 sps:$4 sm:$0xff]   ;;  %v3793_v46 = vld [vmem:[%s4716_s3 + $0x168] ss:$16 sps:$4 sm:$0xff]  }
 0x1fb   : > { %v1535_v55 = vadd.f32 %v1534_v23, %v884_v50  ;;  %v1536_v45 = vpop.f32.mrb[122].mxu0  ;;  %2538 = vmatprep.subr.bf16.mxu1 %v1802_v51  ;;  %v3794_v47 = vld [vmem:[%s4716_s3 + $0x18c] ss:$16 sps:$4 sm:$0xff]   ;;  %v3796_v48 = vld [vmem:[%s4716_s3 + $0x188] ss:$16 sps:$4 sm:$0xff]  }
 0x1fc   : > { %v1537_v56 = vadd.f32 %v1536_v45, %v889_v54  ;;  %v1538_v57 = vpop.f32.mrb[123].mxu0  ;;  %2539 = vmatpush1.bf16.msra.mxu1 %v1801_v49  ;;  %v1671_v60 = vmax.f32 %v1533_v53, 0.0  ;;  %v3797_v49 = vld [vmem:[%s4716_s3 + $0x1ac] ss:$16 sps:$4 sm:$0xff]   ;;  %v3799_v50 = vld [vmem:[%s4716_s3 + $0x1a8] ss:$16 sps:$4 sm:$0xff]  }
 0x1fd   : > { %v1539_v58 = vadd.f32 %v1538_v57, %v889_v54  ;;  %v1672_v62 = vmax.f32 %v1535_v55, 0.0  ;;  %v3800_v51 = vld [vmem:[%s4716_s3 + $0x1cc] ss:$16 sps:$4 sm:$0xff]   ;;  %v3802_v52 = vld [vmem:[%s4716_s3 + $0x1c8] ss:$16 sps:$4 sm:$0xff]   ;;  %v1842_v54 = vpop.permute.xlu0 %1841  ;;  %v1847_v57 = vpop.permute.xlu1 %1846 }
 0x1fe   : > { %v1673_v61 = vmax.f32 %v1537_v56, 0.0  ;;  %v3803_v53 = vld [vmem:[%s4716_s3 + $0x1ec] ss:$16 sps:$4 sm:$0xff]   ;;  %v3805_v23 = vld [vmem:[%s4716_s3 + $0x1e8] ss:$16 sps:$4 sm:$0xff]  }
 0x1ff   : > { %v1674_v63 = vmax.f32 %v1539_v58, 0.0  ;;  %2492 = vmatmul.mubr.bf16.gmra.mrb[56].mxu1 %v3754_v27 }
 0x200   : > { %v1803_v0 = vpack.c.bf16 %v1673_v61, %v1671_v60  ;;  %2501 = vmatprep.mubr.bf16.mxu1 %v3755_v59  ;;  %v3808_v61 = vld [vmem:[%s4718_s5 + $0x4] ss:$8 sps:$4 sm:$0xff]  }
 0x201   : > { %v1804_v2 = vpack.c.bf16 %v1674_v63, %v1672_v62  ;;  %v1542_v3 = vpop.f32.mrb[124].mxu0  ;;  %3025 = vmatprep.mubr.bf16.mxu0 %v3808_v61 }
 0x202   : > { %v1543_v4 = vadd.f32 %v1542_v3, %v894_v1  ;;  %v1544_v30 = vpop.f32.mrb[125].mxu0  ;;  %v1852_v3 = vpop.permute.xlu0 %1851 }
 0x203   : > { %v1545_v6 = vadd.f32 %v1544_v30, %v894_v1  ;;  %v1546_v9 = vpop.f32.mrb[126].mxu0  ;;  %2540 = vmatprep.subr.bf16.mxu1 %v1804_v2 }
 0x204   : > { %v1547_v10 = vadd.f32 %v1546_v9, %v899_v5  ;;  %v1548_v31 = vpop.f32.mrb[127].mxu0  ;;  %2541 = vmatpush1.bf16.msra.mxu1 %v1803_v0  ;;  %v1675_v14 = vmax.f32 %v1543_v4, 0.0  ;;  %v1857_v9 = vpop.permute.xlu1 %1856 }
 0x205   : > { %v1549_v12 = vadd.f32 %v1548_v31, %v899_v5  ;;  %v1676_v7 = vmax.f32 %v1545_v6, 0.0 }
 0x206   : > { %v1677_v16 = vmax.f32 %v1547_v10, 0.0 }
 0x207   : > { %v1678_v17 = vmax.f32 %v1549_v12, 0.0  ;;  %2502 = vmatmul.mubr.bf16.gmra.mrb[60].mxu1 %v3757_v11 }
 0x208   : > { %v1805_v18 = vpack.c.bf16 %v1677_v16, %v1675_v14  ;;  %2544 = vmatprep.mubr.bf16.mxu1 %v3760_v13 }
 0x209   : > { %v1806_v21 = vpack.c.bf16 %v1678_v17, %v1676_v7 }
 0x20b   : > { %2542 = vmatprep.subr.bf16.mxu1 %v1806_v21  ;;  %v1862_v21 = vpop.permute.xlu0 %1861 }
 0x20c   : > { %2543 = vmatpush1.bf16.msra.mxu1 %v1805_v18 }
 0x20f   : > { %2545 = vmatmul.mubr.bf16.vlgmr.msra.gmra.mrb[0].mxu1 %v3758_v35 }
 0x210   : > { %2554 = vmatprep.mubr.bf16.mxu1 %v3761_v22 }
 0x217   : > { %2555 = vmatmul.mubr.bf16.gmra.mrb[4].mxu1 %v3763_v15 }
 0x218   : > { %2564 = vmatprep.mubr.bf16.mxu1 %v3764_v24 }
 0x21f   : > { %2565 = vmatmul.mubr.bf16.gmra.mrb[8].mxu1 %v3766_v25  ;;  %v1867_v25 = vpop.permute.xlu1 %1866 }
 0x220   : > { %2574 = vmatprep.mubr.bf16.mxu1 %v3767_v38 }
 0x227   : > { %2575 = vmatmul.mubr.bf16.gmra.mrb[12].mxu1 %v3769_v26 }
 0x228   : > { %2584 = vmatprep.mubr.bf16.mxu1 %v3770_v28 }
 0x22f   : > { %2585 = vmatmul.mubr.bf16.gmra.mrb[16].mxu1 %v3772_v29 }
 0x230   : > { %2594 = vmatprep.mubr.bf16.mxu1 %v3773_v32 }
 0x237   : > { %2595 = vmatmul.mubr.bf16.gmra.mrb[20].mxu1 %v3775_v33 }
 0x238   : > { %2604 = vmatprep.mubr.bf16.mxu1 %v3776_v34 }
 0x23f   : > { %2605 = vmatmul.mubr.bf16.gmra.mrb[24].mxu1 %v3778_v36 }
 0x240   : > { %2614 = vmatprep.mubr.bf16.mxu1 %v3779_v19 }
 0x247   : > { %2615 = vmatmul.mubr.bf16.gmra.mrb[28].mxu1 %v3781_v37 }
 0x248   : > { %2624 = vmatprep.mubr.bf16.mxu1 %v3782_v42  ;;  %v1872_v42 = vpop.permute.xlu0 %1871 }
 0x24f   : > { %2625 = vmatmul.mubr.bf16.gmra.mrb[32].mxu1 %v3784_v39 }
 0x250   : > { %2634 = vmatprep.mubr.bf16.mxu1 %v3785_v40 }
 0x257   : > { %2635 = vmatmul.mubr.bf16.gmra.mrb[36].mxu1 %v3787_v41 }
 0x258   : > { %2644 = vmatprep.mubr.bf16.mxu1 %v3788_v20 }
 0x25f   : > { %2645 = vmatmul.mubr.bf16.gmra.mrb[40].mxu1 %v3790_v44  ;;  %v1877_v44 = vpop.permute.xlu1 %1876 }
 0x260   : > { %2654 = vmatprep.mubr.bf16.mxu1 %v3791_v43 }
 0x267   : > { %2655 = vmatmul.mubr.bf16.gmra.mrb[44].mxu1 %v3793_v46 }
 0x268   : > { %2664 = vmatprep.mubr.bf16.mxu1 %v3794_v47 }
 0x26f   : > { %2665 = vmatmul.mubr.bf16.gmra.mrb[48].mxu1 %v3796_v48 }
 0x270   : > { %2674 = vmatprep.mubr.bf16.mxu1 %v3797_v49 }
 0x277   : > { %2675 = vmatmul.mubr.bf16.gmra.mrb[52].mxu1 %v3799_v50 }
 0x278   : > { %2684 = vmatprep.mubr.bf16.mxu1 %v3800_v51 }
 0x27f   : > { %2685 = vmatmul.mubr.bf16.gmra.mrb[56].mxu1 %v3802_v52 }
 0x280   : > { %2694 = vmatprep.mubr.bf16.mxu1 %v3803_v53 }
 0x287   : > { %2695 = vmatmul.mubr.bf16.gmra.mrb[60].mxu1 %v3805_v23 }
 0x288   : > { %3193 = vmatprep.mubr.bf16.mxu1 %v3886_v8 }
 0x2e2   : > { %v2546_v55 = vpop.f32.mrb[0].mxu1 }
 0x2e3   : > { %v3479_v45 = vadd.f32 %v2546_v55, %v1842_v54  ;;  %v2548_v56 = vpop.f32.mrb[1].mxu1 }
 0x2e4   : > { %v3480_v27 = vadd.f32 %v2548_v56, %v1842_v54  ;;  %v2550_v58 = vpop.f32.mrb[2].mxu1  ;;  %v1882_v54 = vpop.permute.xlu0 %1881 }
 0x2e5   : > { %v3481_v59 = vadd.f32 %v2550_v58, %v1847_v57  ;;  %v2552_v60 = vpop.f32.mrb[3].mxu1  ;;  %v2705_v63 = vmax.f32 %v3479_v45, 0.0 }
 0x2e6   : > { %v3482_v62 = vadd.f32 %v2552_v60, %v1847_v57  ;;  %v2706_v1 = vmax.f32 %v3480_v27, 0.0  ;;  %v1887_v27 = vpop.permute.xlu1 %1886 }
 0x2e7   : > { %v2707_v0 = vmax.f32 %v3481_v59, 0.0 }
 0x2e8   : > { %v2708_v2 = vmax.f32 %v3482_v62, 0.0 }
 0x2e9   : > { %v2785_v8 = vpack.c.bf16 %v2707_v0, %v2705_v63 }
 0x2ea   : > { %v2786_v4 = vpack.c.bf16 %v2708_v2, %v2706_v1  ;;  %v2556_v30 = vpop.f32.mrb[4].mxu1 }
 0x2eb   : > { %v3483_v5 = vadd.f32 %v2556_v30, %v1852_v3  ;;  %v2558_v6 = vpop.f32.mrb[5].mxu1 }
 0x2ec   : > { %v3484_v10 = vadd.f32 %v2558_v6, %v1852_v3  ;;  %v2560_v31 = vpop.f32.mrb[6].mxu1  ;;  %2993 = vmatprep.subr.bf16.mxu0 %v2786_v4  ;;  %v1892_v3 = vpop.permute.xlu0 %1891 }
 0x2ed   : > { %v3485_v11 = vadd.f32 %v2560_v31, %v1857_v9  ;;  %v2562_v12 = vpop.f32.mrb[7].mxu1  ;;  %2994 = vmatpush1.bf16.msra.mxu0 %v2785_v8  ;;  %v2709_v14 = vmax.f32 %v3483_v5, 0.0 }
 0x2ee   : > { %v3486_v13 = vadd.f32 %v2562_v12, %v1857_v9  ;;  %v2710_v7 = vmax.f32 %v3484_v10, 0.0  ;;  %v1897_v9 = vpop.permute.xlu1 %1896 }
 0x2ef   : > { %v2711_v16 = vmax.f32 %v3485_v11, 0.0 }
 0x2f0   : > { %v2712_v17 = vmax.f32 %v3486_v13, 0.0 }
 0x2f1   : > { %v2787_v18 = vpack.c.bf16 %v2711_v16, %v2709_v14 }
 0x2f2   : > { %v2788_v35 = vpack.c.bf16 %v2712_v17, %v2710_v7  ;;  %v2566_v22 = vpop.f32.mrb[8].mxu1 }
 0x2f3   : > { %v3487_v15 = vadd.f32 %v2566_v22, %v1862_v21  ;;  %v2568_v24 = vpop.f32.mrb[9].mxu1 }
 0x2f4   : > { %v3488_v38 = vadd.f32 %v2568_v24, %v1862_v21  ;;  %v2570_v26 = vpop.f32.mrb[10].mxu1  ;;  %2995 = vmatprep.subr.bf16.mxu0 %v2788_v35  ;;  %v1902_v21 = vpop.permute.xlu0 %1901 }
 0x2f5   : > { %v3489_v28 = vadd.f32 %v2570_v26, %v1867_v25  ;;  %v2572_v29 = vpop.f32.mrb[11].mxu1  ;;  %2996 = vmatpush1.bf16.msra.mxu0 %v2787_v18  ;;  %v2713_v33 = vmax.f32 %v3487_v15, 0.0 }
 0x2f6   : > { %v3490_v32 = vadd.f32 %v2572_v29, %v1867_v25  ;;  %v2714_v36 = vmax.f32 %v3488_v38, 0.0  ;;  %v1907_v25 = vpop.permute.xlu1 %1906 }
 0x2f7   : > { %v2715_v34 = vmax.f32 %v3489_v28, 0.0 }
 0x2f8   : > { %v2716_v19 = vmax.f32 %v3490_v32, 0.0 }
 0x2f9   : > { %v2789_v37 = vpack.c.bf16 %v2715_v34, %v2713_v33 }
 0x2fa   : > { %v2790_v39 = vpack.c.bf16 %v2716_v19, %v2714_v36  ;;  %v2576_v40 = vpop.f32.mrb[12].mxu1 }
 0x2fb   : > { %v3491_v41 = vadd.f32 %v2576_v40, %v1872_v42  ;;  %v2578_v20 = vpop.f32.mrb[13].mxu1 }
 0x2fc   : > { %v3492_v43 = vadd.f32 %v2578_v20, %v1872_v42  ;;  %v2580_v46 = vpop.f32.mrb[14].mxu1  ;;  %2997 = vmatprep.subr.bf16.mxu0 %v2790_v39  ;;  %v1912_v42 = vpop.permute.xlu0 %1911 }
 0x2fd   : > { %v3493_v47 = vadd.f32 %v2580_v46, %v1877_v44  ;;  %v2582_v48 = vpop.f32.mrb[15].mxu1  ;;  %2998 = vmatpush1.bf16.msra.mxu0 %v2789_v37  ;;  %v2717_v50 = vmax.f32 %v3491_v41, 0.0 }
 0x2fe   : > { %v3494_v49 = vadd.f32 %v2582_v48, %v1877_v44  ;;  %v2718_v52 = vmax.f32 %v3492_v43, 0.0  ;;  %v1917_v44 = vpop.permute.xlu1 %1916 }
 0x2ff   : > { %v2719_v51 = vmax.f32 %v3493_v47, 0.0 }
 0x300   : > { %v2720_v53 = vmax.f32 %v3494_v49, 0.0 }
 0x301   : > { %v2791_v23 = vpack.c.bf16 %v2719_v51, %v2717_v50 }
 0x302   : > { %v2792_v55 = vpack.c.bf16 %v2720_v53, %v2718_v52  ;;  %v2586_v45 = vpop.f32.mrb[16].mxu1 }
 0x303   : > { %v3495_v56 = vadd.f32 %v2586_v45, %v1882_v54  ;;  %v2588_v57 = vpop.f32.mrb[17].mxu1 }
 0x304   : > { %v3496_v58 = vadd.f32 %v2588_v57, %v1882_v54  ;;  %v2590_v59 = vpop.f32.mrb[18].mxu1  ;;  %2999 = vmatprep.subr.bf16.mxu0 %v2792_v55  ;;  %v1922_v54 = vpop.permute.xlu0 %1921 }
 0x305   : > { %v3497_v60 = vadd.f32 %v2590_v59, %v1887_v27  ;;  %v2592_v61 = vpop.f32.mrb[19].mxu1  ;;  %3000 = vmatpush1.bf16.msra.mxu0 %v2791_v23  ;;  %v2721_v63 = vmax.f32 %v3495_v56, 0.0 }
 0x306   : > { %v3498_v62 = vadd.f32 %v2592_v61, %v1887_v27  ;;  %v2722_v1 = vmax.f32 %v3496_v58, 0.0  ;;  %v1927_v27 = vpop.permute.xlu1 %1926 }
 0x307   : > { %v2723_v0 = vmax.f32 %v3497_v60, 0.0 }
 0x308   : > { %v2724_v2 = vmax.f32 %v3498_v62, 0.0 }
 0x309   : > { %v2793_v8 = vpack.c.bf16 %v2723_v0, %v2721_v63 }
 0x30a   : > { %v2794_v4 = vpack.c.bf16 %v2724_v2, %v2722_v1  ;;  %v2596_v30 = vpop.f32.mrb[20].mxu1 }
 0x30b   : > { %v3499_v5 = vadd.f32 %v2596_v30, %v1892_v3  ;;  %v2598_v6 = vpop.f32.mrb[21].mxu1 }
 0x30c   : > { %v3500_v10 = vadd.f32 %v2598_v6, %v1892_v3  ;;  %v2600_v31 = vpop.f32.mrb[22].mxu1  ;;  %3001 = vmatprep.subr.bf16.mxu0 %v2794_v4  ;;  %v1932_v3 = vpop.permute.xlu0 %1931 }
 0x30d   : > { %v3501_v11 = vadd.f32 %v2600_v31, %v1897_v9  ;;  %v2602_v12 = vpop.f32.mrb[23].mxu1  ;;  %3002 = vmatpush1.bf16.msra.mxu0 %v2793_v8  ;;  %v2725_v14 = vmax.f32 %v3499_v5, 0.0 }
 0x30e   : > { %v3502_v13 = vadd.f32 %v2602_v12, %v1897_v9  ;;  %v2726_v7 = vmax.f32 %v3500_v10, 0.0  ;;  %v1937_v9 = vpop.permute.xlu1 %1936 }
 0x30f   : > { %v2727_v16 = vmax.f32 %v3501_v11, 0.0 }
 0x310   : > { %v2728_v17 = vmax.f32 %v3502_v13, 0.0 }
 0x311   : > { %v2795_v18 = vpack.c.bf16 %v2727_v16, %v2725_v14 }
 0x312   : > { %v2796_v35 = vpack.c.bf16 %v2728_v17, %v2726_v7  ;;  %v2606_v22 = vpop.f32.mrb[24].mxu1 }
 0x313   : > { %v3503_v15 = vadd.f32 %v2606_v22, %v1902_v21  ;;  %v2608_v24 = vpop.f32.mrb[25].mxu1 }
 0x314   : > { %v3504_v38 = vadd.f32 %v2608_v24, %v1902_v21  ;;  %v2610_v26 = vpop.f32.mrb[26].mxu1  ;;  %3003 = vmatprep.subr.bf16.mxu0 %v2796_v35  ;;  %v1942_v21 = vpop.permute.xlu0 %1941 }
 0x315   : > { %v3505_v28 = vadd.f32 %v2610_v26, %v1907_v25  ;;  %v2612_v29 = vpop.f32.mrb[27].mxu1  ;;  %3004 = vmatpush1.bf16.msra.mxu0 %v2795_v18  ;;  %v2729_v33 = vmax.f32 %v3503_v15, 0.0 }
 0x316   : > { %v3506_v32 = vadd.f32 %v2612_v29, %v1907_v25  ;;  %v2730_v36 = vmax.f32 %v3504_v38, 0.0  ;;  %v1947_v25 = vpop.permute.xlu1 %1946 }
 0x317   : > { %v2731_v34 = vmax.f32 %v3505_v28, 0.0 }
 0x318   : > { %v2732_v19 = vmax.f32 %v3506_v32, 0.0 }
 0x319   : > { %v2797_v37 = vpack.c.bf16 %v2731_v34, %v2729_v33 }
 0x31a   : > { %v2798_v39 = vpack.c.bf16 %v2732_v19, %v2730_v36  ;;  %v2616_v40 = vpop.f32.mrb[28].mxu1 }
 0x31b   : > { %v3507_v41 = vadd.f32 %v2616_v40, %v1912_v42  ;;  %v2618_v20 = vpop.f32.mrb[29].mxu1 }
 0x31c   : > { %v3508_v43 = vadd.f32 %v2618_v20, %v1912_v42  ;;  %v2620_v46 = vpop.f32.mrb[30].mxu1  ;;  %3005 = vmatprep.subr.bf16.mxu0 %v2798_v39  ;;  %v1952_v42 = vpop.permute.xlu0 %1951 }
 0x31d   : > { %v3509_v47 = vadd.f32 %v2620_v46, %v1917_v44  ;;  %v2622_v48 = vpop.f32.mrb[31].mxu1  ;;  %3006 = vmatpush1.bf16.msra.mxu0 %v2797_v37  ;;  %v2733_v50 = vmax.f32 %v3507_v41, 0.0 }
 0x31e   : > { %v3510_v49 = vadd.f32 %v2622_v48, %v1917_v44  ;;  %v2734_v52 = vmax.f32 %v3508_v43, 0.0  ;;  %v1957_v44 = vpop.permute.xlu1 %1956 }
 0x31f   : > { %v2735_v51 = vmax.f32 %v3509_v47, 0.0 }
 0x320   : > { %v2736_v53 = vmax.f32 %v3510_v49, 0.0 }
 0x321   : > { %v2799_v23 = vpack.c.bf16 %v2735_v51, %v2733_v50 }
 0x322   : > { %v2800_v55 = vpack.c.bf16 %v2736_v53, %v2734_v52  ;;  %v2626_v45 = vpop.f32.mrb[32].mxu1 }
 0x323   : > { %v3511_v56 = vadd.f32 %v2626_v45, %v1922_v54  ;;  %v2628_v57 = vpop.f32.mrb[33].mxu1 }
 0x324   : > { %v3512_v58 = vadd.f32 %v2628_v57, %v1922_v54  ;;  %v2630_v59 = vpop.f32.mrb[34].mxu1  ;;  %3007 = vmatprep.subr.bf16.mxu0 %v2800_v55  ;;  %v1962_v54 = vpop.permute.xlu0 %1961 }
 0x325   : > { %v3513_v60 = vadd.f32 %v2630_v59, %v1927_v27  ;;  %v2632_v61 = vpop.f32.mrb[35].mxu1  ;;  %3008 = vmatpush1.bf16.msra.mxu0 %v2799_v23  ;;  %v2737_v63 = vmax.f32 %v3511_v56, 0.0 }
 0x326   : > { %v3514_v62 = vadd.f32 %v2632_v61, %v1927_v27  ;;  %v2738_v1 = vmax.f32 %v3512_v58, 0.0  ;;  %v1967_v27 = vpop.permute.xlu1 %1966 }
 0x327   : > { %v2739_v0 = vmax.f32 %v3513_v60, 0.0 }
 0x328   : > { %v2740_v2 = vmax.f32 %v3514_v62, 0.0 }
 0x329   : > { %v2801_v8 = vpack.c.bf16 %v2739_v0, %v2737_v63 }
 0x32a   : > { %v2802_v4 = vpack.c.bf16 %v2740_v2, %v2738_v1  ;;  %v2636_v30 = vpop.f32.mrb[36].mxu1 }
 0x32b   : > { %v3515_v5 = vadd.f32 %v2636_v30, %v1932_v3  ;;  %v2638_v6 = vpop.f32.mrb[37].mxu1 }
 0x32c   : > { %v3516_v10 = vadd.f32 %v2638_v6, %v1932_v3  ;;  %v2640_v31 = vpop.f32.mrb[38].mxu1  ;;  %3009 = vmatprep.subr.bf16.mxu0 %v2802_v4  ;;  %v1972_v3 = vpop.permute.xlu0 %1971 }
 0x32d   : > { %v3517_v11 = vadd.f32 %v2640_v31, %v1937_v9  ;;  %v2642_v12 = vpop.f32.mrb[39].mxu1  ;;  %3010 = vmatpush1.bf16.msra.mxu0 %v2801_v8  ;;  %v2741_v14 = vmax.f32 %v3515_v5, 0.0 }
 0x32e   : > { %v3518_v13 = vadd.f32 %v2642_v12, %v1937_v9  ;;  %v2742_v7 = vmax.f32 %v3516_v10, 0.0  ;;  %v1977_v9 = vpop.permute.xlu1 %1976 }
 0x32f   : > { %v2743_v16 = vmax.f32 %v3517_v11, 0.0 }
 0x330   : > { %v2744_v17 = vmax.f32 %v3518_v13, 0.0 }
 0x331   : > { %v2803_v18 = vpack.c.bf16 %v2743_v16, %v2741_v14 }
 0x332   : > { %v2804_v35 = vpack.c.bf16 %v2744_v17, %v2742_v7  ;;  %v2646_v22 = vpop.f32.mrb[40].mxu1 }
 0x333   : > { %v3519_v15 = vadd.f32 %v2646_v22, %v1942_v21  ;;  %v2648_v24 = vpop.f32.mrb[41].mxu1 }
 0x334   : > { %v3520_v38 = vadd.f32 %v2648_v24, %v1942_v21  ;;  %v2650_v26 = vpop.f32.mrb[42].mxu1  ;;  %3011 = vmatprep.subr.bf16.mxu0 %v2804_v35  ;;  %v1982_v21 = vpop.permute.xlu0 %1981 }
 0x335   : > { %v3521_v28 = vadd.f32 %v2650_v26, %v1947_v25  ;;  %v2652_v29 = vpop.f32.mrb[43].mxu1  ;;  %3012 = vmatpush1.bf16.msra.mxu0 %v2803_v18  ;;  %v2745_v33 = vmax.f32 %v3519_v15, 0.0 }
 0x336   : > { %v3522_v32 = vadd.f32 %v2652_v29, %v1947_v25  ;;  %v2746_v36 = vmax.f32 %v3520_v38, 0.0  ;;  %v1987_v25 = vpop.permute.xlu1 %1986 }
 0x337   : > { %v2747_v34 = vmax.f32 %v3521_v28, 0.0 }
 0x338   : > { %v2748_v19 = vmax.f32 %v3522_v32, 0.0 }
 0x339   : > { %v2805_v37 = vpack.c.bf16 %v2747_v34, %v2745_v33 }
 0x33a   : > { %v2806_v39 = vpack.c.bf16 %v2748_v19, %v2746_v36  ;;  %v2656_v40 = vpop.f32.mrb[44].mxu1 }
 0x33b   : > { %v3523_v41 = vadd.f32 %v2656_v40, %v1952_v42  ;;  %v2658_v20 = vpop.f32.mrb[45].mxu1 }
 0x33c   : > { %v3524_v43 = vadd.f32 %v2658_v20, %v1952_v42  ;;  %v2660_v46 = vpop.f32.mrb[46].mxu1  ;;  %3013 = vmatprep.subr.bf16.mxu0 %v2806_v39  ;;  %v1992_v42 = vpop.permute.xlu0 %1991 }
 0x33d   : > { %v3525_v47 = vadd.f32 %v2660_v46, %v1957_v44  ;;  %v2662_v48 = vpop.f32.mrb[47].mxu1  ;;  %3014 = vmatpush1.bf16.msra.mxu0 %v2805_v37  ;;  %v2749_v50 = vmax.f32 %v3523_v41, 0.0 }
 0x33e   : > { %v3526_v49 = vadd.f32 %v2662_v48, %v1957_v44  ;;  %v2750_v52 = vmax.f32 %v3524_v43, 0.0  ;;  %v1997_v44 = vpop.permute.xlu1 %1996 }
 0x33f   : > { %v2751_v51 = vmax.f32 %v3525_v47, 0.0 }
 0x340   : > { %v2752_v53 = vmax.f32 %v3526_v49, 0.0 }
 0x341   : > { %v2807_v23 = vpack.c.bf16 %v2751_v51, %v2749_v50 }
 0x342   : > { %v2808_v55 = vpack.c.bf16 %v2752_v53, %v2750_v52  ;;  %v2666_v45 = vpop.f32.mrb[48].mxu1 }
 0x343   : > { %v3527_v56 = vadd.f32 %v2666_v45, %v1962_v54  ;;  %v2668_v57 = vpop.f32.mrb[49].mxu1  ;;  %v3809_v45 = vld [vmem:[%s4718_s5 + $0x14] ss:$8 sps:$4 sm:$0xff]  }
 0x344   : > { %v3528_v58 = vadd.f32 %v2668_v57, %v1962_v54  ;;  %v2670_v59 = vpop.f32.mrb[50].mxu1  ;;  %3015 = vmatprep.subr.bf16.mxu0 %v2808_v55  ;;  %v3806_v55 = vld [vmem:[%s4718_s5] ss:$8 sps:$4 sm:$0xff]   ;;  %v3812_v57 = vld [vmem:[%s4718_s5 + $0x24] ss:$8 sps:$4 sm:$0xff]  }
 0x345   : > { %v3529_v60 = vadd.f32 %v2670_v59, %v1967_v27  ;;  %v2672_v61 = vpop.f32.mrb[51].mxu1  ;;  %3016 = vmatpush1.bf16.msra.mxu0 %v2807_v23  ;;  %v2753_v63 = vmax.f32 %v3527_v56, 0.0  ;;  %v3811_v56 = vld [vmem:[%s4718_s5 + $0x10] ss:$8 sps:$4 sm:$0xff]  }
 0x346   : > { %v3530_v62 = vadd.f32 %v2672_v61, %v1967_v27  ;;  %v2754_v1 = vmax.f32 %v3528_v58, 0.0  ;;  %v3814_v27 = vld [vmem:[%s4718_s5 + $0x20] ss:$8 sps:$4 sm:$0xff]   ;;  %v3815_v58 = vld [vmem:[%s4718_s5 + $0x34] ss:$8 sps:$4 sm:$0xff]  }
 0x347   : > { %v2755_v0 = vmax.f32 %v3529_v60, 0.0  ;;  %v3817_v59 = vld [vmem:[%s4718_s5 + $0x30] ss:$8 sps:$4 sm:$0xff]   ;;  %v3818_v60 = vld [vmem:[%s4718_s5 + $0x44] ss:$8 sps:$4 sm:$0xff]  }
 0x348   : > { %v2756_v2 = vmax.f32 %v3530_v62, 0.0  ;;  %v3820_v61 = vld [vmem:[%s4718_s5 + $0x40] ss:$8 sps:$4 sm:$0xff]   ;;  %v3821_v62 = vld [vmem:[%s4718_s5 + $0x54] ss:$8 sps:$4 sm:$0xff]  }
 0x349   : > { %v2809_v8 = vpack.c.bf16 %v2755_v0, %v2753_v63  ;;  %v3823_v63 = vld [vmem:[%s4718_s5 + $0x50] ss:$8 sps:$4 sm:$0xff]   ;;  %v3824_v0 = vld [vmem:[%s4718_s5 + $0x64] ss:$8 sps:$4 sm:$0xff]  }
 0x34a   : > { %v2810_v4 = vpack.c.bf16 %v2756_v2, %v2754_v1  ;;  %v2676_v30 = vpop.f32.mrb[52].mxu1  ;;  %v3826_v1 = vld [vmem:[%s4718_s5 + $0x60] ss:$8 sps:$4 sm:$0xff]   ;;  %v3827_v2 = vld [vmem:[%s4718_s5 + $0x74] ss:$8 sps:$4 sm:$0xff]  }
 0x34b   : > { %v3531_v5 = vadd.f32 %v2676_v30, %v1972_v3  ;;  %v2678_v6 = vpop.f32.mrb[53].mxu1 }
 0x34c   : > { %v3532_v10 = vadd.f32 %v2678_v6, %v1972_v3  ;;  %v2680_v31 = vpop.f32.mrb[54].mxu1  ;;  %3017 = vmatprep.subr.bf16.mxu0 %v2810_v4  ;;  %v2836_v3 = vpop.permute.xlu0 %2835 }
 0x34d   : > { %v3533_v11 = vadd.f32 %v2680_v31, %v1977_v9  ;;  %v2682_v12 = vpop.f32.mrb[55].mxu1  ;;  %3018 = vmatpush1.bf16.msra.mxu0 %v2809_v8  ;;  %v2757_v14 = vmax.f32 %v3531_v5, 0.0  ;;  %v3829_v8 = vld [vmem:[%s4718_s5 + $0x70] ss:$8 sps:$4 sm:$0xff]   ;;  %v2841_v6 = vpop.permute.xlu1 %2840 }
 0x34e   : > { %v3534_v13 = vadd.f32 %v2682_v12, %v1977_v9  ;;  %v2758_v7 = vmax.f32 %v3532_v10, 0.0 }
 0x34f   : > { %v2759_v16 = vmax.f32 %v3533_v11, 0.0 }
 0x350   : > { %v2760_v17 = vmax.f32 %v3534_v13, 0.0 }
 0x351   : > { %v2811_v18 = vpack.c.bf16 %v2759_v16, %v2757_v14 }
 0x352   : > { %v2812_v35 = vpack.c.bf16 %v2760_v17, %v2758_v7  ;;  %v2686_v22 = vpop.f32.mrb[56].mxu1 }
 0x353   : > { %v3535_v15 = vadd.f32 %v2686_v22, %v1982_v21  ;;  %v2688_v24 = vpop.f32.mrb[57].mxu1 }
 0x354   : > { %v3536_v38 = vadd.f32 %v2688_v24, %v1982_v21  ;;  %v2690_v26 = vpop.f32.mrb[58].mxu1  ;;  %3019 = vmatprep.subr.bf16.mxu0 %v2812_v35  ;;  %v2851_v24 = vpop.permute.xlu1 %2850 }
 0x355   : > { %v3537_v28 = vadd.f32 %v2690_v26, %v1987_v25  ;;  %v2692_v29 = vpop.f32.mrb[59].mxu1  ;;  %3020 = vmatpush1.bf16.msra.mxu0 %v2811_v18  ;;  %v2761_v33 = vmax.f32 %v3535_v15, 0.0  ;;  %v2846_v18 = vpop.permute.xlu0 %2845 }
 0x356   : > { %v3538_v32 = vadd.f32 %v2692_v29, %v1987_v25  ;;  %v2762_v36 = vmax.f32 %v3536_v38, 0.0 }
 0x357   : > { %v2763_v34 = vmax.f32 %v3537_v28, 0.0 }
 0x358   : > { %v2764_v19 = vmax.f32 %v3538_v32, 0.0 }
 0x359   : > { %v2813_v37 = vpack.c.bf16 %v2763_v34, %v2761_v33 }
 0x35a   : > { %v2814_v39 = vpack.c.bf16 %v2764_v19, %v2762_v36  ;;  %v2696_v40 = vpop.f32.mrb[60].mxu1 }
 0x35b   : > { %v3539_v41 = vadd.f32 %v2696_v40, %v1992_v42  ;;  %v2698_v20 = vpop.f32.mrb[61].mxu1 }
 0x35c   : > { %v3540_v43 = vadd.f32 %v2698_v20, %v1992_v42  ;;  %v2700_v46 = vpop.f32.mrb[62].mxu1  ;;  %3021 = vmatprep.subr.bf16.mxu0 %v2814_v39  ;;  %v2861_v20 = vpop.permute.xlu1 %2860 }
 0x35d   : > { %v3541_v47 = vadd.f32 %v2700_v46, %v1997_v44  ;;  %v2702_v48 = vpop.f32.mrb[63].mxu1  ;;  %3022 = vmatpush1.bf16.msra.mxu0 %v2813_v37  ;;  %v2765_v50 = vmax.f32 %v3539_v41, 0.0  ;;  %v2856_v37 = vpop.permute.xlu0 %2855 }
 0x35e   : > { %v3542_v49 = vadd.f32 %v2702_v48, %v1997_v44  ;;  %v2766_v52 = vmax.f32 %v3540_v43, 0.0 }
 0x35f   : > { %v2767_v51 = vmax.f32 %v3541_v47, 0.0 }
 0x360   : > { %v2768_v53 = vmax.f32 %v3542_v49, 0.0 }
 0x361   : > { %v2815_v23 = vpack.c.bf16 %v2767_v51, %v2765_v50 }
 0x362   : > { %v2816_v54 = vpack.c.bf16 %v2768_v53, %v2766_v52 }
 0x364   : > { %3023 = vmatprep.subr.bf16.mxu0 %v2816_v54 }
 0x365   : > { %3024 = vmatpush1.bf16.msra.mxu0 %v2815_v23  ;;  %v2866_v23 = vpop.permute.xlu0 %2865 }
 0x368   : > { %3026 = vmatmul.mubr.bf16.vlgmr.msra.gmra.mrb[128].mxu0 %v3806_v55 }
 0x369   : > { %3035 = vmatprep.mubr.bf16.mxu0 %v3809_v45 }
 0x370   : > { %3036 = vmatmul.mubr.bf16.gmra.mrb[132].mxu0 %v3811_v56 }
 0x371   : > { %3045 = vmatprep.mubr.bf16.mxu0 %v3812_v57  ;;  %v2871_v57 = vpop.permute.xlu1 %2870 }
 0x378   : > { %3046 = vmatmul.mubr.bf16.gmra.mrb[136].mxu0 %v3814_v27 }
 0x379   : > { %3055 = vmatprep.mubr.bf16.mxu0 %v3815_v58 }
 0x380   : > { %3056 = vmatmul.mubr.bf16.gmra.mrb[140].mxu0 %v3817_v59 }
 0x381   : > { %3065 = vmatprep.mubr.bf16.mxu0 %v3818_v60 }
 0x388   : > { %3066 = vmatmul.mubr.bf16.gmra.mrb[144].mxu0 %v3820_v61 }
 0x389   : > { %3075 = vmatprep.mubr.bf16.mxu0 %v3821_v62 }
 0x390   : > { %3076 = vmatmul.mubr.bf16.gmra.mrb[148].mxu0 %v3823_v63 }
 0x391   : > { %3085 = vmatprep.mubr.bf16.mxu0 %v3824_v0 }
 0x398   : > { %3086 = vmatmul.mubr.bf16.gmra.mrb[152].mxu0 %v3826_v1 }
 0x399   : > { %3095 = vmatprep.mubr.bf16.mxu0 %v3827_v2 }
 0x3a0   : > { %3096 = vmatmul.mubr.bf16.gmra.mrb[156].mxu0 %v3829_v8  ;;  %v2876_v8 = vpop.permute.xlu0 %2875 }
 0x43b   : > { %v3027_v4 = vpop.f32.mrb[128].mxu0 }
 0x43c   : > { %v3028_v30 = vadd.f32 %v3027_v4, %v2836_v3  ;;  %v3029_v5 = vpop.f32.mrb[129].mxu0 }
 0x43d   : > { %v3030_v9 = vadd.f32 %v3029_v5, %v2836_v3  ;;  %v3031_v10 = vpop.f32.mrb[130].mxu0 }
 0x43e   : > { %v3032_v31 = vadd.f32 %v3031_v10, %v2841_v6  ;;  %v3033_v11 = vpop.f32.mrb[131].mxu0  ;;  %v3106_v13 = vmax.f32 %v3028_v30, 0.0 }
 0x43f   : > { %v3034_v12 = vadd.f32 %v3033_v11, %v2841_v6  ;;  %v3107_v16 = vmax.f32 %v3030_v9, 0.0  ;;  %v2881_v6 = vpop.permute.xlu1 %2880 }
 0x440   : > { %v3108_v14 = vmax.f32 %v3032_v31, 0.0 }
 0x441   : > { %v3109_v7 = vmax.f32 %v3034_v12, 0.0 }
 0x442   : > { %v3139_v17 = vpack.c.bf16 %v3108_v14, %v3106_v13 }
 0x443   : > { %v3140_v21 = vpack.c.bf16 %v3109_v7, %v3107_v16  ;;  %v3037_v35 = vpop.f32.mrb[132].mxu0 }
 0x444   : > { %v3038_v22 = vadd.f32 %v3037_v35, %v2846_v18  ;;  %v3039_v15 = vpop.f32.mrb[133].mxu0 }
 0x445   : > { %v3040_v25 = vadd.f32 %v3039_v15, %v2846_v18  ;;  %v3041_v38 = vpop.f32.mrb[134].mxu0  ;;  %3161 = vmatprep.subr.bf16.mxu1 %v3140_v21  ;;  %v2886_v18 = vpop.permute.xlu0 %2885 }
 0x446   : > { %v3042_v26 = vadd.f32 %v3041_v38, %v2851_v24  ;;  %v3043_v28 = vpop.f32.mrb[135].mxu0  ;;  %3162 = vmatpush1.bf16.msra.mxu1 %v3139_v17  ;;  %v3110_v32 = vmax.f32 %v3038_v22, 0.0 }
 0x447   : > { %v3044_v29 = vadd.f32 %v3043_v28, %v2851_v24  ;;  %v3111_v34 = vmax.f32 %v3040_v25, 0.0  ;;  %v2891_v24 = vpop.permute.xlu1 %2890 }
 0x448   : > { %v3112_v33 = vmax.f32 %v3042_v26, 0.0 }
 0x449   : > { %v3113_v36 = vmax.f32 %v3044_v29, 0.0 }
 0x44a   : > { %v3141_v19 = vpack.c.bf16 %v3112_v33, %v3110_v32 }
 0x44b   : > { %v3142_v42 = vpack.c.bf16 %v3113_v36, %v3111_v34  ;;  %v3047_v39 = vpop.f32.mrb[136].mxu0 }
 0x44c   : > { %v3048_v40 = vadd.f32 %v3047_v39, %v2856_v37  ;;  %v3049_v41 = vpop.f32.mrb[137].mxu0 }
 0x44d   : > { %v3050_v44 = vadd.f32 %v3049_v41, %v2856_v37  ;;  %v3051_v43 = vpop.f32.mrb[138].mxu0  ;;  %3163 = vmatprep.subr.bf16.mxu1 %v3142_v42  ;;  %v2896_v37 = vpop.permute.xlu0 %2895 }
 0x44e   : > { %v3052_v46 = vadd.f32 %v3051_v43, %v2861_v20  ;;  %v3053_v47 = vpop.f32.mrb[139].mxu0  ;;  %3164 = vmatpush1.bf16.msra.mxu1 %v3141_v19  ;;  %v3114_v49 = vmax.f32 %v3048_v40, 0.0 }
 0x44f   : > { %v3054_v48 = vadd.f32 %v3053_v47, %v2861_v20  ;;  %v3115_v51 = vmax.f32 %v3050_v44, 0.0  ;;  %v2901_v20 = vpop.permute.xlu1 %2900 }
 0x450   : > { %v3116_v50 = vmax.f32 %v3052_v46, 0.0 }
 0x451   : > { %v3117_v52 = vmax.f32 %v3054_v48, 0.0 }
 0x452   : > { %v3143_v53 = vpack.c.bf16 %v3116_v50, %v3114_v49 }
 0x453   : > { %v3144_v54 = vpack.c.bf16 %v3117_v52, %v3115_v51  ;;  %v3057_v55 = vpop.f32.mrb[140].mxu0 }
 0x454   : > { %v3058_v45 = vadd.f32 %v3057_v55, %v2866_v23  ;;  %v3059_v56 = vpop.f32.mrb[141].mxu0 }
 0x455   : > { %v3060_v27 = vadd.f32 %v3059_v56, %v2866_v23  ;;  %v3061_v58 = vpop.f32.mrb[142].mxu0  ;;  %3165 = vmatprep.subr.bf16.mxu1 %v3144_v54  ;;  %v2906_v23 = vpop.permute.xlu0 %2905 }
 0x456   : > { %v3062_v59 = vadd.f32 %v3061_v58, %v2871_v57  ;;  %v3063_v60 = vpop.f32.mrb[143].mxu0  ;;  %3166 = vmatpush1.bf16.msra.mxu1 %v3143_v53  ;;  %v3118_v62 = vmax.f32 %v3058_v45, 0.0 }
 0x457   : > { %v3064_v61 = vadd.f32 %v3063_v60, %v2871_v57  ;;  %v3119_v0 = vmax.f32 %v3060_v27, 0.0  ;;  %v2911_v57 = vpop.permute.xlu1 %2910 }
 0x458   : > { %v3120_v63 = vmax.f32 %v3062_v59, 0.0 }
 0x459   : > { %v3121_v1 = vmax.f32 %v3064_v61, 0.0 }
 0x45a   : > { %v3145_v2 = vpack.c.bf16 %v3120_v63, %v3118_v62 }
 0x45b   : > { %v3146_v3 = vpack.c.bf16 %v3121_v1, %v3119_v0  ;;  %v3067_v4 = vpop.f32.mrb[144].mxu0 }
 0x45c   : > { %v3068_v30 = vadd.f32 %v3067_v4, %v2876_v8  ;;  %v3069_v5 = vpop.f32.mrb[145].mxu0  ;;  %v3159_v4 = vpop.permute.xlu0 %3158 }
 0x45d   : > { %v3070_v9 = vadd.f32 %v3069_v5, %v2876_v8  ;;  %v3071_v10 = vpop.f32.mrb[146].mxu0  ;;  %3167 = vmatprep.subr.bf16.mxu1 %v3146_v3  ;;  %v3138_v3 = vld [vmem:[%s4720_s7] sm:$0xf] }
 0x45e   : > { %v3072_v31 = vadd.f32 %v3071_v10, %v2881_v6  ;;  %v3073_v11 = vpop.f32.mrb[147].mxu0  ;;  %3168 = vmatpush1.bf16.msra.mxu1 %v3145_v2  ;;  %v3122_v13 = vmax.f32 %v3068_v30, 0.0 }
 0x45f   : > { %v3074_v12 = vadd.f32 %v3073_v11, %v2881_v6  ;;  %v3123_v16 = vmax.f32 %v3070_v9, 0.0 }
 0x460   : > { %v3124_v14 = vmax.f32 %v3072_v31, 0.0 }
 0x461   : > { %v3125_v7 = vmax.f32 %v3074_v12, 0.0 }
 0x462   : > { %v3147_v17 = vpack.c.bf16 %v3124_v14, %v3122_v13 }
 0x463   : > { %v3148_v21 = vpack.c.bf16 %v3125_v7, %v3123_v16  ;;  %v3077_v35 = vpop.f32.mrb[148].mxu0 }
 0x464   : > { %v3078_v22 = vadd.f32 %v3077_v35, %v2886_v18  ;;  %v3079_v15 = vpop.f32.mrb[149].mxu0 }
 0x465   : > { %v3080_v25 = vadd.f32 %v3079_v15, %v2886_v18  ;;  %v3081_v38 = vpop.f32.mrb[150].mxu0  ;;  %3169 = vmatprep.subr.bf16.mxu1 %v3148_v21 }
 0x466   : > { %v3082_v26 = vadd.f32 %v3081_v38, %v2891_v24  ;;  %v3083_v28 = vpop.f32.mrb[151].mxu0  ;;  %3170 = vmatpush1.bf16.msra.mxu1 %v3147_v17  ;;  %v3126_v32 = vmax.f32 %v3078_v22, 0.0 }
 0x467   : > { %v3084_v29 = vadd.f32 %v3083_v28, %v2891_v24  ;;  %v3127_v34 = vmax.f32 %v3080_v25, 0.0 }
 0x468   : > { %v3128_v33 = vmax.f32 %v3082_v26, 0.0 }
 0x469   : > { %v3129_v36 = vmax.f32 %v3084_v29, 0.0 }
 0x46a   : > { %v3149_v19 = vpack.c.bf16 %v3128_v33, %v3126_v32 }
 0x46b   : > { %v3150_v42 = vpack.c.bf16 %v3129_v36, %v3127_v34  ;;  %v3087_v39 = vpop.f32.mrb[152].mxu0 }
 0x46c   : > { %v3088_v40 = vadd.f32 %v3087_v39, %v2896_v37  ;;  %v3089_v41 = vpop.f32.mrb[153].mxu0 }
 0x46d   : > { %v3090_v44 = vadd.f32 %v3089_v41, %v2896_v37  ;;  %v3091_v43 = vpop.f32.mrb[154].mxu0  ;;  %3171 = vmatprep.subr.bf16.mxu1 %v3150_v42 }
 0x46e   : > { %v3092_v46 = vadd.f32 %v3091_v43, %v2901_v20  ;;  %v3093_v47 = vpop.f32.mrb[155].mxu0  ;;  %3172 = vmatpush1.bf16.msra.mxu1 %v3149_v19  ;;  %v3130_v49 = vmax.f32 %v3088_v40, 0.0 }
 0x46f   : > { %v3094_v48 = vadd.f32 %v3093_v47, %v2901_v20  ;;  %v3131_v51 = vmax.f32 %v3090_v44, 0.0 }
 0x470   : > { %v3132_v50 = vmax.f32 %v3092_v46, 0.0 }
 0x471   : > { %v3133_v52 = vmax.f32 %v3094_v48, 0.0 }
 0x472   : > { %v3151_v53 = vpack.c.bf16 %v3132_v50, %v3130_v49 }
 0x473   : > { %v3152_v54 = vpack.c.bf16 %v3133_v52, %v3131_v51  ;;  %v3097_v55 = vpop.f32.mrb[156].mxu0 }
 0x474   : > { %v3098_v45 = vadd.f32 %v3097_v55, %v2906_v23  ;;  %v3099_v56 = vpop.f32.mrb[157].mxu0 }
 0x475   : > { %v3100_v27 = vadd.f32 %v3099_v56, %v2906_v23  ;;  %v3101_v58 = vpop.f32.mrb[158].mxu0  ;;  %3173 = vmatprep.subr.bf16.mxu1 %v3152_v54 }
 0x476   : > { %v3102_v59 = vadd.f32 %v3101_v58, %v2911_v57  ;;  %v3103_v60 = vpop.f32.mrb[159].mxu0  ;;  %3174 = vmatpush1.bf16.msra.mxu1 %v3151_v53  ;;  %v3134_v62 = vmax.f32 %v3098_v45, 0.0 }
 0x477   : > { %v3104_v61 = vadd.f32 %v3103_v60, %v2911_v57  ;;  %v3135_v0 = vmax.f32 %v3100_v27, 0.0 }
 0x478   : > { %v3136_v63 = vmax.f32 %v3102_v59, 0.0 }
 0x479   : > { %v3137_v1 = vmax.f32 %v3104_v61, 0.0 }
 0x47a   : > { %v3153_v2 = vpack.c.bf16 %v3136_v63, %v3134_v62 }
 0x47b   : > { %v3154_v8 = vpack.c.bf16 %v3137_v1, %v3135_v0 }
 0x47d   : > { %3175 = vmatprep.subr.bf16.mxu1 %v3154_v8 }
 0x47e   : > { %3176 = vmatpush1.bf16.msra.mxu1 %v3153_v2 }
 0x481   : > { %3194 = vmatmul.mubr.bf16.vlgmr.msra.gmra.mrb[64].mxu1 %v3138_v3 }
 0x554   : > { %v3195_v30 = vpop.f32.mrb[64].mxu1 }
 0x555   : > { %v3196_v5 = vadd.f32 %v3195_v30, %v3159_v4  ;;  %v3197_v6 = vpop.f32.mrb[65].mxu1 }
 0x556   : > { %v3198_v9 = vadd.f32 %v3197_v6, %v3159_v4  ;;  %v3199_v10 = vpop.f32.mrb[66].mxu1 }
 0x557   : > { %3202 = vst [vmem:[%s442_s20] sm:$0xff] %v3196_v5  ;;  %v3200_v31 = vpop.f32.mrb[67].mxu1 }
 0x558   : > { %3203 = vst [vmem:[%s442_s20 + $0x8] sm:$0xff] %v3198_v9 }
 0x559 PF: > { %s19_s15 = sadd.s32 1, %s3884_s15   ;;  %s4725_s21 = sld [smem:[#allocation3_spill]] }
 0x55a   : > { %p16_p12 = scmp.ge.s32.totalorder %s19_s15, 6   ;;  %s4726_s30 = smov %s3864_s10 }
 0x55b   : > { %s4727_s10 = smov %s3988_s22  ;;  %s4728_s11 = smov %s3876_s13 }
 0x55c   : > { %s4729_s12 = smov %s3880_s14  ;;  %s4730_s13 = smov %s4733_s16 }
 0x55d   :  { %18 = sbr.rel (!%p16_p12) target bundleno = 4 (0x4), region = 132 }
 0x55f   : > { %s4731_s14 = smov %s4725_s21 }

</bundles_post_ra>
